<compile_context>
chip_gen: v5e
topology: v5e:2x2
jax: 0.10.0
libtpu: 0.0.40
codegen_flags: <defaults>
</compile_context>

<pallas_src>
import jax
import jax.numpy as jnp
from jax.experimental import pallas as pl
from jax.experimental.pallas import tpu as pltpu

LANE = 128


def _round_up(x, m):
    return -(-x // m) * m


def _pad2(x, rows, cols):
    return jnp.pad(x, ((0, rows - x.shape[0]), (0, cols - x.shape[1])))


# ----------------------------------------------------------------------------
# Pallas kernels
# ----------------------------------------------------------------------------
def _conv_tanh_pool_kernel(a0_ref, a1_ref, a2_ref, a3_ref, w_ref, b_ref, o_ref):
    """One M-tile of: mean over the 4 pool corners of tanh(corner @ W + b).

    a*: (tm, Kp)  bf16 im2col patches, one per 2x2 pool-window corner
    w : (Kp, 128) bf16 zero-padded conv weights (K and Cout padded)
    b : (1, 128)  f32  zero-padded bias
    o : (tm, 128) f32  lane-dense pooled + activated output
    """
    w = w_ref[...]
    b = b_ref[...]
    acc = jnp.tanh(jnp.dot(a0_ref[...], w, preferred_element_type=jnp.float32) + b)
    acc = acc + jnp.tanh(jnp.dot(a1_ref[...], w, preferred_element_type=jnp.float32) + b)
    acc = acc + jnp.tanh(jnp.dot(a2_ref[...], w, preferred_element_type=jnp.float32) + b)
    acc = acc + jnp.tanh(jnp.dot(a3_ref[...], w, preferred_element_type=jnp.float32) + b)
    o_ref[...] = acc * 0.25


def _fc_fused_kernel(x_ref, w1_ref, b1_ref, w2_ref, b2_ref, w3_ref, b3_ref, o_ref):
    """sigmoid(tanh(tanh(x@W1+b1)@W2+b2)@W3+b3); all weights VMEM-resident.

    Padded hidden columns stay exactly zero because the padded weight columns
    and bias entries are zero (tanh(0) == 0), so the chain stays correct.
    """
    h = jnp.tanh(
        jnp.dot(x_ref[...], w1_ref[...], preferred_element_type=jnp.float32) + b1_ref[...]
    )
    h = jnp.tanh(
        jnp.dot(h, w2_ref[...], preferred_element_type=jnp.float32) + b2_ref[...]
    )
    y = jnp.dot(h, w3_ref[...], preferred_element_type=jnp.float32) + b3_ref[...]
    o_ref[...] = jax.nn.sigmoid(y)


# ----------------------------------------------------------------------------
# Pallas wrappers
# ----------------------------------------------------------------------------
def conv_tanh_pool(corners, w_pad, b_pad, cout, max_tm=1024):
    """Fused conv+tanh+avgpool.  corners: 4x (M, Kp) bf16 -> (M, cout) f32."""
    M, Kp = corners[0].shape
    Np = w_pad.shape[1]
    # Keep >=2 grid tiles (v7x has 2 TensorCores); round tile to 16 sublanes
    # for clean bf16 packing; cap the tile so large batches still pipeline.
    ntiles = max(2, pl.cdiv(M, max_tm))
    tm = _round_up(pl.cdiv(M, ntiles), 16)
    Mp = tm * ntiles
    corners = [jnp.pad(c, ((0, Mp - M), (0, 0))) for c in corners]

    out = pl.pallas_call(
        _conv_tanh_pool_kernel,
        out_shape=jax.ShapeDtypeStruct((Mp, Np), jnp.float32),
        grid=(ntiles,),
        in_specs=[pl.BlockSpec((tm, Kp), lambda i: (i, 0)) for _ in range(4)]
        + [
            pl.BlockSpec((Kp, Np), lambda i: (0, 0)),   # weights resident
            pl.BlockSpec((1, Np), lambda i: (0, 0)),    # bias resident
        ],
        out_specs=pl.BlockSpec((tm, Np), lambda i: (i, 0)),
        compiler_params=pltpu.CompilerParams(dimension_semantics=("parallel",)),
    )(*corners, w_pad, b_pad)
    return out[:M, :cout]


def fc_fused(x, fw1, fb1, fw2, fb2, fw3, fb3, n_out=1):
    """Single Pallas call for Linear->Tanh->Linear->Tanh->Linear->Sigmoid."""
    M = x.shape[0]
    Mp = max(8, _round_up(M, 8))          # pad batch only to the sublane size
    x_p = jnp.pad(x, ((0, Mp - M), (0, 0)))
    out = pl.pallas_call(
        _fc_fused_kernel,
        out_shape=jax.ShapeDtypeStruct((Mp, fw3.shape[1]), jnp.float32),
    )(x_p, fw1, fb1, fw2, fb2, fw3, fb3)
    return out[:M, :n_out]


# ----------------------------------------------------------------------------
# Glue: corner-only im2col (only pool-consumed conv positions are gathered)
# ----------------------------------------------------------------------------
def corner_patches(x, k, stride, di, dj, ph, pw):
    """x: NHWC.  im2col rows for conv outputs at (di + stride*p, dj + stride*q).

    Feature order is ((ki*k + kj)*C + c), matching the stored weight layout.
    """
    n = x.shape[0]
    c = x.shape[3]
    cols = []
    for ki in range(k):
        for kj in range(k):
            r0 = di + ki
            c0 = dj + kj
            cols.append(
                x[:, r0:r0 + stride * (ph - 1) + 1:stride,
                     c0:c0 + stride * (pw - 1) + 1:stride, :]
            )
    patches = jnp.concatenate(cols, axis=-1)          # (n, ph, pw, k*k*c)
    return patches.reshape(n * ph * pw, k * k * c)


# ----------------------------------------------------------------------------
# Parameter init: stored once in padded, matmul-ready layout (no per-call casts)
# ----------------------------------------------------------------------------
def init_params(key):
    def dense(k, fan_in, shape):
        scale = 1.0 / jnp.sqrt(jnp.float32(fan_in))
        return jax.random.uniform(k, shape, jnp.float32, -scale, scale)

    ks = jax.random.split(key, 10)
    # Conv weights in im2col matmul form ((kh, kw, cin) -> cout).
    # TODO(synk): real PyTorch Conv2d weights (O,I,kh,kw) must be permuted to
    # (kh,kw,I,O) before reshaping into this layout.
    w1 = dense(ks[0], 3 * 5 * 5, (5 * 5 * 3, 6))
    b1 = dense(ks[1], 3 * 5 * 5, (6,))
    w2 = dense(ks[2], 6 * 5 * 5, (5 * 5 * 6, 16))
    b2 = dense(ks[3], 6 * 5 * 5, (16,))
    fw1 = dense(ks[4], 256, (256, 120))
    fb1 = dense(ks[5], 256, (120,))
    fw2 = dense(ks[6], 120, (120, 84))
    fb2 = dense(ks[7], 120, (84,))
    fw3 = dense(ks[8], 84, (84, 1))
    fb3 = dense(ks[9], 84, (1,))

    return {
        # conv weights: K padded to 128/256, Cout padded to 128, bf16 MXU inputs
        "w1": _pad2(w1, 128, LANE).astype(jnp.bfloat16),
        "b1": _pad2(b1.reshape(1, -1), 1, LANE),
        "w2": _pad2(w2, 256, LANE).astype(jnp.bfloat16),
        "b2": _pad2(b2.reshape(1, -1), 1, LANE),
        # FC weights: lane-padded f32, kept f32 (tiny; epilogue stays f32)
        "fw1": _pad2(fw1, 256, LANE),
        "fb1": _pad2(fb1.reshape(1, -1), 1, LANE),
        "fw2": _pad2(fw2, LANE, LANE),
        "fb2": _pad2(fb2.reshape(1, -1), 1, LANE),
        "fw3": _pad2(fw3, LANE, LANE),
        "fb3": _pad2(fb3.reshape(1, -1), 1, LANE),
    }


# ----------------------------------------------------------------------------
# Forward pass (mirrors CNN.forward)
# ----------------------------------------------------------------------------
def cnn_forward(params, x_nchw):
    # Input is NCHW (PyTorch convention); work in NHWC internally.
    x = jnp.transpose(x_nchw, (0, 2, 3, 1)).astype(jnp.float32)   # (N,128,128,3)
    n, h, w, _ = x.shape
    k, pk, ps = 5, 2, 5                                            # conv k, pool k/s

    # --- Conv1(3->6,k5) + Tanh + AvgPool(2,s=5), fused.
    #     Only the 50x50 (of 124x124) conv positions the pool consumes are built.
    ho, wo = h - k + 1, w - k + 1
    ph, pw = (ho - pk) // ps + 1, (wo - pk) // ps + 1               # 25, 25
    corners = [corner_patches(x, k, ps, di, dj, ph, pw)
               for di in range(pk) for dj in range(pk)]
    kp = _round_up(corners[0].shape[1], LANE)                       # 75 -> 128
    corners = [jnp.pad(c, ((0, 0), (0, kp - c.shape[1]))).astype(jnp.bfloat16)
               for c in corners]
    y = conv_tanh_pool(corners, params["w1"], params["b1"], cout=6)
    y = y.reshape(n, ph, pw, 6)                                     # (N,25,25,6)

    # --- Conv2(6->16,k5) + Tanh + AvgPool(2,s=5), fused (8x8 of 21x21 used).
    h2, w2 = y.shape[1], y.shape[2]
    ho, wo = h2 - k + 1, w2 - k + 1
    ph2, pw2 = (ho - pk) // ps + 1, (wo - pk) // ps + 1             # 4, 4
    corners = [corner_patches(y, k, ps, di, dj, ph2, pw2)
               for di in range(pk) for dj in range(pk)]
    kp = _round_up(corners[0].shape[1], LANE)                       # 150 -> 256
    corners = [jnp.pad(c, ((0, 0), (0, kp - c.shape[1]))).astype(jnp.bfloat16)
               for c in corners]
    z = conv_tanh_pool(corners, params["w2"], params["b2"], cout=16)
    z = z.reshape(n, ph2, pw2, 16)                                  # (N,4,4,16)

    # PyTorch's x.view(N, -1) flattens NCHW order.
    feat = jnp.transpose(z, (0, 3, 1, 2)).reshape(n, 16 * ph2 * pw2)  # (N,256)

    # --- fc_model + final sigmoid, all fused in one Pallas kernel.
    return fc_fused(feat, params["fw1"], params["fb1"],
                    params["fw2"], params["fb2"],
                    params["fw3"], params["fb3"], n_out=1)


if __name__ == "__main__":
    key = jax.random.PRNGKey(0)
    pkey, xkey = jax.random.split(key)
    params = init_params(pkey)
    # 128x128 spatial is forced by the 256-feature flatten (16*4*4) in fc_model.
    x = jax.random.normal(xkey, (2, 3, 128, 128), jnp.float32)

    out = jax.jit(cnn_forward)(params, x)
    out = jax.block_until_ready(out)
    assert out.shape == (2, 1)
    assert bool(jnp.all((out >= 0.0) & (out <= 1.0)))
    assert bool(jnp.all(jnp.isfinite(out)))
    print("KERNEL_OK")
</pallas_src>

<mosaic_0001>
module attributes {stable_mosaic.version = 11 : i64} {
  func.func @_conv_tanh_pool_kernel(%arg0: i32, %arg1: memref<640x128xbf16, #tpu.memory_space<vmem>>, %arg2: memref<640x128xbf16, #tpu.memory_space<vmem>>, %arg3: memref<640x128xbf16, #tpu.memory_space<vmem>>, %arg4: memref<640x128xbf16, #tpu.memory_space<vmem>>, %arg5: memref<128x128xbf16, #tpu.memory_space<vmem>>, %arg6: memref<1x128xf32, #tpu.memory_space<vmem>>, %arg7: memref<640x128xf32, #tpu.memory_space<vmem>>) attributes {dimension_semantics = [#tpu.dimension_semantics<parallel>], iteration_bounds = array<i64: 2>, scalar_prefetch = 0 : i64, scratch_operands = 0 : i64, tpu.core_type = #tpu.core_type<tc>, window_params = [{transform_indices = @transform_0, window_bounds = array<i64: 640, 128>}, {transform_indices = @transform_1, window_bounds = array<i64: 640, 128>}, {transform_indices = @transform_2, window_bounds = array<i64: 640, 128>}, {transform_indices = @transform_3, window_bounds = array<i64: 640, 128>}, {pipeline_mode = #tpu.pipeline_mode<synchronous>, transform_indices = @transform_4, window_bounds = array<i64: 128, 128>}, {pipeline_mode = #tpu.pipeline_mode<synchronous>, transform_indices = @transform_5, window_bounds = array<i64: 1, 128>}, {transform_indices = @transform_6, window_bounds = array<i64: 640, 128>}]} {
    %c0 = arith.constant 0 : index
    %c0_0 = arith.constant 0 : index
    %0 = vector.load %arg5[%c0, %c0_0] : memref<128x128xbf16, #tpu.memory_space<vmem>>, vector<128x128xbf16>
    %c0_1 = arith.constant 0 : index
    %c0_2 = arith.constant 0 : index
    %1 = vector.load %arg6[%c0_1, %c0_2] : memref<1x128xf32, #tpu.memory_space<vmem>>, vector<1x128xf32>
    %c0_3 = arith.constant 0 : index
    %c0_4 = arith.constant 0 : index
    %2 = vector.load %arg1[%c0_3, %c0_4] : memref<640x128xbf16, #tpu.memory_space<vmem>>, vector<640x128xbf16>
    %cst = arith.constant dense<0.000000e+00> : vector<640x128xf32>
    %3 = tpu.matmul %2, %0, %cst {dimension_numbers = #tpu.dot_dimension_numbers<[1], [0], [0], [1], [0, 0, 1, 1], [], []>} : vector<640x128xbf16>, vector<128x128xbf16>, vector<640x128xf32> -> vector<640x128xf32>
    %4 = vector.broadcast %1 : vector<1x128xf32> to vector<640x128xf32>
    %5 = arith.addf %3, %4 : vector<640x128xf32>
    %6 = math.tanh %5 : vector<640x128xf32>
    %c0_5 = arith.constant 0 : index
    %c0_6 = arith.constant 0 : index
    %7 = vector.load %arg2[%c0_5, %c0_6] : memref<640x128xbf16, #tpu.memory_space<vmem>>, vector<640x128xbf16>
    %cst_7 = arith.constant dense<0.000000e+00> : vector<640x128xf32>
    %8 = tpu.matmul %7, %0, %cst_7 {dimension_numbers = #tpu.dot_dimension_numbers<[1], [0], [0], [1], [0, 0, 1, 1], [], []>} : vector<640x128xbf16>, vector<128x128xbf16>, vector<640x128xf32> -> vector<640x128xf32>
    %9 = vector.broadcast %1 : vector<1x128xf32> to vector<640x128xf32>
    %10 = arith.addf %8, %9 : vector<640x128xf32>
    %11 = math.tanh %10 : vector<640x128xf32>
    %12 = arith.addf %6, %11 : vector<640x128xf32>
    %c0_8 = arith.constant 0 : index
    %c0_9 = arith.constant 0 : index
    %13 = vector.load %arg3[%c0_8, %c0_9] : memref<640x128xbf16, #tpu.memory_space<vmem>>, vector<640x128xbf16>
    %cst_10 = arith.constant dense<0.000000e+00> : vector<640x128xf32>
    %14 = tpu.matmul %13, %0, %cst_10 {dimension_numbers = #tpu.dot_dimension_numbers<[1], [0], [0], [1], [0, 0, 1, 1], [], []>} : vector<640x128xbf16>, vector<128x128xbf16>, vector<640x128xf32> -> vector<640x128xf32>
    %15 = vector.broadcast %1 : vector<1x128xf32> to vector<640x128xf32>
    %16 = arith.addf %14, %15 : vector<640x128xf32>
    %17 = math.tanh %16 : vector<640x128xf32>
    %18 = arith.addf %12, %17 : vector<640x128xf32>
    %c0_11 = arith.constant 0 : index
    %c0_12 = arith.constant 0 : index
    %19 = vector.load %arg4[%c0_11, %c0_12] : memref<640x128xbf16, #tpu.memory_space<vmem>>, vector<640x128xbf16>
    %cst_13 = arith.constant dense<0.000000e+00> : vector<640x128xf32>
    %20 = tpu.matmul %19, %0, %cst_13 {dimension_numbers = #tpu.dot_dimension_numbers<[1], [0], [0], [1], [0, 0, 1, 1], [], []>} : vector<640x128xbf16>, vector<128x128xbf16>, vector<640x128xf32> -> vector<640x128xf32>
    %21 = vector.broadcast %1 : vector<1x128xf32> to vector<640x128xf32>
    %22 = arith.addf %20, %21 : vector<640x128xf32>
    %23 = math.tanh %22 : vector<640x128xf32>
    %24 = arith.addf %18, %23 : vector<640x128xf32>
    %cst_14 = arith.constant 2.500000e-01 : f32
    %25 = vector.broadcast %cst_14 : f32 to vector<640x128xf32>
    %26 = arith.mulf %24, %25 : vector<640x128xf32>
    %c0_15 = arith.constant 0 : index
    %c0_16 = arith.constant 0 : index
    %27 = vector.load %arg7[%c0_15, %c0_16] : memref<640x128xf32, #tpu.memory_space<vmem>>, vector<640x128xf32>
    tpu.vector_store %arg7[%c0_15, %c0_16], %26 {strides = array<i32>} : memref<640x128xf32, #tpu.memory_space<vmem>>, vector<640x128xf32>,
    return
  }
  func.func @transform_0(%arg0: i32) -> (i32, i32) {
    %c0_i32 = arith.constant 0 : i32
    %c0_i32_0 = arith.constant 0 : i32
    return %arg0, %c0_i32 : i32, i32
  }
  func.func @transform_1(%arg0: i32) -> (i32, i32) {
    %c0_i32 = arith.constant 0 : i32
    %c0_i32_0 = arith.constant 0 : i32
    return %arg0, %c0_i32 : i32, i32
  }
  func.func @transform_2(%arg0: i32) -> (i32, i32) {
    %c0_i32 = arith.constant 0 : i32
    %c0_i32_0 = arith.constant 0 : i32
    return %arg0, %c0_i32 : i32, i32
  }
  func.func @transform_3(%arg0: i32) -> (i32, i32) {
    %c0_i32 = arith.constant 0 : i32
    %c0_i32_0 = arith.constant 0 : i32
    return %arg0, %c0_i32 : i32, i32
  }
  func.func @transform_4(%arg0: i32) -> (i32, i32) {
    %c0_i32 = arith.constant 0 : i32
    %c0_i32_0 = arith.constant 0 : i32
    %c0_i32_1 = arith.constant 0 : i32
    return %c0_i32, %c0_i32_0 : i32, i32
  }
  func.func @transform_5(%arg0: i32) -> (i32, i32) {
    %c0_i32 = arith.constant 0 : i32
    %c0_i32_0 = arith.constant 0 : i32
    %c0_i32_1 = arith.constant 0 : i32
    return %c0_i32, %c0_i32_0 : i32, i32
  }
  func.func @transform_6(%arg0: i32) -> (i32, i32) {
    %c0_i32 = arith.constant 0 : i32
    %c0_i32_0 = arith.constant 0 : i32
    return %arg0, %c0_i32 : i32, i32
  }
}

module attributes {stable_mosaic.version = 11 : i64} {
  func.func @_conv_tanh_pool_kernel(%arg0: i32, %arg1: memref<16x256xbf16, #tpu.memory_space<vmem>>, %arg2: memref<16x256xbf16, #tpu.memory_space<vmem>>, %arg3: memref<16x256xbf16, #tpu.memory_space<vmem>>, %arg4: memref<16x256xbf16, #tpu.memory_space<vmem>>, %arg5: memref<256x128xbf16, #tpu.memory_space<vmem>>, %arg6: memref<1x128xf32, #tpu.memory_space<vmem>>, %arg7: memref<16x128xf32, #tpu.memory_space<vmem>>) attributes {dimension_semantics = [#tpu.dimension_semantics<parallel>], iteration_bounds = array<i64: 2>, scalar_prefetch = 0 : i64, scratch_operands = 0 : i64, tpu.core_type = #tpu.core_type<tc>, window_params = [{transform_indices = @transform_0, window_bounds = array<i64: 16, 256>}, {transform_indices = @transform_1, window_bounds = array<i64: 16, 256>}, {transform_indices = @transform_2, window_bounds = array<i64: 16, 256>}, {transform_indices = @transform_3, window_bounds = array<i64: 16, 256>}, {pipeline_mode = #tpu.pipeline_mode<synchronous>, transform_indices = @transform_4, window_bounds = array<i64: 256, 128>}, {pipeline_mode = #tpu.pipeline_mode<synchronous>, transform_indices = @transform_5, window_bounds = array<i64: 1, 128>}, {transform_indices = @transform_6, window_bounds = array<i64: 16, 128>}]} {
    %c0 = arith.constant 0 : index
    %c0_0 = arith.constant 0 : index
    %0 = vector.load %arg5[%c0, %c0_0] : memref<256x128xbf16, #tpu.memory_space<vmem>>, vector<256x128xbf16>
    %c0_1 = arith.constant 0 : index
    %c0_2 = arith.constant 0 : index
    %1 = vector.load %arg6[%c0_1, %c0_2] : memref<1x128xf32, #tpu.memory_space<vmem>>, vector<1x128xf32>
    %c0_3 = arith.constant 0 : index
    %c0_4 = arith.constant 0 : index
    %2 = vector.load %arg1[%c0_3, %c0_4] : memref<16x256xbf16, #tpu.memory_space<vmem>>, vector<16x256xbf16>
    %cst = arith.constant dense<0.000000e+00> : vector<16x128xf32>
    %3 = tpu.matmul %2, %0, %cst {dimension_numbers = #tpu.dot_dimension_numbers<[1], [0], [0], [1], [0, 0, 1, 1], [], []>} : vector<16x256xbf16>, vector<256x128xbf16>, vector<16x128xf32> -> vector<16x128xf32>
    %4 = vector.broadcast %1 : vector<1x128xf32> to vector<16x128xf32>
    %5 = arith.addf %3, %4 : vector<16x128xf32>
    %6 = math.tanh %5 : vector<16x128xf32>
    %c0_5 = arith.constant 0 : index
    %c0_6 = arith.constant 0 : index
    %7 = vector.load %arg2[%c0_5, %c0_6] : memref<16x256xbf16, #tpu.memory_space<vmem>>, vector<16x256xbf16>
    %cst_7 = arith.constant dense<0.000000e+00> : vector<16x128xf32>
    %8 = tpu.matmul %7, %0, %cst_7 {dimension_numbers = #tpu.dot_dimension_numbers<[1], [0], [0], [1], [0, 0, 1, 1], [], []>} : vector<16x256xbf16>, vector<256x128xbf16>, vector<16x128xf32> -> vector<16x128xf32>
    %9 = vector.broadcast %1 : vector<1x128xf32> to vector<16x128xf32>
    %10 = arith.addf %8, %9 : vector<16x128xf32>
    %11 = math.tanh %10 : vector<16x128xf32>
    %12 = arith.addf %6, %11 : vector<16x128xf32>
    %c0_8 = arith.constant 0 : index
    %c0_9 = arith.constant 0 : index
    %13 = vector.load %arg3[%c0_8, %c0_9] : memref<16x256xbf16, #tpu.memory_space<vmem>>, vector<16x256xbf16>
    %cst_10 = arith.constant dense<0.000000e+00> : vector<16x128xf32>
    %14 = tpu.matmul %13, %0, %cst_10 {dimension_numbers = #tpu.dot_dimension_numbers<[1], [0], [0], [1], [0, 0, 1, 1], [], []>} : vector<16x256xbf16>, vector<256x128xbf16>, vector<16x128xf32> -> vector<16x128xf32>
    %15 = vector.broadcast %1 : vector<1x128xf32> to vector<16x128xf32>
    %16 = arith.addf %14, %15 : vector<16x128xf32>
    %17 = math.tanh %16 : vector<16x128xf32>
    %18 = arith.addf %12, %17 : vector<16x128xf32>
    %c0_11 = arith.constant 0 : index
    %c0_12 = arith.constant 0 : index
    %19 = vector.load %arg4[%c0_11, %c0_12] : memref<16x256xbf16, #tpu.memory_space<vmem>>, vector<16x256xbf16>
    %cst_13 = arith.constant dense<0.000000e+00> : vector<16x128xf32>
    %20 = tpu.matmul %19, %0, %cst_13 {dimension_numbers = #tpu.dot_dimension_numbers<[1], [0], [0], [1], [0, 0, 1, 1], [], []>} : vector<16x256xbf16>, vector<256x128xbf16>, vector<16x128xf32> -> vector<16x128xf32>
    %21 = vector.broadcast %1 : vector<1x128xf32> to vector<16x128xf32>
    %22 = arith.addf %20, %21 : vector<16x128xf32>
    %23 = math.tanh %22 : vector<16x128xf32>
    %24 = arith.addf %18, %23 : vector<16x128xf32>
    %cst_14 = arith.constant 2.500000e-01 : f32
    %25 = vector.broadcast %cst_14 : f32 to vector<16x128xf32>
    %26 = arith.mulf %24, %25 : vector<16x128xf32>
    %c0_15 = arith.constant 0 : index
    %c0_16 = arith.constant 0 : index
    %27 = vector.load %arg7[%c0_15, %c0_16] : memref<16x128xf32, #tpu.memory_space<vmem>>, vector<16x128xf32>
    tpu.vector_store %arg7[%c0_15, %c0_16], %26 {strides = array<i32>} : memref<16x128xf32, #tpu.memory_space<vmem>>, vector<16x128xf32>,
    return
  }
  func.func @transform_0(%arg0: i32) -> (i32, i32) {
    %c0_i32 = arith.constant 0 : i32
    %c0_i32_0 = arith.constant 0 : i32
    return %arg0, %c0_i32 : i32, i32
  }
  func.func @transform_1(%arg0: i32) -> (i32, i32) {
    %c0_i32 = arith.constant 0 : i32
    %c0_i32_0 = arith.constant 0 : i32
    return %arg0, %c0_i32 : i32, i32
  }
  func.func @transform_2(%arg0: i32) -> (i32, i32) {
    %c0_i32 = arith.constant 0 : i32
    %c0_i32_0 = arith.constant 0 : i32
    return %arg0, %c0_i32 : i32, i32
  }
  func.func @transform_3(%arg0: i32) -> (i32, i32) {
    %c0_i32 = arith.constant 0 : i32
    %c0_i32_0 = arith.constant 0 : i32
    return %arg0, %c0_i32 : i32, i32
  }
  func.func @transform_4(%arg0: i32) -> (i32, i32) {
    %c0_i32 = arith.constant 0 : i32
    %c0_i32_0 = arith.constant 0 : i32
    %c0_i32_1 = arith.constant 0 : i32
    return %c0_i32, %c0_i32_0 : i32, i32
  }
  func.func @transform_5(%arg0: i32) -> (i32, i32) {
    %c0_i32 = arith.constant 0 : i32
    %c0_i32_0 = arith.constant 0 : i32
    %c0_i32_1 = arith.constant 0 : i32
    return %c0_i32, %c0_i32_0 : i32, i32
  }
  func.func @transform_6(%arg0: i32) -> (i32, i32) {
    %c0_i32 = arith.constant 0 : i32
    %c0_i32_0 = arith.constant 0 : i32
    return %arg0, %c0_i32 : i32, i32
  }
}

module attributes {stable_mosaic.version = 11 : i64} {
  func.func @_fc_fused_kernel(%arg0: memref<8x256xf32, #tpu.memory_space<vmem>>, %arg1: memref<256x128xf32, #tpu.memory_space<vmem>>, %arg2: memref<1x128xf32, #tpu.memory_space<vmem>>, %arg3: memref<128x128xf32, #tpu.memory_space<vmem>>, %arg4: memref<1x128xf32, #tpu.memory_space<vmem>>, %arg5: memref<128x128xf32, #tpu.memory_space<vmem>>, %arg6: memref<1x128xf32, #tpu.memory_space<vmem>>, %arg7: memref<8x128xf32, #tpu.memory_space<vmem>>) attributes {dimension_semantics = [], scalar_prefetch = 0 : i64, scratch_operands = 0 : i64, tpu.core_type = #tpu.core_type<tc>} {
    %c0 = arith.constant 0 : index
    %c0_0 = arith.constant 0 : index
    %0 = vector.load %arg0[%c0, %c0_0] : memref<8x256xf32, #tpu.memory_space<vmem>>, vector<8x256xf32>
    %c0_1 = arith.constant 0 : index
    %c0_2 = arith.constant 0 : index
    %1 = vector.load %arg1[%c0_1, %c0_2] : memref<256x128xf32, #tpu.memory_space<vmem>>, vector<256x128xf32>
    %cst = arith.constant dense<0.000000e+00> : vector<8x128xf32>
    %2 = tpu.matmul %0, %1, %cst {dimension_numbers = #tpu.dot_dimension_numbers<[1], [0], [0], [1], [0, 0, 1, 1], [], []>} : vector<8x256xf32>, vector<256x128xf32>, vector<8x128xf32> -> vector<8x128xf32>
    %c0_3 = arith.constant 0 : index
    %c0_4 = arith.constant 0 : index
    %3 = vector.load %arg2[%c0_3, %c0_4] : memref<1x128xf32, #tpu.memory_space<vmem>>, vector<1x128xf32>
    %4 = vector.broadcast %3 : vector<1x128xf32> to vector<8x128xf32>
    %5 = arith.addf %2, %4 : vector<8x128xf32>
    %6 = math.tanh %5 : vector<8x128xf32>
    %c0_5 = arith.constant 0 : index
    %c0_6 = arith.constant 0 : index
    %7 = vector.load %arg3[%c0_5, %c0_6] : memref<128x128xf32, #tpu.memory_space<vmem>>, vector<128x128xf32>
    %cst_7 = arith.constant dense<0.000000e+00> : vector<8x128xf32>
    %8 = tpu.matmul %6, %7, %cst_7 {dimension_numbers = #tpu.dot_dimension_numbers<[1], [0], [0], [1], [0, 0, 1, 1], [], []>} : vector<8x128xf32>, vector<128x128xf32>, vector<8x128xf32> -> vector<8x128xf32>
    %c0_8 = arith.constant 0 : index
    %c0_9 = arith.constant 0 : index
    %9 = vector.load %arg4[%c0_8, %c0_9] : memref<1x128xf32, #tpu.memory_space<vmem>>, vector<1x128xf32>
    %10 = vector.broadcast %9 : vector<1x128xf32> to vector<8x128xf32>
    %11 = arith.addf %8, %10 : vector<8x128xf32>
    %12 = math.tanh %11 : vector<8x128xf32>
    %c0_10 = arith.constant 0 : index
    %c0_11 = arith.constant 0 : index
    %13 = vector.load %arg5[%c0_10, %c0_11] : memref<128x128xf32, #tpu.memory_space<vmem>>, vector<128x128xf32>
    %cst_12 = arith.constant dense<0.000000e+00> : vector<8x128xf32>
    %14 = tpu.matmul %12, %13, %cst_12 {dimension_numbers = #tpu.dot_dimension_numbers<[1], [0], [0], [1], [0, 0, 1, 1], [], []>} : vector<8x128xf32>, vector<128x128xf32>, vector<8x128xf32> -> vector<8x128xf32>
    %c0_13 = arith.constant 0 : index
    %c0_14 = arith.constant 0 : index
    %15 = vector.load %arg6[%c0_13, %c0_14] : memref<1x128xf32, #tpu.memory_space<vmem>>, vector<1x128xf32>
    %16 = vector.broadcast %15 : vector<1x128xf32> to vector<8x128xf32>
    %17 = arith.addf %14, %16 : vector<8x128xf32>
    %18 = arith.negf %17 : vector<8x128xf32>
    %19 = math.exp %18 : vector<8x128xf32>
    %cst_15 = arith.constant 1.000000e+00 : f32
    %20 = vector.broadcast %cst_15 : f32 to vector<8x128xf32>
    %21 = arith.addf %20, %19 : vector<8x128xf32>
    %22 = arith.divf %20, %21 : vector<8x128xf32>
    %c0_16 = arith.constant 0 : index
    %c0_17 = arith.constant 0 : index
    %23 = vector.load %arg7[%c0_16, %c0_17] : memref<8x128xf32, #tpu.memory_space<vmem>>, vector<8x128xf32>
    tpu.vector_store %arg7[%c0_16, %c0_17], %22 {strides = array<i32>} : memref<8x128xf32, #tpu.memory_space<vmem>>, vector<8x128xf32>,
    return
  }
}

</mosaic_0001>

<bundles_post_ra>
// kernel: cnn_forward.3
= control target key start
LH: loop header
LB: loop body
LE: loop exit
PB: predicated region body
PF: predicated region fallthrough
CT: control target
= control target key end

     0   :  { %s4864_s21 = smov 0   ;;  %s5508_s0 = inlined_call_operand.vmem [shape: bf16[1280,128], index: 0, kind: input, shape index: {}]   ;;  %s5509_s1 = inlined_call_operand.vmem [shape: bf16[1280,128], index: 1, kind: input, shape index: {}]   ;;  %s5510_s2 = inlined_call_operand.vmem [shape: bf16[1280,128], index: 2, kind: input, shape index: {}]   ;;  %s5511_s3 = inlined_call_operand.vmem [shape: bf16[1280,128], index: 3, kind: input, shape index: {}]   ;;  %s5512_s4 = inlined_call_operand.vmem [shape: bf16[128,128], index: 4, kind: input, shape index: {}]   ;;  %s5513_s5 = inlined_call_operand.vmem [shape: f32[1,128], index: 5, kind: input, shape index: {}]   ;;  %s5514_s6 = inlined_call_operand.vmem [shape: f32[1280,128], index: 6, kind: output, shape index: {}]  }
   0x1 LB: > { %s3317_s22 = sadd.s32 4294967295, %s4827_s21   ;;  %p3321_p0 = scmp.ge.s32.totalorder %s4827_s21, 1  ;;  %s4827_s21 = sphi %s4864_s21, %s16_s21  }
   0x2   : > { %p246_p1 = scmp.lt.s32.totalorder %s4827_s21, 3 }
   0x4   : > { %p247_p2 = pnand %p3321_p0, %p246_p1 }
   0x5   : > { %s291_s7 = smul.u32 (!%p247_p2), 80, %s3317_s22 }
   0x6   : > { %250 = sbr.rel (%p247_p2) target bundleno = 824 (0x338), region = 44 }
   0x7   : > { %p292_p3 = scmp.lt.s32.totalorder (!%p247_p2), %s291_s7, 159 }
   0xb   : > { %v4008_v0 = vld [vmem:[%s5512_s4 + $0x38] sm:$0xff]  ;;  %v4007_v1 = vld [vmem:[%s5512_s4 + $0x30] sm:$0xff]  ;;  %v4006_v2 = vld [vmem:[%s5512_s4 + $0x28] sm:$0xff]  ;;  %s5516_s7 = smov (!%p292_p3, %s291_s7), 159 }
   0xc   : > { %709 = vmatpush.bf16.msra.mxu0 %v4008_v0  ;;  %1318 = vmatpush.bf16.msra.mxu1 %v4008_v0  ;;  %v4005_v3 = vld [vmem:[%s5512_s4 + $0x20] sm:$0xff]  ;;  %v4004_v4 = vld [vmem:[%s5512_s4 + $0x18] sm:$0xff]  ;;  %v4003_v5 = vld [vmem:[%s5512_s4 + $0x10] sm:$0xff]  ;;  %s3322_s14 = sshll.u32 %s5516_s7, 2  ;;  %s3326_s9 = sshll.u32 %s5516_s7, 3 }
   0xd   : > { %2007 = vmatpush.bf16.msra.mxu2 %v4008_v0  ;;  %2696 = vmatpush.bf16.msra.mxu3 %v4008_v0  ;;  %v4002_v6 = vld [vmem:[%s5512_s4 + $0x8] sm:$0xff]  ;;  %v4001_v7 = vld [vmem:[%s5512_s4] sm:$0xff]  ;;  %s4902_s19 = scalar_lea.vmem %s5508_s0, %s3322_s14  ;;  %s4907_s23 = scalar_lea.vmem %s5509_s1, %s3322_s14 }
   0xe   : > { %s4912_s26 = scalar_lea.vmem %s5510_s2, %s3322_s14  ;;  %s4917_s29 = scalar_lea.vmem %s5511_s3, %s3322_s14  ;;  %v4009_v8 = vld [vmem:[%s4902_s19] sm:$0xff]  ;;  %v4010_v12 = vld [vmem:[%s4902_s19 + $0x8] sm:$0xff]  ;;  %v4011_v16 = vld [vmem:[%s4902_s19 + $0x10] sm:$0xff] }
   0xf   : > { %v4049_v9 = vld [vmem:[%s4907_s23] sm:$0xff]  ;;  %v4050_v13 = vld [vmem:[%s4907_s23 + $0x8] sm:$0xff]  ;;  %v4051_v17 = vld [vmem:[%s4907_s23 + $0x10] sm:$0xff]  ;;  %s4978_s12 = scalar_lea.vmem %s5514_s6, %s3326_s9 }
  0x10   : > { %710 = vmatpush.bf16.msra.mxu0 %v4007_v1  ;;  %1319 = vmatpush.bf16.msra.mxu1 %v4007_v1  ;;  %v4089_v10 = vld [vmem:[%s4912_s26] sm:$0xff]  ;;  %v4090_v14 = vld [vmem:[%s4912_s26 + $0x8] sm:$0xff]  ;;  %v4091_v18 = vld [vmem:[%s4912_s26 + $0x10] sm:$0xff] }
  0x11   : > { %2008 = vmatpush.bf16.msra.mxu2 %v4007_v1  ;;  %2697 = vmatpush.bf16.msra.mxu3 %v4007_v1  ;;  %v4129_v11 = vld [vmem:[%s4917_s29] sm:$0xff]  ;;  %v4130_v15 = vld [vmem:[%s4917_s29 + $0x8] sm:$0xff]  ;;  %v4131_v19 = vld [vmem:[%s4917_s29 + $0x10] sm:$0xff] }
  0x12   : > { %v4012_v20 = vld [vmem:[%s4902_s19 + $0x18] sm:$0xff]  ;;  %v4013_v24 = vld [vmem:[%s4902_s19 + $0x20] sm:$0xff]  ;;  %v4014_v28 = vld [vmem:[%s4902_s19 + $0x28] sm:$0xff] }
  0x13   : > { %v4052_v21 = vld [vmem:[%s4907_s23 + $0x18] sm:$0xff]  ;;  %v4053_v25 = vld [vmem:[%s4907_s23 + $0x20] sm:$0xff]  ;;  %v4054_v29 = vld [vmem:[%s4907_s23 + $0x28] sm:$0xff] }
  0x14   : > { %711 = vmatpush.bf16.msra.mxu0 %v4006_v2  ;;  %1320 = vmatpush.bf16.msra.mxu1 %v4006_v2  ;;  %v4092_v22 = vld [vmem:[%s4912_s26 + $0x18] sm:$0xff]  ;;  %v4093_v26 = vld [vmem:[%s4912_s26 + $0x20] sm:$0xff]  ;;  %v4094_v30 = vld [vmem:[%s4912_s26 + $0x28] sm:$0xff] }
  0x15   : > { %2009 = vmatpush.bf16.msra.mxu2 %v4006_v2  ;;  %2698 = vmatpush.bf16.msra.mxu3 %v4006_v2  ;;  %v4132_v23 = vld [vmem:[%s4917_s29 + $0x18] sm:$0xff]  ;;  %v4133_v27 = vld [vmem:[%s4917_s29 + $0x20] sm:$0xff]  ;;  %v4134_v31 = vld [vmem:[%s4917_s29 + $0x28] sm:$0xff] }
  0x16   : > { %v4015_v32 = vld [vmem:[%s4902_s19 + $0x30] sm:$0xff]  ;;  %v4016_v36 = vld [vmem:[%s4902_s19 + $0x38] sm:$0xff]  ;;  %v4954_v40 = vld [vmem:[%s5513_s5] ss:$0 sm:$0xff] }
  0x17   : > { %v4055_v33 = vld [vmem:[%s4907_s23 + $0x30] sm:$0xff]  ;;  %v4056_v37 = vld [vmem:[%s4907_s23 + $0x38] sm:$0xff]  ;;  %v4017_v41 = vld [vmem:[%s4902_s19 + $0x40] sm:$0xff] }
  0x18   : > { %712 = vmatpush.bf16.msra.mxu0 %v4005_v3  ;;  %1321 = vmatpush.bf16.msra.mxu1 %v4005_v3  ;;  %v4095_v34 = vld [vmem:[%s4912_s26 + $0x30] sm:$0xff]  ;;  %v4096_v38 = vld [vmem:[%s4912_s26 + $0x38] sm:$0xff]  ;;  %v4057_v42 = vld [vmem:[%s4907_s23 + $0x40] sm:$0xff] }
  0x19   : > { %2010 = vmatpush.bf16.msra.mxu2 %v4005_v3  ;;  %2699 = vmatpush.bf16.msra.mxu3 %v4005_v3  ;;  %v4135_v35 = vld [vmem:[%s4917_s29 + $0x30] sm:$0xff]  ;;  %v4136_v39 = vld [vmem:[%s4917_s29 + $0x38] sm:$0xff]  ;;  %v4097_v45 = vld [vmem:[%s4912_s26 + $0x40] sm:$0xff] }
  0x1a   : > { %v4137_v46 = vld [vmem:[%s4917_s29 + $0x40] sm:$0xff]  ;;  %v4018_v62 = vld [vmem:[%s4902_s19 + $0x48] sm:$0xff] }
  0x1b   : > { %v4058_v63 = vld [vmem:[%s4907_s23 + $0x48] sm:$0xff] }
  0x1c   : > { %713 = vmatpush.bf16.msra.mxu0 %v4004_v4  ;;  %1322 = vmatpush.bf16.msra.mxu1 %v4004_v4 }
  0x1d   : > { %2011 = vmatpush.bf16.msra.mxu2 %v4004_v4  ;;  %2700 = vmatpush.bf16.msra.mxu3 %v4004_v4 }
  0x20   : > { %714 = vmatpush.bf16.msra.mxu0 %v4003_v5  ;;  %1323 = vmatpush.bf16.msra.mxu1 %v4003_v5 }
  0x21   : > { %2012 = vmatpush.bf16.msra.mxu2 %v4003_v5  ;;  %2701 = vmatpush.bf16.msra.mxu3 %v4003_v5  ;;  %v4098_v5 = vld [vmem:[%s4912_s26 + $0x48] sm:$0xff] }
  0x24   : > { %715 = vmatpush.bf16.msra.mxu0 %v4002_v6  ;;  %1324 = vmatpush.bf16.msra.mxu1 %v4002_v6 }
  0x25   : > { %2013 = vmatpush.bf16.msra.mxu2 %v4002_v6  ;;  %2702 = vmatpush.bf16.msra.mxu3 %v4002_v6  ;;  %v4138_v6 = vld [vmem:[%s4917_s29 + $0x48] sm:$0xff] }
  0x28   : > { %716 = vmatpush.bf16.msra.mxu0 %v4001_v7  ;;  %1325 = vmatpush.bf16.msra.mxu1 %v4001_v7 }
  0x29   : > { %2014 = vmatpush.bf16.msra.mxu2 %v4001_v7  ;;  %2703 = vmatpush.bf16.msra.mxu3 %v4001_v7 }
  0x2b   : > { %717 = vmatmul.bf16.vlgmr.msra.gmra.mxu0 %v4009_v8  ;;  %1326 = vmatmul.bf16.vlgmr.msra.gmra.mxu1 %v4049_v9 }
  0x2c   : > { %2015 = vmatmul.bf16.vlgmr.msra.gmra.mxu2 %v4089_v10  ;;  %2704 = vmatmul.bf16.vlgmr.msra.gmra.mxu3 %v4129_v11 }
  0x3b   : > { %722 = vmatmul.bf16.gmra.mxu0 %v4010_v12  ;;  %1331 = vmatmul.bf16.gmra.mxu1 %v4050_v13 }
  0x3c   : > { %2020 = vmatmul.bf16.gmra.mxu2 %v4090_v14  ;;  %2709 = vmatmul.bf16.gmra.mxu3 %v4130_v15 }
  0x4b   : > { %727 = vmatmul.bf16.gmra.mxu0 %v4011_v16  ;;  %1336 = vmatmul.bf16.gmra.mxu1 %v4051_v17 }
  0x4c   : > { %2025 = vmatmul.bf16.gmra.mxu2 %v4091_v18  ;;  %2714 = vmatmul.bf16.gmra.mxu3 %v4131_v19 }
  0x5b   : > { %732 = vmatmul.bf16.gmra.mxu0 %v4012_v20  ;;  %1341 = vmatmul.bf16.gmra.mxu1 %v4052_v21 }
  0x5c   : > { %2030 = vmatmul.bf16.gmra.mxu2 %v4092_v22  ;;  %2719 = vmatmul.bf16.gmra.mxu3 %v4132_v23 }
  0x6b   : > { %737 = vmatmul.bf16.gmra.mxu0 %v4013_v24  ;;  %1346 = vmatmul.bf16.gmra.mxu1 %v4053_v25 }
  0x6c   : > { %2035 = vmatmul.bf16.gmra.mxu2 %v4093_v26  ;;  %2724 = vmatmul.bf16.gmra.mxu3 %v4133_v27 }
  0x7b   : > { %742 = vmatmul.bf16.gmra.mxu0 %v4014_v28  ;;  %1351 = vmatmul.bf16.gmra.mxu1 %v4054_v29 }
  0x7c   : > { %2040 = vmatmul.bf16.gmra.mxu2 %v4094_v30  ;;  %2729 = vmatmul.bf16.gmra.mxu3 %v4134_v31 }
  0x8b   : > { %747 = vmatmul.bf16.gmra.mxu0 %v4015_v32  ;;  %1356 = vmatmul.bf16.gmra.mxu1 %v4055_v33 }
  0x8c   : > { %2045 = vmatmul.bf16.gmra.mxu2 %v4095_v34  ;;  %2734 = vmatmul.bf16.gmra.mxu3 %v4135_v35  ;;  %v4019_v34 = vld [vmem:[%s4902_s19 + $0x50] sm:$0xff] }
  0x8d   : > { %v4059_v35 = vld [vmem:[%s4907_s23 + $0x50] sm:$0xff] }
  0x9b   : > { %752 = vmatmul.bf16.gmra.mxu0 %v4016_v36  ;;  %1361 = vmatmul.bf16.gmra.mxu1 %v4056_v37 }
  0x9c   : > { %2050 = vmatmul.bf16.gmra.mxu2 %v4096_v38  ;;  %2739 = vmatmul.bf16.gmra.mxu3 %v4136_v39 }
  0xa8   : > { %v718_v43 = vpop.f32.mrf.mxu0  ;;  %v1327_v44 = vpop.f32.mrf.mxu1 }
  0xa9   : > { %v719_v47 = vadd.f32 %v4954_v40, %v718_v43  ;;  %v1328_v48 = vadd.f32 %v4954_v40, %v1327_v44  ;;  %v4139_v43 = vld [vmem:[%s4917_s29 + $0x50] sm:$0xff] }
  0xab   : > { %4178 = vtanh.f32 %v719_v47  ;;  %757 = vmatmul.bf16.gmra.mxu0 %v4017_v41  ;;  %1366 = vmatmul.bf16.gmra.mxu1 %v4057_v42  ;;  %v4099_v42 = vld [vmem:[%s4912_s26 + $0x50] sm:$0xff] }
  0xac   : > { %4180 = vtanh.f32 %v1328_v48  ;;  %2055 = vmatmul.bf16.gmra.mxu2 %v4097_v45  ;;  %2744 = vmatmul.bf16.gmra.mxu3 %v4137_v46 }
  0xaf   : > { %v2016_v49 = vpop.f32.mrf.mxu2  ;;  %v2705_v50 = vpop.f32.mrf.mxu3 }
  0xb0   : > { %v2017_v51 = vadd.f32 %v4954_v40, %v2016_v49  ;;  %v2706_v52 = vadd.f32 %v4954_v40, %v2705_v50  ;;  %v720_v53 = vpop.f32.mrf.mxu0  ;;  %v1329_v54 = vpop.f32.mrf.mxu1 }
  0xb1   : > { %v4179_v55 = vpop.eup %4178  ;;  %v721_v56 = vadd.f32 %v4954_v40, %v720_v53  ;;  %v1330_v58 = vadd.f32 %v4954_v40, %v1329_v54 }
  0xb2   : > { %v4181_v57 = vpop.eup %4180  ;;  %4182 = vtanh.f32 %v2017_v51 }
  0xb3   : > { %4184 = vtanh.f32 %v2706_v52  ;;  %v1607_v59 = vadd.f32 %v4181_v57, %v4179_v55 }
  0xb4   : > { %4186 = vtanh.f32 %v721_v56 }
  0xb5   : > { %4188 = vtanh.f32 %v1330_v58 }
  0xb7   : > { %v2018_v60 = vpop.f32.mrf.mxu2  ;;  %v2707_v61 = vpop.f32.mrf.mxu3 }
  0xb8   : > { %v4183_v0 = vpop.eup %4182  ;;  %v2019_v1 = vadd.f32 %v4954_v40, %v2018_v60  ;;  %v2708_v2 = vadd.f32 %v4954_v40, %v2707_v61  ;;  %v723_v3 = vpop.f32.mrf.mxu0 }
  0xb9   : > { %v1332_v4 = vpop.f32.mrf.mxu1  ;;  %v4185_v7 = vpop.eup %4184  ;;  %v2296_v8 = vadd.f32 %v4183_v0, %v1607_v59  ;;  %v724_v9 = vadd.f32 %v4954_v40, %v723_v3 }
  0xba   : > { %v1333_v10 = vadd.f32 %v4954_v40, %v1332_v4  ;;  %4190 = vtanh.f32 %v2019_v1  ;;  %v4187_v11 = vpop.eup %4186 }
  0xbb   : > { %v2985_v12 = vadd.f32 %v4185_v7, %v2296_v8  ;;  %4192 = vtanh.f32 %v2708_v2  ;;  %762 = vmatmul.bf16.gmra.mxu0 %v4018_v62  ;;  %1371 = vmatmul.bf16.gmra.mxu1 %v4058_v63  ;;  %v4189_v13 = vpop.eup %4188  ;;  %v4020_v7 = vld [vmem:[%s4902_s19 + $0x58] sm:$0xff] }
  0xbc   : > { %4194 = vtanh.f32 %v724_v9  ;;  %2060 = vmatmul.bf16.gmra.mxu2 %v4098_v5  ;;  %2749 = vmatmul.bf16.gmra.mxu3 %v4138_v6  ;;  %v1608_v15 = vadd.f32 %v4189_v13, %v4187_v11  ;;  %v4060_v8 = vld [vmem:[%s4907_s23 + $0x58] sm:$0xff] }
  0xbd   : > { %v3065_v14 = vmul.f32 0.25, %v2985_v12  ;;  %4196 = vtanh.f32 %v1333_v10 }
  0xbf   : > { %3145 = vst [vmem:[%s4978_s12] sm:$0xff] %v3065_v14  ;;  %v2021_v16 = vpop.f32.mrf.mxu2  ;;  %v2710_v17 = vpop.f32.mrf.mxu3  ;;  %v4100_v14 = vld [vmem:[%s4912_s26 + $0x58] sm:$0xff] }
  0xc0   : > { %v4191_v18 = vpop.eup %4190  ;;  %v2022_v19 = vadd.f32 %v4954_v40, %v2021_v16  ;;  %v2711_v20 = vadd.f32 %v4954_v40, %v2710_v17  ;;  %v725_v21 = vpop.f32.mrf.mxu0 }
  0xc1   : > { %v1334_v22 = vpop.f32.mrf.mxu1  ;;  %v4193_v23 = vpop.eup %4192  ;;  %v2297_v24 = vadd.f32 %v4191_v18, %v1608_v15  ;;  %v726_v25 = vadd.f32 %v4954_v40, %v725_v21  ;;  %v4140_v15 = vld [vmem:[%s4917_s29 + $0x58] sm:$0xff] }
  0xc2   : > { %v4195_v26 = vpop.eup %4194  ;;  %4198 = vtanh.f32 %v2022_v19  ;;  %v1335_v27 = vadd.f32 %v4954_v40, %v1334_v22 }
  0xc3   : > { %v4197_v28 = vpop.eup %4196  ;;  %v2986_v29 = vadd.f32 %v4193_v23, %v2297_v24  ;;  %4200 = vtanh.f32 %v2711_v20 }
  0xc4   : > { %v1609_v31 = vadd.f32 %v4197_v28, %v4195_v26  ;;  %4202 = vtanh.f32 %v726_v25 }
  0xc5   : > { %v3066_v30 = vmul.f32 0.25, %v2986_v29  ;;  %4204 = vtanh.f32 %v1335_v27 }
  0xc7   : > { %3146 = vst [vmem:[%s4978_s12 + $0x8] sm:$0xff] %v3066_v30  ;;  %v2023_v32 = vpop.f32.mrf.mxu2  ;;  %v2712_v33 = vpop.f32.mrf.mxu3 }
  0xc8   : > { %v4199_v36 = vpop.eup %4198  ;;  %v2024_v37 = vadd.f32 %v4954_v40, %v2023_v32  ;;  %v2713_v38 = vadd.f32 %v4954_v40, %v2712_v33  ;;  %v728_v39 = vpop.f32.mrf.mxu0 }
  0xc9   : > { %v1337_v41 = vpop.f32.mrf.mxu1  ;;  %v4201_v44 = vpop.eup %4200  ;;  %v2298_v45 = vadd.f32 %v4199_v36, %v1609_v31  ;;  %v729_v46 = vadd.f32 %v4954_v40, %v728_v39 }
  0xca   : > { %v1338_v47 = vadd.f32 %v4954_v40, %v1337_v41  ;;  %4206 = vtanh.f32 %v2024_v37  ;;  %v4203_v48 = vpop.eup %4202 }
  0xcb   : > { %v2987_v49 = vadd.f32 %v4201_v44, %v2298_v45  ;;  %4208 = vtanh.f32 %v2713_v38  ;;  %767 = vmatmul.bf16.gmra.mxu0 %v4019_v34  ;;  %1376 = vmatmul.bf16.gmra.mxu1 %v4059_v35  ;;  %v4205_v50 = vpop.eup %4204  ;;  %v4021_v44 = vld [vmem:[%s4902_s19 + $0x60] sm:$0xff] }
  0xcc   : > { %4210 = vtanh.f32 %v729_v46  ;;  %2065 = vmatmul.bf16.gmra.mxu2 %v4099_v42  ;;  %2754 = vmatmul.bf16.gmra.mxu3 %v4139_v43  ;;  %v1610_v52 = vadd.f32 %v4205_v50, %v4203_v48  ;;  %v4061_v45 = vld [vmem:[%s4907_s23 + $0x60] sm:$0xff] }
  0xcd   : > { %v3067_v51 = vmul.f32 0.25, %v2987_v49  ;;  %4212 = vtanh.f32 %v1338_v47 }
  0xcf   : > { %3147 = vst [vmem:[%s4978_s12 + $0x10] sm:$0xff] %v3067_v51  ;;  %v2026_v53 = vpop.f32.mrf.mxu2  ;;  %v2715_v54 = vpop.f32.mrf.mxu3  ;;  %v4101_v51 = vld [vmem:[%s4912_s26 + $0x60] sm:$0xff] }
  0xd0   : > { %v4207_v55 = vpop.eup %4206  ;;  %v2027_v56 = vadd.f32 %v4954_v40, %v2026_v53  ;;  %v2716_v57 = vadd.f32 %v4954_v40, %v2715_v54  ;;  %v730_v58 = vpop.f32.mrf.mxu0 }
  0xd1   : > { %v1339_v59 = vpop.f32.mrf.mxu1  ;;  %v4209_v60 = vpop.eup %4208  ;;  %v2299_v61 = vadd.f32 %v4207_v55, %v1610_v52  ;;  %v731_v62 = vadd.f32 %v4954_v40, %v730_v58  ;;  %v4141_v52 = vld [vmem:[%s4917_s29 + $0x60] sm:$0xff] }
  0xd2   : > { %v4211_v63 = vpop.eup %4210  ;;  %4214 = vtanh.f32 %v2027_v56  ;;  %v1340_v0 = vadd.f32 %v4954_v40, %v1339_v59 }
  0xd3   : > { %v4213_v1 = vpop.eup %4212  ;;  %v2988_v2 = vadd.f32 %v4209_v60, %v2299_v61  ;;  %4216 = vtanh.f32 %v2716_v57 }
  0xd4   : > { %v1611_v4 = vadd.f32 %v4213_v1, %v4211_v63  ;;  %4218 = vtanh.f32 %v731_v62 }
  0xd5   : > { %v3068_v3 = vmul.f32 0.25, %v2988_v2  ;;  %4220 = vtanh.f32 %v1340_v0 }
  0xd7   : > { %3148 = vst [vmem:[%s4978_s12 + $0x18] sm:$0xff] %v3068_v3  ;;  %v2028_v5 = vpop.f32.mrf.mxu2  ;;  %v2717_v6 = vpop.f32.mrf.mxu3 }
  0xd8   : > { %v4215_v9 = vpop.eup %4214  ;;  %v2029_v10 = vadd.f32 %v4954_v40, %v2028_v5  ;;  %v2718_v11 = vadd.f32 %v4954_v40, %v2717_v6  ;;  %v733_v12 = vpop.f32.mrf.mxu0 }
  0xd9   : > { %v1342_v13 = vpop.f32.mrf.mxu1  ;;  %v4217_v16 = vpop.eup %4216  ;;  %v2300_v17 = vadd.f32 %v4215_v9, %v1611_v4  ;;  %v734_v18 = vadd.f32 %v4954_v40, %v733_v12 }
  0xda   : > { %v1343_v19 = vadd.f32 %v4954_v40, %v1342_v13  ;;  %4222 = vtanh.f32 %v2029_v10  ;;  %v4219_v20 = vpop.eup %4218 }
  0xdb   : > { %v2989_v21 = vadd.f32 %v4217_v16, %v2300_v17  ;;  %4224 = vtanh.f32 %v2718_v11  ;;  %772 = vmatmul.bf16.gmra.mxu0 %v4020_v7  ;;  %1381 = vmatmul.bf16.gmra.mxu1 %v4060_v8  ;;  %v4221_v22 = vpop.eup %4220  ;;  %v4022_v16 = vld [vmem:[%s4902_s19 + $0x68] sm:$0xff] }
  0xdc   : > { %4226 = vtanh.f32 %v734_v18  ;;  %2070 = vmatmul.bf16.gmra.mxu2 %v4100_v14  ;;  %2759 = vmatmul.bf16.gmra.mxu3 %v4140_v15  ;;  %v1612_v24 = vadd.f32 %v4221_v22, %v4219_v20  ;;  %v4062_v17 = vld [vmem:[%s4907_s23 + $0x68] sm:$0xff] }
  0xdd   : > { %v3069_v23 = vmul.f32 0.25, %v2989_v21  ;;  %4228 = vtanh.f32 %v1343_v19 }
  0xdf   : > { %3149 = vst [vmem:[%s4978_s12 + $0x20] sm:$0xff] %v3069_v23  ;;  %v2031_v25 = vpop.f32.mrf.mxu2  ;;  %v2720_v26 = vpop.f32.mrf.mxu3  ;;  %v4102_v23 = vld [vmem:[%s4912_s26 + $0x68] sm:$0xff] }
  0xe0   : > { %v4223_v27 = vpop.eup %4222  ;;  %v2032_v28 = vadd.f32 %v4954_v40, %v2031_v25  ;;  %v2721_v29 = vadd.f32 %v4954_v40, %v2720_v26  ;;  %v735_v30 = vpop.f32.mrf.mxu0 }
  0xe1   : > { %v1344_v31 = vpop.f32.mrf.mxu1  ;;  %v4225_v32 = vpop.eup %4224  ;;  %v2301_v33 = vadd.f32 %v4223_v27, %v1612_v24  ;;  %v736_v34 = vadd.f32 %v4954_v40, %v735_v30  ;;  %v4142_v24 = vld [vmem:[%s4917_s29 + $0x68] sm:$0xff] }
  0xe2   : > { %v4227_v35 = vpop.eup %4226  ;;  %4230 = vtanh.f32 %v2032_v28  ;;  %v1345_v36 = vadd.f32 %v4954_v40, %v1344_v31 }
  0xe3   : > { %v4229_v37 = vpop.eup %4228  ;;  %v2990_v38 = vadd.f32 %v4225_v32, %v2301_v33  ;;  %4232 = vtanh.f32 %v2721_v29 }
  0xe4   : > { %v1613_v41 = vadd.f32 %v4229_v37, %v4227_v35  ;;  %4234 = vtanh.f32 %v736_v34 }
  0xe5   : > { %v3070_v39 = vmul.f32 0.25, %v2990_v38  ;;  %4236 = vtanh.f32 %v1345_v36 }
  0xe7   : > { %3150 = vst [vmem:[%s4978_s12 + $0x28] sm:$0xff] %v3070_v39  ;;  %v2033_v42 = vpop.f32.mrf.mxu2  ;;  %v2722_v43 = vpop.f32.mrf.mxu3 }
  0xe8   : > { %v4231_v46 = vpop.eup %4230  ;;  %v2034_v47 = vadd.f32 %v4954_v40, %v2033_v42  ;;  %v2723_v48 = vadd.f32 %v4954_v40, %v2722_v43  ;;  %v738_v49 = vpop.f32.mrf.mxu0 }
  0xe9   : > { %v1347_v50 = vpop.f32.mrf.mxu1  ;;  %v4233_v53 = vpop.eup %4232  ;;  %v2302_v54 = vadd.f32 %v4231_v46, %v1613_v41  ;;  %v739_v55 = vadd.f32 %v4954_v40, %v738_v49 }
  0xea   : > { %v1348_v56 = vadd.f32 %v4954_v40, %v1347_v50  ;;  %4238 = vtanh.f32 %v2034_v47  ;;  %v4235_v57 = vpop.eup %4234 }
  0xeb   : > { %v2991_v58 = vadd.f32 %v4233_v53, %v2302_v54  ;;  %4240 = vtanh.f32 %v2723_v48  ;;  %777 = vmatmul.bf16.gmra.mxu0 %v4021_v44  ;;  %1386 = vmatmul.bf16.gmra.mxu1 %v4061_v45  ;;  %v4237_v59 = vpop.eup %4236  ;;  %v4023_v53 = vld [vmem:[%s4902_s19 + $0x70] sm:$0xff] }
  0xec   : > { %4242 = vtanh.f32 %v739_v55  ;;  %2075 = vmatmul.bf16.gmra.mxu2 %v4101_v51  ;;  %2764 = vmatmul.bf16.gmra.mxu3 %v4141_v52  ;;  %v1614_v61 = vadd.f32 %v4237_v59, %v4235_v57  ;;  %v4063_v54 = vld [vmem:[%s4907_s23 + $0x70] sm:$0xff] }
  0xed   : > { %v3071_v60 = vmul.f32 0.25, %v2991_v58  ;;  %4244 = vtanh.f32 %v1348_v56 }
  0xef   : > { %3151 = vst [vmem:[%s4978_s12 + $0x30] sm:$0xff] %v3071_v60  ;;  %v2036_v62 = vpop.f32.mrf.mxu2  ;;  %v2725_v63 = vpop.f32.mrf.mxu3  ;;  %v4103_v60 = vld [vmem:[%s4912_s26 + $0x70] sm:$0xff] }
  0xf0   : > { %v4239_v0 = vpop.eup %4238  ;;  %v2037_v1 = vadd.f32 %v4954_v40, %v2036_v62  ;;  %v2726_v2 = vadd.f32 %v4954_v40, %v2725_v63  ;;  %v740_v3 = vpop.f32.mrf.mxu0 }
  0xf1   : > { %v1349_v4 = vpop.f32.mrf.mxu1  ;;  %v4241_v5 = vpop.eup %4240  ;;  %v2303_v6 = vadd.f32 %v4239_v0, %v1614_v61  ;;  %v741_v7 = vadd.f32 %v4954_v40, %v740_v3  ;;  %v4143_v61 = vld [vmem:[%s4917_s29 + $0x70] sm:$0xff] }
  0xf2   : > { %v4243_v8 = vpop.eup %4242  ;;  %4246 = vtanh.f32 %v2037_v1  ;;  %v1350_v9 = vadd.f32 %v4954_v40, %v1349_v4 }
  0xf3   : > { %v4245_v10 = vpop.eup %4244  ;;  %v2992_v11 = vadd.f32 %v4241_v5, %v2303_v6  ;;  %4248 = vtanh.f32 %v2726_v2 }
  0xf4   : > { %v1615_v13 = vadd.f32 %v4245_v10, %v4243_v8  ;;  %4250 = vtanh.f32 %v741_v7 }
  0xf5   : > { %v3072_v12 = vmul.f32 0.25, %v2992_v11  ;;  %4252 = vtanh.f32 %v1350_v9 }
  0xf7   : > { %3152 = vst [vmem:[%s4978_s12 + $0x38] sm:$0xff] %v3072_v12  ;;  %v2038_v14 = vpop.f32.mrf.mxu2  ;;  %v2727_v15 = vpop.f32.mrf.mxu3 }
  0xf8   : > { %v4247_v18 = vpop.eup %4246  ;;  %v2039_v19 = vadd.f32 %v4954_v40, %v2038_v14  ;;  %v2728_v20 = vadd.f32 %v4954_v40, %v2727_v15  ;;  %v743_v21 = vpop.f32.mrf.mxu0 }
  0xf9   : > { %v1352_v22 = vpop.f32.mrf.mxu1  ;;  %v4249_v25 = vpop.eup %4248  ;;  %v2304_v26 = vadd.f32 %v4247_v18, %v1615_v13  ;;  %v744_v27 = vadd.f32 %v4954_v40, %v743_v21 }
  0xfa   : > { %v1353_v28 = vadd.f32 %v4954_v40, %v1352_v22  ;;  %4254 = vtanh.f32 %v2039_v19  ;;  %v4251_v29 = vpop.eup %4250 }
  0xfb   : > { %v2993_v30 = vadd.f32 %v4249_v25, %v2304_v26  ;;  %4256 = vtanh.f32 %v2728_v20  ;;  %782 = vmatmul.bf16.gmra.mxu0 %v4022_v16  ;;  %1391 = vmatmul.bf16.gmra.mxu1 %v4062_v17  ;;  %v4253_v31 = vpop.eup %4252  ;;  %v4024_v25 = vld [vmem:[%s4902_s19 + $0x78] sm:$0xff] }
  0xfc   : > { %4258 = vtanh.f32 %v744_v27  ;;  %2080 = vmatmul.bf16.gmra.mxu2 %v4102_v23  ;;  %2769 = vmatmul.bf16.gmra.mxu3 %v4142_v24  ;;  %v1616_v33 = vadd.f32 %v4253_v31, %v4251_v29  ;;  %v4064_v26 = vld [vmem:[%s4907_s23 + $0x78] sm:$0xff] }
  0xfd   : > { %v3073_v32 = vmul.f32 0.25, %v2993_v30  ;;  %4260 = vtanh.f32 %v1353_v28 }
  0xff   : > { %3153 = vst [vmem:[%s4978_s12 + $0x40] sm:$0xff] %v3073_v32  ;;  %v2041_v34 = vpop.f32.mrf.mxu2  ;;  %v2730_v35 = vpop.f32.mrf.mxu3  ;;  %v4104_v32 = vld [vmem:[%s4912_s26 + $0x78] sm:$0xff] }
 0x100   : > { %v4255_v36 = vpop.eup %4254  ;;  %v2042_v37 = vadd.f32 %v4954_v40, %v2041_v34  ;;  %v2731_v38 = vadd.f32 %v4954_v40, %v2730_v35  ;;  %v745_v39 = vpop.f32.mrf.mxu0 }
 0x101   : > { %v1354_v41 = vpop.f32.mrf.mxu1  ;;  %v4257_v42 = vpop.eup %4256  ;;  %v2305_v43 = vadd.f32 %v4255_v36, %v1616_v33  ;;  %v746_v44 = vadd.f32 %v4954_v40, %v745_v39  ;;  %v4144_v33 = vld [vmem:[%s4917_s29 + $0x78] sm:$0xff] }
 0x102   : > { %v4259_v45 = vpop.eup %4258  ;;  %4262 = vtanh.f32 %v2042_v37  ;;  %v1355_v46 = vadd.f32 %v4954_v40, %v1354_v41 }
 0x103   : > { %v4261_v47 = vpop.eup %4260  ;;  %v2994_v48 = vadd.f32 %v4257_v42, %v2305_v43  ;;  %4264 = vtanh.f32 %v2731_v38 }
 0x104   : > { %v1617_v50 = vadd.f32 %v4261_v47, %v4259_v45  ;;  %4266 = vtanh.f32 %v746_v44 }
 0x105   : > { %v3074_v49 = vmul.f32 0.25, %v2994_v48  ;;  %4268 = vtanh.f32 %v1355_v46 }
 0x107   : > { %3154 = vst [vmem:[%s4978_s12 + $0x48] sm:$0xff] %v3074_v49  ;;  %v2043_v51 = vpop.f32.mrf.mxu2  ;;  %v2732_v52 = vpop.f32.mrf.mxu3 }
 0x108   : > { %v4263_v55 = vpop.eup %4262  ;;  %v2044_v56 = vadd.f32 %v4954_v40, %v2043_v51  ;;  %v2733_v57 = vadd.f32 %v4954_v40, %v2732_v52  ;;  %v748_v58 = vpop.f32.mrf.mxu0 }
 0x109   : > { %v1357_v59 = vpop.f32.mrf.mxu1  ;;  %v4265_v62 = vpop.eup %4264  ;;  %v2306_v63 = vadd.f32 %v4263_v55, %v1617_v50  ;;  %v749_v0 = vadd.f32 %v4954_v40, %v748_v58 }
 0x10a   : > { %v1358_v1 = vadd.f32 %v4954_v40, %v1357_v59  ;;  %4270 = vtanh.f32 %v2044_v56  ;;  %v4267_v2 = vpop.eup %4266 }
 0x10b   : > { %v2995_v3 = vadd.f32 %v4265_v62, %v2306_v63  ;;  %4272 = vtanh.f32 %v2733_v57  ;;  %787 = vmatmul.bf16.gmra.mxu0 %v4023_v53  ;;  %1396 = vmatmul.bf16.gmra.mxu1 %v4063_v54  ;;  %v4269_v4 = vpop.eup %4268  ;;  %v4025_v62 = vld [vmem:[%s4902_s19 + $0x80] sm:$0xff] }
 0x10c   : > { %4274 = vtanh.f32 %v749_v0  ;;  %2085 = vmatmul.bf16.gmra.mxu2 %v4103_v60  ;;  %2774 = vmatmul.bf16.gmra.mxu3 %v4143_v61  ;;  %v1618_v6 = vadd.f32 %v4269_v4, %v4267_v2  ;;  %v4065_v63 = vld [vmem:[%s4907_s23 + $0x80] sm:$0xff] }
 0x10d   : > { %v3075_v5 = vmul.f32 0.25, %v2995_v3  ;;  %4276 = vtanh.f32 %v1358_v1 }
 0x10f   : > { %3155 = vst [vmem:[%s4978_s12 + $0x50] sm:$0xff] %v3075_v5  ;;  %v2046_v7 = vpop.f32.mrf.mxu2  ;;  %v2735_v8 = vpop.f32.mrf.mxu3  ;;  %v4105_v5 = vld [vmem:[%s4912_s26 + $0x80] sm:$0xff] }
 0x110   : > { %v4271_v9 = vpop.eup %4270  ;;  %v2047_v10 = vadd.f32 %v4954_v40, %v2046_v7  ;;  %v2736_v11 = vadd.f32 %v4954_v40, %v2735_v8  ;;  %v750_v12 = vpop.f32.mrf.mxu0 }
 0x111   : > { %v1359_v13 = vpop.f32.mrf.mxu1  ;;  %v4273_v14 = vpop.eup %4272  ;;  %v2307_v15 = vadd.f32 %v4271_v9, %v1618_v6  ;;  %v751_v16 = vadd.f32 %v4954_v40, %v750_v12  ;;  %v4145_v6 = vld [vmem:[%s4917_s29 + $0x80] sm:$0xff] }
 0x112   : > { %v4275_v17 = vpop.eup %4274  ;;  %4278 = vtanh.f32 %v2047_v10  ;;  %v1360_v18 = vadd.f32 %v4954_v40, %v1359_v13 }
 0x113   : > { %v4277_v19 = vpop.eup %4276  ;;  %v2996_v20 = vadd.f32 %v4273_v14, %v2307_v15  ;;  %4280 = vtanh.f32 %v2736_v11 }
 0x114   : > { %v1619_v22 = vadd.f32 %v4277_v19, %v4275_v17  ;;  %4282 = vtanh.f32 %v751_v16 }
 0x115   : > { %v3076_v21 = vmul.f32 0.25, %v2996_v20  ;;  %4284 = vtanh.f32 %v1360_v18 }
 0x117   : > { %3156 = vst [vmem:[%s4978_s12 + $0x58] sm:$0xff] %v3076_v21  ;;  %v2048_v23 = vpop.f32.mrf.mxu2  ;;  %v2737_v24 = vpop.f32.mrf.mxu3 }
 0x118   : > { %v4279_v27 = vpop.eup %4278  ;;  %v2049_v28 = vadd.f32 %v4954_v40, %v2048_v23  ;;  %v2738_v29 = vadd.f32 %v4954_v40, %v2737_v24  ;;  %v753_v30 = vpop.f32.mrf.mxu0 }
 0x119   : > { %v1362_v31 = vpop.f32.mrf.mxu1  ;;  %v4281_v34 = vpop.eup %4280  ;;  %v2308_v35 = vadd.f32 %v4279_v27, %v1619_v22  ;;  %v754_v36 = vadd.f32 %v4954_v40, %v753_v30 }
 0x11a   : > { %v1363_v37 = vadd.f32 %v4954_v40, %v1362_v31  ;;  %4286 = vtanh.f32 %v2049_v28  ;;  %v4283_v38 = vpop.eup %4282 }
 0x11b   : > { %v2997_v39 = vadd.f32 %v4281_v34, %v2308_v35  ;;  %4288 = vtanh.f32 %v2738_v29  ;;  %792 = vmatmul.bf16.gmra.mxu0 %v4024_v25  ;;  %1401 = vmatmul.bf16.gmra.mxu1 %v4064_v26  ;;  %v4285_v41 = vpop.eup %4284  ;;  %v4026_v34 = vld [vmem:[%s4902_s19 + $0x88] sm:$0xff] }
 0x11c   : > { %4290 = vtanh.f32 %v754_v36  ;;  %2090 = vmatmul.bf16.gmra.mxu2 %v4104_v32  ;;  %2779 = vmatmul.bf16.gmra.mxu3 %v4144_v33  ;;  %v1620_v43 = vadd.f32 %v4285_v41, %v4283_v38  ;;  %v4066_v35 = vld [vmem:[%s4907_s23 + $0x88] sm:$0xff] }
 0x11d   : > { %v3077_v42 = vmul.f32 0.25, %v2997_v39  ;;  %4292 = vtanh.f32 %v1363_v37 }
 0x11f   : > { %3157 = vst [vmem:[%s4978_s12 + $0x60] sm:$0xff] %v3077_v42  ;;  %v2051_v44 = vpop.f32.mrf.mxu2  ;;  %v2740_v45 = vpop.f32.mrf.mxu3  ;;  %v4106_v42 = vld [vmem:[%s4912_s26 + $0x88] sm:$0xff] }
 0x120   : > { %v4287_v46 = vpop.eup %4286  ;;  %v2052_v47 = vadd.f32 %v4954_v40, %v2051_v44  ;;  %v2741_v48 = vadd.f32 %v4954_v40, %v2740_v45  ;;  %v755_v49 = vpop.f32.mrf.mxu0 }
 0x121   : > { %v1364_v50 = vpop.f32.mrf.mxu1  ;;  %v4289_v51 = vpop.eup %4288  ;;  %v2309_v52 = vadd.f32 %v4287_v46, %v1620_v43  ;;  %v756_v53 = vadd.f32 %v4954_v40, %v755_v49  ;;  %v4146_v43 = vld [vmem:[%s4917_s29 + $0x88] sm:$0xff] }
 0x122   : > { %v4291_v54 = vpop.eup %4290  ;;  %4294 = vtanh.f32 %v2052_v47  ;;  %v1365_v55 = vadd.f32 %v4954_v40, %v1364_v50 }
 0x123   : > { %v4293_v56 = vpop.eup %4292  ;;  %v2998_v57 = vadd.f32 %v4289_v51, %v2309_v52  ;;  %4296 = vtanh.f32 %v2741_v48 }
 0x124   : > { %v1621_v59 = vadd.f32 %v4293_v56, %v4291_v54  ;;  %4298 = vtanh.f32 %v756_v53 }
 0x125   : > { %v3078_v58 = vmul.f32 0.25, %v2998_v57  ;;  %4300 = vtanh.f32 %v1365_v55 }
 0x127   : > { %3158 = vst [vmem:[%s4978_s12 + $0x68] sm:$0xff] %v3078_v58  ;;  %v2053_v60 = vpop.f32.mrf.mxu2  ;;  %v2742_v61 = vpop.f32.mrf.mxu3 }
 0x128   : > { %v4295_v0 = vpop.eup %4294  ;;  %v2054_v1 = vadd.f32 %v4954_v40, %v2053_v60  ;;  %v2743_v2 = vadd.f32 %v4954_v40, %v2742_v61  ;;  %v758_v3 = vpop.f32.mrf.mxu0 }
 0x129   : > { %v1367_v4 = vpop.f32.mrf.mxu1  ;;  %v4297_v7 = vpop.eup %4296  ;;  %v2310_v8 = vadd.f32 %v4295_v0, %v1621_v59  ;;  %v759_v9 = vadd.f32 %v4954_v40, %v758_v3 }
 0x12a   : > { %v1368_v10 = vadd.f32 %v4954_v40, %v1367_v4  ;;  %4302 = vtanh.f32 %v2054_v1  ;;  %v4299_v11 = vpop.eup %4298 }
 0x12b   : > { %v2999_v12 = vadd.f32 %v4297_v7, %v2310_v8  ;;  %4304 = vtanh.f32 %v2743_v2  ;;  %797 = vmatmul.bf16.gmra.mxu0 %v4025_v62  ;;  %1406 = vmatmul.bf16.gmra.mxu1 %v4065_v63  ;;  %v4301_v13 = vpop.eup %4300  ;;  %v4027_v7 = vld [vmem:[%s4902_s19 + $0x90] sm:$0xff] }
 0x12c   : > { %4306 = vtanh.f32 %v759_v9  ;;  %2095 = vmatmul.bf16.gmra.mxu2 %v4105_v5  ;;  %2784 = vmatmul.bf16.gmra.mxu3 %v4145_v6  ;;  %v1622_v15 = vadd.f32 %v4301_v13, %v4299_v11  ;;  %v4067_v8 = vld [vmem:[%s4907_s23 + $0x90] sm:$0xff] }
 0x12d   : > { %v3079_v14 = vmul.f32 0.25, %v2999_v12  ;;  %4308 = vtanh.f32 %v1368_v10 }
 0x12f   : > { %3159 = vst [vmem:[%s4978_s12 + $0x70] sm:$0xff] %v3079_v14  ;;  %v2056_v16 = vpop.f32.mrf.mxu2  ;;  %v2745_v17 = vpop.f32.mrf.mxu3  ;;  %v4107_v14 = vld [vmem:[%s4912_s26 + $0x90] sm:$0xff] }
 0x130   : > { %v4303_v18 = vpop.eup %4302  ;;  %v2057_v19 = vadd.f32 %v4954_v40, %v2056_v16  ;;  %v2746_v20 = vadd.f32 %v4954_v40, %v2745_v17  ;;  %v760_v21 = vpop.f32.mrf.mxu0 }
 0x131   : > { %v1369_v22 = vpop.f32.mrf.mxu1  ;;  %v4305_v23 = vpop.eup %4304  ;;  %v2311_v24 = vadd.f32 %v4303_v18, %v1622_v15  ;;  %v761_v25 = vadd.f32 %v4954_v40, %v760_v21  ;;  %v4147_v15 = vld [vmem:[%s4917_s29 + $0x90] sm:$0xff] }
 0x132   : > { %v4307_v26 = vpop.eup %4306  ;;  %4310 = vtanh.f32 %v2057_v19  ;;  %v1370_v27 = vadd.f32 %v4954_v40, %v1369_v22 }
 0x133   : > { %v4309_v28 = vpop.eup %4308  ;;  %v3000_v29 = vadd.f32 %v4305_v23, %v2311_v24  ;;  %4312 = vtanh.f32 %v2746_v20 }
 0x134   : > { %v1623_v31 = vadd.f32 %v4309_v28, %v4307_v26  ;;  %4314 = vtanh.f32 %v761_v25 }
 0x135   : > { %v3080_v30 = vmul.f32 0.25, %v3000_v29  ;;  %4316 = vtanh.f32 %v1370_v27 }
 0x137   : > { %3160 = vst [vmem:[%s4978_s12 + $0x78] sm:$0xff] %v3080_v30  ;;  %v2058_v32 = vpop.f32.mrf.mxu2  ;;  %v2747_v33 = vpop.f32.mrf.mxu3 }
 0x138   : > { %v4311_v36 = vpop.eup %4310  ;;  %v2059_v37 = vadd.f32 %v4954_v40, %v2058_v32  ;;  %v2748_v38 = vadd.f32 %v4954_v40, %v2747_v33  ;;  %v763_v39 = vpop.f32.mrf.mxu0 }
 0x139   : > { %v1372_v41 = vpop.f32.mrf.mxu1  ;;  %v4313_v44 = vpop.eup %4312  ;;  %v2312_v45 = vadd.f32 %v4311_v36, %v1623_v31  ;;  %v764_v46 = vadd.f32 %v4954_v40, %v763_v39 }
 0x13a   : > { %v1373_v47 = vadd.f32 %v4954_v40, %v1372_v41  ;;  %4318 = vtanh.f32 %v2059_v37  ;;  %v4315_v48 = vpop.eup %4314 }
 0x13b   : > { %v3001_v49 = vadd.f32 %v4313_v44, %v2312_v45  ;;  %4320 = vtanh.f32 %v2748_v38  ;;  %802 = vmatmul.bf16.gmra.mxu0 %v4026_v34  ;;  %1411 = vmatmul.bf16.gmra.mxu1 %v4066_v35  ;;  %v4317_v50 = vpop.eup %4316  ;;  %v4028_v44 = vld [vmem:[%s4902_s19 + $0x98] sm:$0xff] }
 0x13c   : > { %4322 = vtanh.f32 %v764_v46  ;;  %2100 = vmatmul.bf16.gmra.mxu2 %v4106_v42  ;;  %2789 = vmatmul.bf16.gmra.mxu3 %v4146_v43  ;;  %v1624_v52 = vadd.f32 %v4317_v50, %v4315_v48  ;;  %v4068_v45 = vld [vmem:[%s4907_s23 + $0x98] sm:$0xff] }
 0x13d   : > { %v3081_v51 = vmul.f32 0.25, %v3001_v49  ;;  %4324 = vtanh.f32 %v1373_v47 }
 0x13f   : > { %3161 = vst [vmem:[%s4978_s12 + $0x80] sm:$0xff] %v3081_v51  ;;  %v2061_v53 = vpop.f32.mrf.mxu2  ;;  %v2750_v54 = vpop.f32.mrf.mxu3  ;;  %v4108_v51 = vld [vmem:[%s4912_s26 + $0x98] sm:$0xff] }
 0x140   : > { %v4319_v55 = vpop.eup %4318  ;;  %v2062_v56 = vadd.f32 %v4954_v40, %v2061_v53  ;;  %v2751_v57 = vadd.f32 %v4954_v40, %v2750_v54  ;;  %v765_v58 = vpop.f32.mrf.mxu0 }
 0x141   : > { %v1374_v59 = vpop.f32.mrf.mxu1  ;;  %v4321_v60 = vpop.eup %4320  ;;  %v2313_v61 = vadd.f32 %v4319_v55, %v1624_v52  ;;  %v766_v62 = vadd.f32 %v4954_v40, %v765_v58  ;;  %v4148_v52 = vld [vmem:[%s4917_s29 + $0x98] sm:$0xff] }
 0x142   : > { %v4323_v63 = vpop.eup %4322  ;;  %4326 = vtanh.f32 %v2062_v56  ;;  %v1375_v0 = vadd.f32 %v4954_v40, %v1374_v59 }
 0x143   : > { %v4325_v1 = vpop.eup %4324  ;;  %v3002_v2 = vadd.f32 %v4321_v60, %v2313_v61  ;;  %4328 = vtanh.f32 %v2751_v57 }
 0x144   : > { %v1625_v4 = vadd.f32 %v4325_v1, %v4323_v63  ;;  %4330 = vtanh.f32 %v766_v62 }
 0x145   : > { %v3082_v3 = vmul.f32 0.25, %v3002_v2  ;;  %4332 = vtanh.f32 %v1375_v0 }
 0x147   : > { %3162 = vst [vmem:[%s4978_s12 + $0x88] sm:$0xff] %v3082_v3  ;;  %v2063_v5 = vpop.f32.mrf.mxu2  ;;  %v2752_v6 = vpop.f32.mrf.mxu3 }
 0x148   : > { %v4327_v9 = vpop.eup %4326  ;;  %v2064_v10 = vadd.f32 %v4954_v40, %v2063_v5  ;;  %v2753_v11 = vadd.f32 %v4954_v40, %v2752_v6  ;;  %v768_v12 = vpop.f32.mrf.mxu0 }
 0x149   : > { %v1377_v13 = vpop.f32.mrf.mxu1  ;;  %v4329_v16 = vpop.eup %4328  ;;  %v2314_v17 = vadd.f32 %v4327_v9, %v1625_v4  ;;  %v769_v18 = vadd.f32 %v4954_v40, %v768_v12 }
 0x14a   : > { %v1378_v19 = vadd.f32 %v4954_v40, %v1377_v13  ;;  %4334 = vtanh.f32 %v2064_v10  ;;  %v4331_v20 = vpop.eup %4330  ;;  %v5110_v40 = vld [vmem:[%s5513_s5] ss:$0 sm:$0xff] }
 0x14b   : > { %v3003_v21 = vadd.f32 %v4329_v16, %v2314_v17  ;;  %4336 = vtanh.f32 %v2753_v11  ;;  %807 = vmatmul.bf16.gmra.mxu0 %v4027_v7  ;;  %1416 = vmatmul.bf16.gmra.mxu1 %v4067_v8  ;;  %v4333_v22 = vpop.eup %4332  ;;  %v4029_v16 = vld [vmem:[%s4902_s19 + $0xa0] sm:$0xff] }
 0x14c   : > { %4338 = vtanh.f32 %v769_v18  ;;  %2105 = vmatmul.bf16.gmra.mxu2 %v4107_v14  ;;  %2794 = vmatmul.bf16.gmra.mxu3 %v4147_v15  ;;  %v1626_v24 = vadd.f32 %v4333_v22, %v4331_v20  ;;  %v4069_v17 = vld [vmem:[%s4907_s23 + $0xa0] sm:$0xff] }
 0x14d   : > { %v3083_v23 = vmul.f32 0.25, %v3003_v21  ;;  %4340 = vtanh.f32 %v1378_v19 }
 0x14f   : > { %3163 = vst [vmem:[%s4978_s12 + $0x90] sm:$0xff] %v3083_v23  ;;  %v2066_v25 = vpop.f32.mrf.mxu2  ;;  %v2755_v26 = vpop.f32.mrf.mxu3  ;;  %v4109_v23 = vld [vmem:[%s4912_s26 + $0xa0] sm:$0xff] }
 0x150   : > { %v4335_v27 = vpop.eup %4334  ;;  %v2067_v28 = vadd.f32 %v5110_v40, %v2066_v25  ;;  %v2756_v29 = vadd.f32 %v5110_v40, %v2755_v26  ;;  %v770_v30 = vpop.f32.mrf.mxu0 }
 0x151   : > { %v1379_v31 = vpop.f32.mrf.mxu1  ;;  %v4337_v32 = vpop.eup %4336  ;;  %v2315_v33 = vadd.f32 %v4335_v27, %v1626_v24  ;;  %v771_v34 = vadd.f32 %v5110_v40, %v770_v30  ;;  %v4149_v24 = vld [vmem:[%s4917_s29 + $0xa0] sm:$0xff] }
 0x152   : > { %v4339_v35 = vpop.eup %4338  ;;  %4342 = vtanh.f32 %v2067_v28  ;;  %v1380_v36 = vadd.f32 %v5110_v40, %v1379_v31 }
 0x153   : > { %v4341_v37 = vpop.eup %4340  ;;  %v3004_v38 = vadd.f32 %v4337_v32, %v2315_v33  ;;  %4344 = vtanh.f32 %v2756_v29 }
 0x154   : > { %v1627_v41 = vadd.f32 %v4341_v37, %v4339_v35  ;;  %4346 = vtanh.f32 %v771_v34 }
 0x155   : > { %v3084_v39 = vmul.f32 0.25, %v3004_v38  ;;  %4348 = vtanh.f32 %v1380_v36 }
 0x157   : > { %3164 = vst [vmem:[%s4978_s12 + $0x98] sm:$0xff] %v3084_v39  ;;  %v2068_v42 = vpop.f32.mrf.mxu2  ;;  %v2757_v43 = vpop.f32.mrf.mxu3 }
 0x158   : > { %v4343_v46 = vpop.eup %4342  ;;  %v2069_v47 = vadd.f32 %v5110_v40, %v2068_v42  ;;  %v2758_v48 = vadd.f32 %v5110_v40, %v2757_v43  ;;  %v773_v49 = vpop.f32.mrf.mxu0 }
 0x159   : > { %v1382_v50 = vpop.f32.mrf.mxu1  ;;  %v4345_v53 = vpop.eup %4344  ;;  %v2316_v54 = vadd.f32 %v4343_v46, %v1627_v41  ;;  %v774_v55 = vadd.f32 %v5110_v40, %v773_v49 }
 0x15a   : > { %v1383_v56 = vadd.f32 %v5110_v40, %v1382_v50  ;;  %4350 = vtanh.f32 %v2069_v47  ;;  %v4347_v57 = vpop.eup %4346 }
 0x15b   : > { %v3005_v58 = vadd.f32 %v4345_v53, %v2316_v54  ;;  %4352 = vtanh.f32 %v2758_v48  ;;  %812 = vmatmul.bf16.gmra.mxu0 %v4028_v44  ;;  %1421 = vmatmul.bf16.gmra.mxu1 %v4068_v45  ;;  %v4349_v59 = vpop.eup %4348  ;;  %v4030_v53 = vld [vmem:[%s4902_s19 + $0xa8] sm:$0xff] }
 0x15c   : > { %4354 = vtanh.f32 %v774_v55  ;;  %2110 = vmatmul.bf16.gmra.mxu2 %v4108_v51  ;;  %2799 = vmatmul.bf16.gmra.mxu3 %v4148_v52  ;;  %v1628_v61 = vadd.f32 %v4349_v59, %v4347_v57  ;;  %v4070_v54 = vld [vmem:[%s4907_s23 + $0xa8] sm:$0xff] }
 0x15d   : > { %v3085_v60 = vmul.f32 0.25, %v3005_v58  ;;  %4356 = vtanh.f32 %v1383_v56 }
 0x15f   : > { %3165 = vst [vmem:[%s4978_s12 + $0xa0] sm:$0xff] %v3085_v60  ;;  %v2071_v62 = vpop.f32.mrf.mxu2  ;;  %v2760_v63 = vpop.f32.mrf.mxu3  ;;  %v4110_v60 = vld [vmem:[%s4912_s26 + $0xa8] sm:$0xff] }
 0x160   : > { %v4351_v0 = vpop.eup %4350  ;;  %v2072_v1 = vadd.f32 %v5110_v40, %v2071_v62  ;;  %v2761_v2 = vadd.f32 %v5110_v40, %v2760_v63  ;;  %v775_v3 = vpop.f32.mrf.mxu0 }
 0x161   : > { %v1384_v4 = vpop.f32.mrf.mxu1  ;;  %v4353_v5 = vpop.eup %4352  ;;  %v2317_v6 = vadd.f32 %v4351_v0, %v1628_v61  ;;  %v776_v7 = vadd.f32 %v5110_v40, %v775_v3  ;;  %v4150_v61 = vld [vmem:[%s4917_s29 + $0xa8] sm:$0xff] }
 0x162   : > { %v4355_v8 = vpop.eup %4354  ;;  %4358 = vtanh.f32 %v2072_v1  ;;  %v1385_v9 = vadd.f32 %v5110_v40, %v1384_v4 }
 0x163   : > { %v4357_v10 = vpop.eup %4356  ;;  %v3006_v11 = vadd.f32 %v4353_v5, %v2317_v6  ;;  %4360 = vtanh.f32 %v2761_v2 }
 0x164   : > { %v1629_v13 = vadd.f32 %v4357_v10, %v4355_v8  ;;  %4362 = vtanh.f32 %v776_v7 }
 0x165   : > { %v3086_v12 = vmul.f32 0.25, %v3006_v11  ;;  %4364 = vtanh.f32 %v1385_v9 }
 0x167   : > { %3166 = vst [vmem:[%s4978_s12 + $0xa8] sm:$0xff] %v3086_v12  ;;  %v2073_v14 = vpop.f32.mrf.mxu2  ;;  %v2762_v15 = vpop.f32.mrf.mxu3 }
 0x168   : > { %v4359_v18 = vpop.eup %4358  ;;  %v2074_v19 = vadd.f32 %v5110_v40, %v2073_v14  ;;  %v2763_v20 = vadd.f32 %v5110_v40, %v2762_v15  ;;  %v778_v21 = vpop.f32.mrf.mxu0 }
 0x169   : > { %v1387_v22 = vpop.f32.mrf.mxu1  ;;  %v4361_v25 = vpop.eup %4360  ;;  %v2318_v26 = vadd.f32 %v4359_v18, %v1629_v13  ;;  %v779_v27 = vadd.f32 %v5110_v40, %v778_v21 }
 0x16a   : > { %v1388_v28 = vadd.f32 %v5110_v40, %v1387_v22  ;;  %4366 = vtanh.f32 %v2074_v19  ;;  %v4363_v29 = vpop.eup %4362 }
 0x16b   : > { %v3007_v30 = vadd.f32 %v4361_v25, %v2318_v26  ;;  %4368 = vtanh.f32 %v2763_v20  ;;  %817 = vmatmul.bf16.gmra.mxu0 %v4029_v16  ;;  %1426 = vmatmul.bf16.gmra.mxu1 %v4069_v17  ;;  %v4365_v31 = vpop.eup %4364  ;;  %v4031_v25 = vld [vmem:[%s4902_s19 + $0xb0] sm:$0xff] }
 0x16c   : > { %4370 = vtanh.f32 %v779_v27  ;;  %2115 = vmatmul.bf16.gmra.mxu2 %v4109_v23  ;;  %2804 = vmatmul.bf16.gmra.mxu3 %v4149_v24  ;;  %v1630_v33 = vadd.f32 %v4365_v31, %v4363_v29  ;;  %v4071_v26 = vld [vmem:[%s4907_s23 + $0xb0] sm:$0xff] }
 0x16d   : > { %v3087_v32 = vmul.f32 0.25, %v3007_v30  ;;  %4372 = vtanh.f32 %v1388_v28 }
 0x16f   : > { %3167 = vst [vmem:[%s4978_s12 + $0xb0] sm:$0xff] %v3087_v32  ;;  %v2076_v34 = vpop.f32.mrf.mxu2  ;;  %v2765_v35 = vpop.f32.mrf.mxu3  ;;  %v4111_v32 = vld [vmem:[%s4912_s26 + $0xb0] sm:$0xff] }
 0x170   : > { %v4367_v36 = vpop.eup %4366  ;;  %v2077_v37 = vadd.f32 %v5110_v40, %v2076_v34  ;;  %v2766_v38 = vadd.f32 %v5110_v40, %v2765_v35  ;;  %v780_v39 = vpop.f32.mrf.mxu0 }
 0x171   : > { %v1389_v41 = vpop.f32.mrf.mxu1  ;;  %v4369_v42 = vpop.eup %4368  ;;  %v2319_v43 = vadd.f32 %v4367_v36, %v1630_v33  ;;  %v781_v44 = vadd.f32 %v5110_v40, %v780_v39  ;;  %v4151_v33 = vld [vmem:[%s4917_s29 + $0xb0] sm:$0xff] }
 0x172   : > { %v4371_v45 = vpop.eup %4370  ;;  %4374 = vtanh.f32 %v2077_v37  ;;  %v1390_v46 = vadd.f32 %v5110_v40, %v1389_v41 }
 0x173   : > { %v4373_v47 = vpop.eup %4372  ;;  %v3008_v48 = vadd.f32 %v4369_v42, %v2319_v43  ;;  %4376 = vtanh.f32 %v2766_v38 }
 0x174   : > { %v1631_v50 = vadd.f32 %v4373_v47, %v4371_v45  ;;  %4378 = vtanh.f32 %v781_v44 }
 0x175   : > { %v3088_v49 = vmul.f32 0.25, %v3008_v48  ;;  %4380 = vtanh.f32 %v1390_v46 }
 0x177   : > { %3168 = vst [vmem:[%s4978_s12 + $0xb8] sm:$0xff] %v3088_v49  ;;  %v2078_v51 = vpop.f32.mrf.mxu2  ;;  %v2767_v52 = vpop.f32.mrf.mxu3 }
 0x178   : > { %v4375_v55 = vpop.eup %4374  ;;  %v2079_v56 = vadd.f32 %v5110_v40, %v2078_v51  ;;  %v2768_v57 = vadd.f32 %v5110_v40, %v2767_v52  ;;  %v783_v58 = vpop.f32.mrf.mxu0 }
 0x179   : > { %v1392_v59 = vpop.f32.mrf.mxu1  ;;  %v4377_v62 = vpop.eup %4376  ;;  %v2320_v63 = vadd.f32 %v4375_v55, %v1631_v50  ;;  %v784_v0 = vadd.f32 %v5110_v40, %v783_v58 }
 0x17a   : > { %v1393_v1 = vadd.f32 %v5110_v40, %v1392_v59  ;;  %4382 = vtanh.f32 %v2079_v56  ;;  %v4379_v2 = vpop.eup %4378 }
 0x17b   : > { %v3009_v3 = vadd.f32 %v4377_v62, %v2320_v63  ;;  %4384 = vtanh.f32 %v2768_v57  ;;  %822 = vmatmul.bf16.gmra.mxu0 %v4030_v53  ;;  %1431 = vmatmul.bf16.gmra.mxu1 %v4070_v54  ;;  %v4381_v4 = vpop.eup %4380  ;;  %v4032_v62 = vld [vmem:[%s4902_s19 + $0xb8] sm:$0xff] }
 0x17c   : > { %4386 = vtanh.f32 %v784_v0  ;;  %2120 = vmatmul.bf16.gmra.mxu2 %v4110_v60  ;;  %2809 = vmatmul.bf16.gmra.mxu3 %v4150_v61  ;;  %v1632_v6 = vadd.f32 %v4381_v4, %v4379_v2  ;;  %v4072_v63 = vld [vmem:[%s4907_s23 + $0xb8] sm:$0xff] }
 0x17d   : > { %v3089_v5 = vmul.f32 0.25, %v3009_v3  ;;  %4388 = vtanh.f32 %v1393_v1 }
 0x17f   : > { %3169 = vst [vmem:[%s4978_s12 + $0xc0] sm:$0xff] %v3089_v5  ;;  %v2081_v7 = vpop.f32.mrf.mxu2  ;;  %v2770_v8 = vpop.f32.mrf.mxu3  ;;  %v4112_v5 = vld [vmem:[%s4912_s26 + $0xb8] sm:$0xff] }
 0x180   : > { %v4383_v9 = vpop.eup %4382  ;;  %v2082_v10 = vadd.f32 %v5110_v40, %v2081_v7  ;;  %v2771_v11 = vadd.f32 %v5110_v40, %v2770_v8  ;;  %v785_v12 = vpop.f32.mrf.mxu0 }
 0x181   : > { %v1394_v13 = vpop.f32.mrf.mxu1  ;;  %v4385_v14 = vpop.eup %4384  ;;  %v2321_v15 = vadd.f32 %v4383_v9, %v1632_v6  ;;  %v786_v16 = vadd.f32 %v5110_v40, %v785_v12  ;;  %v4152_v6 = vld [vmem:[%s4917_s29 + $0xb8] sm:$0xff] }
 0x182   : > { %v4387_v17 = vpop.eup %4386  ;;  %4390 = vtanh.f32 %v2082_v10  ;;  %v1395_v18 = vadd.f32 %v5110_v40, %v1394_v13 }
 0x183   : > { %v4389_v19 = vpop.eup %4388  ;;  %v3010_v20 = vadd.f32 %v4385_v14, %v2321_v15  ;;  %4392 = vtanh.f32 %v2771_v11 }
 0x184   : > { %v1633_v22 = vadd.f32 %v4389_v19, %v4387_v17  ;;  %4394 = vtanh.f32 %v786_v16 }
 0x185   : > { %v3090_v21 = vmul.f32 0.25, %v3010_v20  ;;  %4396 = vtanh.f32 %v1395_v18 }
 0x187   : > { %3170 = vst [vmem:[%s4978_s12 + $0xc8] sm:$0xff] %v3090_v21  ;;  %v2083_v23 = vpop.f32.mrf.mxu2  ;;  %v2772_v24 = vpop.f32.mrf.mxu3 }
 0x188   : > { %v4391_v27 = vpop.eup %4390  ;;  %v2084_v28 = vadd.f32 %v5110_v40, %v2083_v23  ;;  %v2773_v29 = vadd.f32 %v5110_v40, %v2772_v24  ;;  %v788_v30 = vpop.f32.mrf.mxu0 }
 0x189   : > { %v1397_v31 = vpop.f32.mrf.mxu1  ;;  %v4393_v34 = vpop.eup %4392  ;;  %v2322_v35 = vadd.f32 %v4391_v27, %v1633_v22  ;;  %v789_v36 = vadd.f32 %v5110_v40, %v788_v30 }
 0x18a   : > { %v1398_v37 = vadd.f32 %v5110_v40, %v1397_v31  ;;  %4398 = vtanh.f32 %v2084_v28  ;;  %v4395_v38 = vpop.eup %4394 }
 0x18b   : > { %v3011_v39 = vadd.f32 %v4393_v34, %v2322_v35  ;;  %4400 = vtanh.f32 %v2773_v29  ;;  %827 = vmatmul.bf16.gmra.mxu0 %v4031_v25  ;;  %1436 = vmatmul.bf16.gmra.mxu1 %v4071_v26  ;;  %v4397_v41 = vpop.eup %4396  ;;  %v4033_v34 = vld [vmem:[%s4902_s19 + $0xc0] sm:$0xff] }
 0x18c   : > { %4402 = vtanh.f32 %v789_v36  ;;  %2125 = vmatmul.bf16.gmra.mxu2 %v4111_v32  ;;  %2814 = vmatmul.bf16.gmra.mxu3 %v4151_v33  ;;  %v1634_v43 = vadd.f32 %v4397_v41, %v4395_v38  ;;  %v4073_v35 = vld [vmem:[%s4907_s23 + $0xc0] sm:$0xff] }
 0x18d   : > { %v3091_v42 = vmul.f32 0.25, %v3011_v39  ;;  %4404 = vtanh.f32 %v1398_v37 }
 0x18f   : > { %3171 = vst [vmem:[%s4978_s12 + $0xd0] sm:$0xff] %v3091_v42  ;;  %v2086_v44 = vpop.f32.mrf.mxu2  ;;  %v2775_v45 = vpop.f32.mrf.mxu3  ;;  %v4113_v42 = vld [vmem:[%s4912_s26 + $0xc0] sm:$0xff] }
 0x190   : > { %v4399_v46 = vpop.eup %4398  ;;  %v2087_v47 = vadd.f32 %v5110_v40, %v2086_v44  ;;  %v2776_v48 = vadd.f32 %v5110_v40, %v2775_v45  ;;  %v790_v49 = vpop.f32.mrf.mxu0 }
 0x191   : > { %v1399_v50 = vpop.f32.mrf.mxu1  ;;  %v4401_v51 = vpop.eup %4400  ;;  %v2323_v52 = vadd.f32 %v4399_v46, %v1634_v43  ;;  %v791_v53 = vadd.f32 %v5110_v40, %v790_v49  ;;  %v4153_v43 = vld [vmem:[%s4917_s29 + $0xc0] sm:$0xff] }
 0x192   : > { %v4403_v54 = vpop.eup %4402  ;;  %4406 = vtanh.f32 %v2087_v47  ;;  %v1400_v55 = vadd.f32 %v5110_v40, %v1399_v50 }
 0x193   : > { %v4405_v56 = vpop.eup %4404  ;;  %v3012_v57 = vadd.f32 %v4401_v51, %v2323_v52  ;;  %4408 = vtanh.f32 %v2776_v48 }
 0x194   : > { %v1635_v59 = vadd.f32 %v4405_v56, %v4403_v54  ;;  %4410 = vtanh.f32 %v791_v53 }
 0x195   : > { %v3092_v58 = vmul.f32 0.25, %v3012_v57  ;;  %4412 = vtanh.f32 %v1400_v55 }
 0x197   : > { %3172 = vst [vmem:[%s4978_s12 + $0xd8] sm:$0xff] %v3092_v58  ;;  %v2088_v60 = vpop.f32.mrf.mxu2  ;;  %v2777_v61 = vpop.f32.mrf.mxu3 }
 0x198   : > { %v4407_v0 = vpop.eup %4406  ;;  %v2089_v1 = vadd.f32 %v5110_v40, %v2088_v60  ;;  %v2778_v2 = vadd.f32 %v5110_v40, %v2777_v61  ;;  %v793_v3 = vpop.f32.mrf.mxu0 }
 0x199   : > { %v1402_v4 = vpop.f32.mrf.mxu1  ;;  %v4409_v7 = vpop.eup %4408  ;;  %v2324_v8 = vadd.f32 %v4407_v0, %v1635_v59  ;;  %v794_v9 = vadd.f32 %v5110_v40, %v793_v3 }
 0x19a   : > { %v1403_v10 = vadd.f32 %v5110_v40, %v1402_v4  ;;  %4414 = vtanh.f32 %v2089_v1  ;;  %v4411_v11 = vpop.eup %4410 }
 0x19b   : > { %v3013_v12 = vadd.f32 %v4409_v7, %v2324_v8  ;;  %4416 = vtanh.f32 %v2778_v2  ;;  %832 = vmatmul.bf16.gmra.mxu0 %v4032_v62  ;;  %1441 = vmatmul.bf16.gmra.mxu1 %v4072_v63  ;;  %v4413_v13 = vpop.eup %4412  ;;  %v4034_v7 = vld [vmem:[%s4902_s19 + $0xc8] sm:$0xff] }
 0x19c   : > { %4418 = vtanh.f32 %v794_v9  ;;  %2130 = vmatmul.bf16.gmra.mxu2 %v4112_v5  ;;  %2819 = vmatmul.bf16.gmra.mxu3 %v4152_v6  ;;  %v1636_v15 = vadd.f32 %v4413_v13, %v4411_v11  ;;  %v4074_v8 = vld [vmem:[%s4907_s23 + $0xc8] sm:$0xff] }
 0x19d   : > { %v3093_v14 = vmul.f32 0.25, %v3013_v12  ;;  %4420 = vtanh.f32 %v1403_v10 }
 0x19f   : > { %3173 = vst [vmem:[%s4978_s12 + $0xe0] sm:$0xff] %v3093_v14  ;;  %v2091_v16 = vpop.f32.mrf.mxu2  ;;  %v2780_v17 = vpop.f32.mrf.mxu3  ;;  %v4114_v14 = vld [vmem:[%s4912_s26 + $0xc8] sm:$0xff] }
 0x1a0   : > { %v4415_v18 = vpop.eup %4414  ;;  %v2092_v19 = vadd.f32 %v5110_v40, %v2091_v16  ;;  %v2781_v20 = vadd.f32 %v5110_v40, %v2780_v17  ;;  %v795_v21 = vpop.f32.mrf.mxu0 }
 0x1a1   : > { %v1404_v22 = vpop.f32.mrf.mxu1  ;;  %v4417_v23 = vpop.eup %4416  ;;  %v2325_v24 = vadd.f32 %v4415_v18, %v1636_v15  ;;  %v796_v25 = vadd.f32 %v5110_v40, %v795_v21  ;;  %v4154_v15 = vld [vmem:[%s4917_s29 + $0xc8] sm:$0xff] }
 0x1a2   : > { %v4419_v26 = vpop.eup %4418  ;;  %4422 = vtanh.f32 %v2092_v19  ;;  %v1405_v27 = vadd.f32 %v5110_v40, %v1404_v22 }
 0x1a3   : > { %v4421_v28 = vpop.eup %4420  ;;  %v3014_v29 = vadd.f32 %v4417_v23, %v2325_v24  ;;  %4424 = vtanh.f32 %v2781_v20 }
 0x1a4   : > { %v1637_v31 = vadd.f32 %v4421_v28, %v4419_v26  ;;  %4426 = vtanh.f32 %v796_v25 }
 0x1a5   : > { %v3094_v30 = vmul.f32 0.25, %v3014_v29  ;;  %4428 = vtanh.f32 %v1405_v27 }
 0x1a7   : > { %3174 = vst [vmem:[%s4978_s12 + $0xe8] sm:$0xff] %v3094_v30  ;;  %v2093_v32 = vpop.f32.mrf.mxu2  ;;  %v2782_v33 = vpop.f32.mrf.mxu3 }
 0x1a8   : > { %v4423_v36 = vpop.eup %4422  ;;  %v2094_v37 = vadd.f32 %v5110_v40, %v2093_v32  ;;  %v2783_v38 = vadd.f32 %v5110_v40, %v2782_v33  ;;  %v798_v39 = vpop.f32.mrf.mxu0 }
 0x1a9   : > { %v1407_v41 = vpop.f32.mrf.mxu1  ;;  %v4425_v44 = vpop.eup %4424  ;;  %v2326_v45 = vadd.f32 %v4423_v36, %v1637_v31  ;;  %v799_v46 = vadd.f32 %v5110_v40, %v798_v39 }
 0x1aa   : > { %v1408_v47 = vadd.f32 %v5110_v40, %v1407_v41  ;;  %4430 = vtanh.f32 %v2094_v37  ;;  %v4427_v48 = vpop.eup %4426 }
 0x1ab   : > { %v3015_v49 = vadd.f32 %v4425_v44, %v2326_v45  ;;  %4432 = vtanh.f32 %v2783_v38  ;;  %837 = vmatmul.bf16.gmra.mxu0 %v4033_v34  ;;  %1446 = vmatmul.bf16.gmra.mxu1 %v4073_v35  ;;  %v4429_v50 = vpop.eup %4428  ;;  %v4035_v44 = vld [vmem:[%s4902_s19 + $0xd0] sm:$0xff] }
 0x1ac   : > { %4434 = vtanh.f32 %v799_v46  ;;  %2135 = vmatmul.bf16.gmra.mxu2 %v4113_v42  ;;  %2824 = vmatmul.bf16.gmra.mxu3 %v4153_v43  ;;  %v1638_v52 = vadd.f32 %v4429_v50, %v4427_v48  ;;  %v4075_v45 = vld [vmem:[%s4907_s23 + $0xd0] sm:$0xff] }
 0x1ad   : > { %v3095_v51 = vmul.f32 0.25, %v3015_v49  ;;  %4436 = vtanh.f32 %v1408_v47 }
 0x1af   : > { %3175 = vst [vmem:[%s4978_s12 + $0xf0] sm:$0xff] %v3095_v51  ;;  %v2096_v53 = vpop.f32.mrf.mxu2  ;;  %v2785_v54 = vpop.f32.mrf.mxu3  ;;  %v4115_v51 = vld [vmem:[%s4912_s26 + $0xd0] sm:$0xff] }
 0x1b0   : > { %v4431_v55 = vpop.eup %4430  ;;  %v2097_v56 = vadd.f32 %v5110_v40, %v2096_v53  ;;  %v2786_v57 = vadd.f32 %v5110_v40, %v2785_v54  ;;  %v800_v58 = vpop.f32.mrf.mxu0 }
 0x1b1   : > { %v1409_v59 = vpop.f32.mrf.mxu1  ;;  %v4433_v60 = vpop.eup %4432  ;;  %v2327_v61 = vadd.f32 %v4431_v55, %v1638_v52  ;;  %v801_v62 = vadd.f32 %v5110_v40, %v800_v58  ;;  %v4155_v52 = vld [vmem:[%s4917_s29 + $0xd0] sm:$0xff] }
 0x1b2   : > { %v4435_v63 = vpop.eup %4434  ;;  %4438 = vtanh.f32 %v2097_v56  ;;  %v1410_v0 = vadd.f32 %v5110_v40, %v1409_v59 }
 0x1b3   : > { %v4437_v1 = vpop.eup %4436  ;;  %v3016_v2 = vadd.f32 %v4433_v60, %v2327_v61  ;;  %4440 = vtanh.f32 %v2786_v57 }
 0x1b4   : > { %v1639_v4 = vadd.f32 %v4437_v1, %v4435_v63  ;;  %4442 = vtanh.f32 %v801_v62 }
 0x1b5   : > { %v3096_v3 = vmul.f32 0.25, %v3016_v2  ;;  %4444 = vtanh.f32 %v1410_v0 }
 0x1b7   : > { %3176 = vst [vmem:[%s4978_s12 + $0xf8] sm:$0xff] %v3096_v3  ;;  %v2098_v5 = vpop.f32.mrf.mxu2  ;;  %v2787_v6 = vpop.f32.mrf.mxu3 }
 0x1b8   : > { %v4439_v9 = vpop.eup %4438  ;;  %v2099_v10 = vadd.f32 %v5110_v40, %v2098_v5  ;;  %v2788_v11 = vadd.f32 %v5110_v40, %v2787_v6  ;;  %v803_v12 = vpop.f32.mrf.mxu0 }
 0x1b9   : > { %v1412_v13 = vpop.f32.mrf.mxu1  ;;  %v4441_v16 = vpop.eup %4440  ;;  %v2328_v17 = vadd.f32 %v4439_v9, %v1639_v4  ;;  %v804_v18 = vadd.f32 %v5110_v40, %v803_v12 }
 0x1ba   : > { %v1413_v19 = vadd.f32 %v5110_v40, %v1412_v13  ;;  %4446 = vtanh.f32 %v2099_v10  ;;  %v4443_v20 = vpop.eup %4442 }
 0x1bb   : > { %v3017_v21 = vadd.f32 %v4441_v16, %v2328_v17  ;;  %4448 = vtanh.f32 %v2788_v11  ;;  %842 = vmatmul.bf16.gmra.mxu0 %v4034_v7  ;;  %1451 = vmatmul.bf16.gmra.mxu1 %v4074_v8  ;;  %v4445_v22 = vpop.eup %4444  ;;  %v4036_v16 = vld [vmem:[%s4902_s19 + $0xd8] sm:$0xff] }
 0x1bc   : > { %4450 = vtanh.f32 %v804_v18  ;;  %2140 = vmatmul.bf16.gmra.mxu2 %v4114_v14  ;;  %2829 = vmatmul.bf16.gmra.mxu3 %v4154_v15  ;;  %v1640_v24 = vadd.f32 %v4445_v22, %v4443_v20  ;;  %v4076_v17 = vld [vmem:[%s4907_s23 + $0xd8] sm:$0xff] }
 0x1bd   : > { %v3097_v23 = vmul.f32 0.25, %v3017_v21  ;;  %4452 = vtanh.f32 %v1413_v19 }
 0x1bf   : > { %3177 = vst [vmem:[%s4978_s12 + $0x100] sm:$0xff] %v3097_v23  ;;  %v2101_v25 = vpop.f32.mrf.mxu2  ;;  %v2790_v26 = vpop.f32.mrf.mxu3  ;;  %v4116_v23 = vld [vmem:[%s4912_s26 + $0xd8] sm:$0xff] }
 0x1c0   : > { %v4447_v27 = vpop.eup %4446  ;;  %v2102_v28 = vadd.f32 %v5110_v40, %v2101_v25  ;;  %v2791_v29 = vadd.f32 %v5110_v40, %v2790_v26  ;;  %v805_v30 = vpop.f32.mrf.mxu0 }
 0x1c1   : > { %v1414_v31 = vpop.f32.mrf.mxu1  ;;  %v4449_v32 = vpop.eup %4448  ;;  %v2329_v33 = vadd.f32 %v4447_v27, %v1640_v24  ;;  %v806_v34 = vadd.f32 %v5110_v40, %v805_v30  ;;  %v4156_v24 = vld [vmem:[%s4917_s29 + $0xd8] sm:$0xff] }
 0x1c2   : > { %v4451_v35 = vpop.eup %4450  ;;  %4454 = vtanh.f32 %v2102_v28  ;;  %v1415_v36 = vadd.f32 %v5110_v40, %v1414_v31 }
 0x1c3   : > { %v4453_v37 = vpop.eup %4452  ;;  %v3018_v38 = vadd.f32 %v4449_v32, %v2329_v33  ;;  %4456 = vtanh.f32 %v2791_v29 }
 0x1c4   : > { %v1641_v41 = vadd.f32 %v4453_v37, %v4451_v35  ;;  %4458 = vtanh.f32 %v806_v34 }
 0x1c5   : > { %v3098_v39 = vmul.f32 0.25, %v3018_v38  ;;  %4460 = vtanh.f32 %v1415_v36 }
 0x1c7   : > { %3178 = vst [vmem:[%s4978_s12 + $0x108] sm:$0xff] %v3098_v39  ;;  %v2103_v42 = vpop.f32.mrf.mxu2  ;;  %v2792_v43 = vpop.f32.mrf.mxu3 }
 0x1c8   : > { %v4455_v46 = vpop.eup %4454  ;;  %v2104_v47 = vadd.f32 %v5110_v40, %v2103_v42  ;;  %v2793_v48 = vadd.f32 %v5110_v40, %v2792_v43  ;;  %v808_v49 = vpop.f32.mrf.mxu0 }
 0x1c9   : > { %v1417_v50 = vpop.f32.mrf.mxu1  ;;  %v4457_v53 = vpop.eup %4456  ;;  %v2330_v54 = vadd.f32 %v4455_v46, %v1641_v41  ;;  %v809_v55 = vadd.f32 %v5110_v40, %v808_v49 }
 0x1ca   : > { %v1418_v56 = vadd.f32 %v5110_v40, %v1417_v50  ;;  %4462 = vtanh.f32 %v2104_v47  ;;  %v4459_v57 = vpop.eup %4458 }
 0x1cb   : > { %v3019_v58 = vadd.f32 %v4457_v53, %v2330_v54  ;;  %4464 = vtanh.f32 %v2793_v48  ;;  %847 = vmatmul.bf16.gmra.mxu0 %v4035_v44  ;;  %1456 = vmatmul.bf16.gmra.mxu1 %v4075_v45  ;;  %v4461_v59 = vpop.eup %4460  ;;  %v4037_v53 = vld [vmem:[%s4902_s19 + $0xe0] sm:$0xff] }
 0x1cc   : > { %4466 = vtanh.f32 %v809_v55  ;;  %2145 = vmatmul.bf16.gmra.mxu2 %v4115_v51  ;;  %2834 = vmatmul.bf16.gmra.mxu3 %v4155_v52  ;;  %v1642_v61 = vadd.f32 %v4461_v59, %v4459_v57  ;;  %v4077_v54 = vld [vmem:[%s4907_s23 + $0xe0] sm:$0xff] }
 0x1cd   : > { %v3099_v60 = vmul.f32 0.25, %v3019_v58  ;;  %4468 = vtanh.f32 %v1418_v56 }
 0x1cf   : > { %3179 = vst [vmem:[%s4978_s12 + $0x110] sm:$0xff] %v3099_v60  ;;  %v2106_v62 = vpop.f32.mrf.mxu2  ;;  %v2795_v63 = vpop.f32.mrf.mxu3  ;;  %v4117_v60 = vld [vmem:[%s4912_s26 + $0xe0] sm:$0xff] }
 0x1d0   : > { %v4463_v0 = vpop.eup %4462  ;;  %v2107_v1 = vadd.f32 %v5110_v40, %v2106_v62  ;;  %v2796_v2 = vadd.f32 %v5110_v40, %v2795_v63  ;;  %v810_v3 = vpop.f32.mrf.mxu0 }
 0x1d1   : > { %v1419_v4 = vpop.f32.mrf.mxu1  ;;  %v4465_v5 = vpop.eup %4464  ;;  %v2331_v6 = vadd.f32 %v4463_v0, %v1642_v61  ;;  %v811_v7 = vadd.f32 %v5110_v40, %v810_v3  ;;  %v4157_v61 = vld [vmem:[%s4917_s29 + $0xe0] sm:$0xff] }
 0x1d2   : > { %v4467_v8 = vpop.eup %4466  ;;  %4470 = vtanh.f32 %v2107_v1  ;;  %v1420_v9 = vadd.f32 %v5110_v40, %v1419_v4 }
 0x1d3   : > { %v4469_v10 = vpop.eup %4468  ;;  %v3020_v11 = vadd.f32 %v4465_v5, %v2331_v6  ;;  %4472 = vtanh.f32 %v2796_v2 }
 0x1d4   : > { %v1643_v13 = vadd.f32 %v4469_v10, %v4467_v8  ;;  %4474 = vtanh.f32 %v811_v7 }
 0x1d5   : > { %v3100_v12 = vmul.f32 0.25, %v3020_v11  ;;  %4476 = vtanh.f32 %v1420_v9 }
 0x1d7   : > { %3180 = vst [vmem:[%s4978_s12 + $0x118] sm:$0xff] %v3100_v12  ;;  %v2108_v14 = vpop.f32.mrf.mxu2  ;;  %v2797_v15 = vpop.f32.mrf.mxu3 }
 0x1d8   : > { %v4471_v18 = vpop.eup %4470  ;;  %v2109_v19 = vadd.f32 %v5110_v40, %v2108_v14  ;;  %v2798_v20 = vadd.f32 %v5110_v40, %v2797_v15  ;;  %v813_v21 = vpop.f32.mrf.mxu0 }
 0x1d9   : > { %v1422_v22 = vpop.f32.mrf.mxu1  ;;  %v4473_v25 = vpop.eup %4472  ;;  %v2332_v26 = vadd.f32 %v4471_v18, %v1643_v13  ;;  %v814_v27 = vadd.f32 %v5110_v40, %v813_v21 }
 0x1da   : > { %v1423_v28 = vadd.f32 %v5110_v40, %v1422_v22  ;;  %4478 = vtanh.f32 %v2109_v19  ;;  %v4475_v29 = vpop.eup %4474 }
 0x1db   : > { %v3021_v30 = vadd.f32 %v4473_v25, %v2332_v26  ;;  %4480 = vtanh.f32 %v2798_v20  ;;  %852 = vmatmul.bf16.gmra.mxu0 %v4036_v16  ;;  %1461 = vmatmul.bf16.gmra.mxu1 %v4076_v17  ;;  %v4477_v31 = vpop.eup %4476  ;;  %v4038_v25 = vld [vmem:[%s4902_s19 + $0xe8] sm:$0xff] }
 0x1dc   : > { %4482 = vtanh.f32 %v814_v27  ;;  %2150 = vmatmul.bf16.gmra.mxu2 %v4116_v23  ;;  %2839 = vmatmul.bf16.gmra.mxu3 %v4156_v24  ;;  %v1644_v33 = vadd.f32 %v4477_v31, %v4475_v29  ;;  %v4078_v26 = vld [vmem:[%s4907_s23 + $0xe8] sm:$0xff] }
 0x1dd   : > { %v3101_v32 = vmul.f32 0.25, %v3021_v30  ;;  %4484 = vtanh.f32 %v1423_v28  ;;  %v5262_v28 = vld [vmem:[%s5513_s5] ss:$0 sm:$0xff] }
 0x1df   : > { %3181 = vst [vmem:[%s4978_s12 + $0x120] sm:$0xff] %v3101_v32  ;;  %v2111_v34 = vpop.f32.mrf.mxu2  ;;  %v2800_v35 = vpop.f32.mrf.mxu3  ;;  %v4118_v32 = vld [vmem:[%s4912_s26 + $0xe8] sm:$0xff] }
 0x1e0   : > { %v4479_v36 = vpop.eup %4478  ;;  %v2112_v37 = vadd.f32 %v5110_v40, %v2111_v34  ;;  %v2801_v38 = vadd.f32 %v5110_v40, %v2800_v35  ;;  %v815_v39 = vpop.f32.mrf.mxu0 }
 0x1e1   : > { %v1424_v41 = vpop.f32.mrf.mxu1  ;;  %v4481_v42 = vpop.eup %4480  ;;  %v2333_v43 = vadd.f32 %v4479_v36, %v1644_v33  ;;  %v816_v44 = vadd.f32 %v5110_v40, %v815_v39  ;;  %v4158_v33 = vld [vmem:[%s4917_s29 + $0xe8] sm:$0xff] }
 0x1e2   : > { %v4483_v45 = vpop.eup %4482  ;;  %4486 = vtanh.f32 %v2112_v37  ;;  %v1425_v46 = vadd.f32 %v5110_v40, %v1424_v41 }
 0x1e3   : > { %v4485_v47 = vpop.eup %4484  ;;  %v3022_v48 = vadd.f32 %v4481_v42, %v2333_v43  ;;  %4488 = vtanh.f32 %v2801_v38 }
 0x1e4   : > { %v1645_v50 = vadd.f32 %v4485_v47, %v4483_v45  ;;  %4490 = vtanh.f32 %v816_v44 }
 0x1e5   : > { %v3102_v49 = vmul.f32 0.25, %v3022_v48  ;;  %4492 = vtanh.f32 %v1425_v46 }
 0x1e7   : > { %3182 = vst [vmem:[%s4978_s12 + $0x128] sm:$0xff] %v3102_v49  ;;  %v2113_v51 = vpop.f32.mrf.mxu2  ;;  %v2802_v52 = vpop.f32.mrf.mxu3 }
 0x1e8   : > { %v4487_v55 = vpop.eup %4486  ;;  %v2114_v56 = vadd.f32 %v5110_v40, %v2113_v51  ;;  %v2803_v57 = vadd.f32 %v5110_v40, %v2802_v52  ;;  %v818_v58 = vpop.f32.mrf.mxu0 }
 0x1e9   : > { %v1427_v59 = vpop.f32.mrf.mxu1  ;;  %v4489_v62 = vpop.eup %4488  ;;  %v2334_v63 = vadd.f32 %v4487_v55, %v1645_v50  ;;  %v819_v0 = vadd.f32 %v5110_v40, %v818_v58 }
 0x1ea   : > { %v1428_v1 = vadd.f32 %v5110_v40, %v1427_v59  ;;  %4494 = vtanh.f32 %v2114_v56  ;;  %v4491_v2 = vpop.eup %4490 }
 0x1eb   : > { %v3023_v3 = vadd.f32 %v4489_v62, %v2334_v63  ;;  %4496 = vtanh.f32 %v2803_v57  ;;  %857 = vmatmul.bf16.gmra.mxu0 %v4037_v53  ;;  %1466 = vmatmul.bf16.gmra.mxu1 %v4077_v54  ;;  %v4493_v4 = vpop.eup %4492  ;;  %v4039_v62 = vld [vmem:[%s4902_s19 + $0xf0] sm:$0xff] }
 0x1ec   : > { %4498 = vtanh.f32 %v819_v0  ;;  %2155 = vmatmul.bf16.gmra.mxu2 %v4117_v60  ;;  %2844 = vmatmul.bf16.gmra.mxu3 %v4157_v61  ;;  %v1646_v6 = vadd.f32 %v4493_v4, %v4491_v2  ;;  %v4079_v63 = vld [vmem:[%s4907_s23 + $0xf0] sm:$0xff] }
 0x1ed   : > { %v3103_v5 = vmul.f32 0.25, %v3023_v3  ;;  %4500 = vtanh.f32 %v1428_v1 }
 0x1ef   : > { %3183 = vst [vmem:[%s4978_s12 + $0x130] sm:$0xff] %v3103_v5  ;;  %v2116_v7 = vpop.f32.mrf.mxu2  ;;  %v2805_v8 = vpop.f32.mrf.mxu3  ;;  %v4119_v5 = vld [vmem:[%s4912_s26 + $0xf0] sm:$0xff] }
 0x1f0   : > { %v4495_v9 = vpop.eup %4494  ;;  %v2117_v10 = vadd.f32 %v5110_v40, %v2116_v7  ;;  %v2806_v11 = vadd.f32 %v5110_v40, %v2805_v8  ;;  %v820_v12 = vpop.f32.mrf.mxu0 }
 0x1f1   : > { %v1429_v13 = vpop.f32.mrf.mxu1  ;;  %v4497_v14 = vpop.eup %4496  ;;  %v2335_v15 = vadd.f32 %v4495_v9, %v1646_v6  ;;  %v821_v16 = vadd.f32 %v5110_v40, %v820_v12  ;;  %v4159_v6 = vld [vmem:[%s4917_s29 + $0xf0] sm:$0xff] }
 0x1f2   : > { %v4499_v17 = vpop.eup %4498  ;;  %4502 = vtanh.f32 %v2117_v10  ;;  %v1430_v18 = vadd.f32 %v5110_v40, %v1429_v13 }
 0x1f3   : > { %v4501_v19 = vpop.eup %4500  ;;  %v3024_v20 = vadd.f32 %v4497_v14, %v2335_v15  ;;  %4504 = vtanh.f32 %v2806_v11 }
 0x1f4   : > { %v1647_v22 = vadd.f32 %v4501_v19, %v4499_v17  ;;  %4506 = vtanh.f32 %v821_v16 }
 0x1f5   : > { %v3104_v21 = vmul.f32 0.25, %v3024_v20  ;;  %4508 = vtanh.f32 %v1430_v18 }
 0x1f7   : > { %3184 = vst [vmem:[%s4978_s12 + $0x138] sm:$0xff] %v3104_v21  ;;  %v2118_v23 = vpop.f32.mrf.mxu2  ;;  %v2807_v24 = vpop.f32.mrf.mxu3 }
 0x1f8   : > { %v4503_v27 = vpop.eup %4502  ;;  %v2119_v40 = vadd.f32 %v5262_v28, %v2118_v23  ;;  %v2808_v29 = vadd.f32 %v5262_v28, %v2807_v24  ;;  %v823_v30 = vpop.f32.mrf.mxu0 }
 0x1f9   : > { %v1432_v31 = vpop.f32.mrf.mxu1  ;;  %v4505_v34 = vpop.eup %4504  ;;  %v2336_v35 = vadd.f32 %v4503_v27, %v1647_v22  ;;  %v824_v36 = vadd.f32 %v5262_v28, %v823_v30 }
 0x1fa   : > { %v1433_v37 = vadd.f32 %v5262_v28, %v1432_v31  ;;  %4510 = vtanh.f32 %v2119_v40  ;;  %v4507_v38 = vpop.eup %4506 }
 0x1fb   : > { %v3025_v39 = vadd.f32 %v4505_v34, %v2336_v35  ;;  %4512 = vtanh.f32 %v2808_v29  ;;  %862 = vmatmul.bf16.gmra.mxu0 %v4038_v25  ;;  %1471 = vmatmul.bf16.gmra.mxu1 %v4078_v26  ;;  %v4509_v41 = vpop.eup %4508  ;;  %v4040_v34 = vld [vmem:[%s4902_s19 + $0xf8] sm:$0xff] }
 0x1fc   : > { %4514 = vtanh.f32 %v824_v36  ;;  %2160 = vmatmul.bf16.gmra.mxu2 %v4118_v32  ;;  %2849 = vmatmul.bf16.gmra.mxu3 %v4158_v33  ;;  %v1648_v43 = vadd.f32 %v4509_v41, %v4507_v38  ;;  %v4080_v35 = vld [vmem:[%s4907_s23 + $0xf8] sm:$0xff] }
 0x1fd   : > { %v3105_v42 = vmul.f32 0.25, %v3025_v39  ;;  %4516 = vtanh.f32 %v1433_v37 }
 0x1ff   : > { %3185 = vst [vmem:[%s4978_s12 + $0x140] sm:$0xff] %v3105_v42  ;;  %v2121_v44 = vpop.f32.mrf.mxu2  ;;  %v2810_v45 = vpop.f32.mrf.mxu3  ;;  %v4120_v42 = vld [vmem:[%s4912_s26 + $0xf8] sm:$0xff] }
 0x200   : > { %v4511_v46 = vpop.eup %4510  ;;  %v2122_v47 = vadd.f32 %v5262_v28, %v2121_v44  ;;  %v2811_v48 = vadd.f32 %v5262_v28, %v2810_v45  ;;  %v825_v49 = vpop.f32.mrf.mxu0 }
 0x201   : > { %v1434_v50 = vpop.f32.mrf.mxu1  ;;  %v4513_v51 = vpop.eup %4512  ;;  %v2337_v52 = vadd.f32 %v4511_v46, %v1648_v43  ;;  %v826_v53 = vadd.f32 %v5262_v28, %v825_v49  ;;  %v4160_v43 = vld [vmem:[%s4917_s29 + $0xf8] sm:$0xff] }
 0x202   : > { %v4515_v54 = vpop.eup %4514  ;;  %4518 = vtanh.f32 %v2122_v47  ;;  %v1435_v55 = vadd.f32 %v5262_v28, %v1434_v50 }
 0x203   : > { %v4517_v56 = vpop.eup %4516  ;;  %v3026_v57 = vadd.f32 %v4513_v51, %v2337_v52  ;;  %4520 = vtanh.f32 %v2811_v48 }
 0x204   : > { %v1649_v59 = vadd.f32 %v4517_v56, %v4515_v54  ;;  %4522 = vtanh.f32 %v826_v53 }
 0x205   : > { %v3106_v58 = vmul.f32 0.25, %v3026_v57  ;;  %4524 = vtanh.f32 %v1435_v55 }
 0x207   : > { %3186 = vst [vmem:[%s4978_s12 + $0x148] sm:$0xff] %v3106_v58  ;;  %v2123_v60 = vpop.f32.mrf.mxu2  ;;  %v2812_v61 = vpop.f32.mrf.mxu3 }
 0x208   : > { %v4519_v0 = vpop.eup %4518  ;;  %v2124_v1 = vadd.f32 %v5262_v28, %v2123_v60  ;;  %v2813_v2 = vadd.f32 %v5262_v28, %v2812_v61  ;;  %v828_v3 = vpop.f32.mrf.mxu0 }
 0x209   : > { %v1437_v4 = vpop.f32.mrf.mxu1  ;;  %v4521_v7 = vpop.eup %4520  ;;  %v2338_v8 = vadd.f32 %v4519_v0, %v1649_v59  ;;  %v829_v9 = vadd.f32 %v5262_v28, %v828_v3 }
 0x20a   : > { %v1438_v10 = vadd.f32 %v5262_v28, %v1437_v4  ;;  %4526 = vtanh.f32 %v2124_v1  ;;  %v4523_v11 = vpop.eup %4522 }
 0x20b   : > { %v3027_v12 = vadd.f32 %v4521_v7, %v2338_v8  ;;  %4528 = vtanh.f32 %v2813_v2  ;;  %867 = vmatmul.bf16.gmra.mxu0 %v4039_v62  ;;  %1476 = vmatmul.bf16.gmra.mxu1 %v4079_v63  ;;  %v4525_v13 = vpop.eup %4524  ;;  %v4041_v7 = vld [vmem:[%s4902_s19 + $0x100] sm:$0xff] }
 0x20c   : > { %4530 = vtanh.f32 %v829_v9  ;;  %2165 = vmatmul.bf16.gmra.mxu2 %v4119_v5  ;;  %2854 = vmatmul.bf16.gmra.mxu3 %v4159_v6  ;;  %v1650_v15 = vadd.f32 %v4525_v13, %v4523_v11  ;;  %v4081_v8 = vld [vmem:[%s4907_s23 + $0x100] sm:$0xff] }
 0x20d   : > { %v3107_v14 = vmul.f32 0.25, %v3027_v12  ;;  %4532 = vtanh.f32 %v1438_v10 }
 0x20f   : > { %3187 = vst [vmem:[%s4978_s12 + $0x150] sm:$0xff] %v3107_v14  ;;  %v2126_v16 = vpop.f32.mrf.mxu2  ;;  %v2815_v17 = vpop.f32.mrf.mxu3  ;;  %v4121_v14 = vld [vmem:[%s4912_s26 + $0x100] sm:$0xff] }
 0x210   : > { %v4527_v18 = vpop.eup %4526  ;;  %v2127_v19 = vadd.f32 %v5262_v28, %v2126_v16  ;;  %v2816_v20 = vadd.f32 %v5262_v28, %v2815_v17  ;;  %v830_v21 = vpop.f32.mrf.mxu0 }
 0x211   : > { %v1439_v22 = vpop.f32.mrf.mxu1  ;;  %v4529_v23 = vpop.eup %4528  ;;  %v2339_v24 = vadd.f32 %v4527_v18, %v1650_v15  ;;  %v831_v25 = vadd.f32 %v5262_v28, %v830_v21  ;;  %v4161_v15 = vld [vmem:[%s4917_s29 + $0x100] sm:$0xff] }
 0x212   : > { %v4531_v26 = vpop.eup %4530  ;;  %4534 = vtanh.f32 %v2127_v19  ;;  %v1440_v27 = vadd.f32 %v5262_v28, %v1439_v22 }
 0x213   : > { %v4533_v40 = vpop.eup %4532  ;;  %v3028_v29 = vadd.f32 %v4529_v23, %v2339_v24  ;;  %4536 = vtanh.f32 %v2816_v20 }
 0x214   : > { %v1651_v31 = vadd.f32 %v4533_v40, %v4531_v26  ;;  %4538 = vtanh.f32 %v831_v25 }
 0x215   : > { %v3108_v30 = vmul.f32 0.25, %v3028_v29  ;;  %4540 = vtanh.f32 %v1440_v27 }
 0x217   : > { %3188 = vst [vmem:[%s4978_s12 + $0x158] sm:$0xff] %v3108_v30  ;;  %v2128_v32 = vpop.f32.mrf.mxu2  ;;  %v2817_v33 = vpop.f32.mrf.mxu3 }
 0x218   : > { %v4535_v36 = vpop.eup %4534  ;;  %v2129_v37 = vadd.f32 %v5262_v28, %v2128_v32  ;;  %v2818_v38 = vadd.f32 %v5262_v28, %v2817_v33  ;;  %v833_v39 = vpop.f32.mrf.mxu0 }
 0x219   : > { %v1442_v41 = vpop.f32.mrf.mxu1  ;;  %v4537_v44 = vpop.eup %4536  ;;  %v2340_v45 = vadd.f32 %v4535_v36, %v1651_v31  ;;  %v834_v46 = vadd.f32 %v5262_v28, %v833_v39 }
 0x21a   : > { %v1443_v47 = vadd.f32 %v5262_v28, %v1442_v41  ;;  %4542 = vtanh.f32 %v2129_v37  ;;  %v4539_v48 = vpop.eup %4538 }
 0x21b   : > { %v3029_v49 = vadd.f32 %v4537_v44, %v2340_v45  ;;  %4544 = vtanh.f32 %v2818_v38  ;;  %872 = vmatmul.bf16.gmra.mxu0 %v4040_v34  ;;  %1481 = vmatmul.bf16.gmra.mxu1 %v4080_v35  ;;  %v4541_v50 = vpop.eup %4540  ;;  %v4042_v44 = vld [vmem:[%s4902_s19 + $0x108] sm:$0xff] }
 0x21c   : > { %4546 = vtanh.f32 %v834_v46  ;;  %2170 = vmatmul.bf16.gmra.mxu2 %v4120_v42  ;;  %2859 = vmatmul.bf16.gmra.mxu3 %v4160_v43  ;;  %v1652_v52 = vadd.f32 %v4541_v50, %v4539_v48  ;;  %v4082_v45 = vld [vmem:[%s4907_s23 + $0x108] sm:$0xff] }
 0x21d   : > { %v3109_v51 = vmul.f32 0.25, %v3029_v49  ;;  %4548 = vtanh.f32 %v1443_v47 }
 0x21f   : > { %3189 = vst [vmem:[%s4978_s12 + $0x160] sm:$0xff] %v3109_v51  ;;  %v2131_v53 = vpop.f32.mrf.mxu2  ;;  %v2820_v54 = vpop.f32.mrf.mxu3  ;;  %v4122_v51 = vld [vmem:[%s4912_s26 + $0x108] sm:$0xff] }
 0x220   : > { %v4543_v55 = vpop.eup %4542  ;;  %v2132_v56 = vadd.f32 %v5262_v28, %v2131_v53  ;;  %v2821_v57 = vadd.f32 %v5262_v28, %v2820_v54  ;;  %v835_v58 = vpop.f32.mrf.mxu0 }
 0x221   : > { %v1444_v59 = vpop.f32.mrf.mxu1  ;;  %v4545_v60 = vpop.eup %4544  ;;  %v2341_v61 = vadd.f32 %v4543_v55, %v1652_v52  ;;  %v836_v62 = vadd.f32 %v5262_v28, %v835_v58  ;;  %v4162_v52 = vld [vmem:[%s4917_s29 + $0x108] sm:$0xff] }
 0x222   : > { %v4547_v63 = vpop.eup %4546  ;;  %4550 = vtanh.f32 %v2132_v56  ;;  %v1445_v0 = vadd.f32 %v5262_v28, %v1444_v59 }
 0x223   : > { %v4549_v1 = vpop.eup %4548  ;;  %v3030_v2 = vadd.f32 %v4545_v60, %v2341_v61  ;;  %4552 = vtanh.f32 %v2821_v57 }
 0x224   : > { %v1653_v4 = vadd.f32 %v4549_v1, %v4547_v63  ;;  %4554 = vtanh.f32 %v836_v62 }
 0x225   : > { %v3110_v3 = vmul.f32 0.25, %v3030_v2  ;;  %4556 = vtanh.f32 %v1445_v0 }
 0x227   : > { %3190 = vst [vmem:[%s4978_s12 + $0x168] sm:$0xff] %v3110_v3  ;;  %v2133_v5 = vpop.f32.mrf.mxu2  ;;  %v2822_v6 = vpop.f32.mrf.mxu3 }
 0x228   : > { %v4551_v9 = vpop.eup %4550  ;;  %v2134_v10 = vadd.f32 %v5262_v28, %v2133_v5  ;;  %v2823_v11 = vadd.f32 %v5262_v28, %v2822_v6  ;;  %v838_v12 = vpop.f32.mrf.mxu0 }
 0x229   : > { %v1447_v13 = vpop.f32.mrf.mxu1  ;;  %v4553_v16 = vpop.eup %4552  ;;  %v2342_v17 = vadd.f32 %v4551_v9, %v1653_v4  ;;  %v839_v18 = vadd.f32 %v5262_v28, %v838_v12 }
 0x22a   : > { %v1448_v19 = vadd.f32 %v5262_v28, %v1447_v13  ;;  %4558 = vtanh.f32 %v2134_v10  ;;  %v4555_v20 = vpop.eup %4554 }
 0x22b   : > { %v3031_v21 = vadd.f32 %v4553_v16, %v2342_v17  ;;  %4560 = vtanh.f32 %v2823_v11  ;;  %877 = vmatmul.bf16.gmra.mxu0 %v4041_v7  ;;  %1486 = vmatmul.bf16.gmra.mxu1 %v4081_v8  ;;  %v4557_v22 = vpop.eup %4556  ;;  %v4043_v16 = vld [vmem:[%s4902_s19 + $0x110] sm:$0xff] }
 0x22c   : > { %4562 = vtanh.f32 %v839_v18  ;;  %2175 = vmatmul.bf16.gmra.mxu2 %v4121_v14  ;;  %2864 = vmatmul.bf16.gmra.mxu3 %v4161_v15  ;;  %v1654_v24 = vadd.f32 %v4557_v22, %v4555_v20  ;;  %v4083_v17 = vld [vmem:[%s4907_s23 + $0x110] sm:$0xff] }
 0x22d   : > { %v3111_v23 = vmul.f32 0.25, %v3031_v21  ;;  %4564 = vtanh.f32 %v1448_v19 }
 0x22f   : > { %3191 = vst [vmem:[%s4978_s12 + $0x170] sm:$0xff] %v3111_v23  ;;  %v2136_v25 = vpop.f32.mrf.mxu2  ;;  %v2825_v26 = vpop.f32.mrf.mxu3  ;;  %v4123_v23 = vld [vmem:[%s4912_s26 + $0x110] sm:$0xff] }
 0x230   : > { %v4559_v27 = vpop.eup %4558  ;;  %v2137_v40 = vadd.f32 %v5262_v28, %v2136_v25  ;;  %v2826_v29 = vadd.f32 %v5262_v28, %v2825_v26  ;;  %v840_v30 = vpop.f32.mrf.mxu0 }
 0x231   : > { %v1449_v31 = vpop.f32.mrf.mxu1  ;;  %v4561_v32 = vpop.eup %4560  ;;  %v2343_v33 = vadd.f32 %v4559_v27, %v1654_v24  ;;  %v841_v34 = vadd.f32 %v5262_v28, %v840_v30  ;;  %v4163_v24 = vld [vmem:[%s4917_s29 + $0x110] sm:$0xff] }
 0x232   : > { %v4563_v35 = vpop.eup %4562  ;;  %4566 = vtanh.f32 %v2137_v40  ;;  %v1450_v36 = vadd.f32 %v5262_v28, %v1449_v31 }
 0x233   : > { %v4565_v37 = vpop.eup %4564  ;;  %v3032_v38 = vadd.f32 %v4561_v32, %v2343_v33  ;;  %4568 = vtanh.f32 %v2826_v29 }
 0x234   : > { %v1655_v41 = vadd.f32 %v4565_v37, %v4563_v35  ;;  %4570 = vtanh.f32 %v841_v34 }
 0x235   : > { %v3112_v39 = vmul.f32 0.25, %v3032_v38  ;;  %4572 = vtanh.f32 %v1450_v36 }
 0x237   : > { %3192 = vst [vmem:[%s4978_s12 + $0x178] sm:$0xff] %v3112_v39  ;;  %v2138_v42 = vpop.f32.mrf.mxu2  ;;  %v2827_v43 = vpop.f32.mrf.mxu3 }
 0x238   : > { %v4567_v46 = vpop.eup %4566  ;;  %v2139_v47 = vadd.f32 %v5262_v28, %v2138_v42  ;;  %v2828_v48 = vadd.f32 %v5262_v28, %v2827_v43  ;;  %v843_v49 = vpop.f32.mrf.mxu0 }
 0x239   : > { %v1452_v50 = vpop.f32.mrf.mxu1  ;;  %v4569_v53 = vpop.eup %4568  ;;  %v2344_v54 = vadd.f32 %v4567_v46, %v1655_v41  ;;  %v844_v55 = vadd.f32 %v5262_v28, %v843_v49 }
 0x23a   : > { %v1453_v56 = vadd.f32 %v5262_v28, %v1452_v50  ;;  %4574 = vtanh.f32 %v2139_v47  ;;  %v4571_v57 = vpop.eup %4570 }
 0x23b   : > { %v3033_v58 = vadd.f32 %v4569_v53, %v2344_v54  ;;  %4576 = vtanh.f32 %v2828_v48  ;;  %882 = vmatmul.bf16.gmra.mxu0 %v4042_v44  ;;  %1491 = vmatmul.bf16.gmra.mxu1 %v4082_v45  ;;  %v4573_v59 = vpop.eup %4572  ;;  %v4044_v53 = vld [vmem:[%s4902_s19 + $0x118] sm:$0xff] }
 0x23c   : > { %4578 = vtanh.f32 %v844_v55  ;;  %2180 = vmatmul.bf16.gmra.mxu2 %v4122_v51  ;;  %2869 = vmatmul.bf16.gmra.mxu3 %v4162_v52  ;;  %v1656_v61 = vadd.f32 %v4573_v59, %v4571_v57  ;;  %v4084_v54 = vld [vmem:[%s4907_s23 + $0x118] sm:$0xff] }
 0x23d   : > { %v3113_v60 = vmul.f32 0.25, %v3033_v58  ;;  %4580 = vtanh.f32 %v1453_v56 }
 0x23f   : > { %3193 = vst [vmem:[%s4978_s12 + $0x180] sm:$0xff] %v3113_v60  ;;  %v2141_v62 = vpop.f32.mrf.mxu2  ;;  %v2830_v63 = vpop.f32.mrf.mxu3  ;;  %v4124_v60 = vld [vmem:[%s4912_s26 + $0x118] sm:$0xff] }
 0x240   : > { %v4575_v0 = vpop.eup %4574  ;;  %v2142_v1 = vadd.f32 %v5262_v28, %v2141_v62  ;;  %v2831_v2 = vadd.f32 %v5262_v28, %v2830_v63  ;;  %v845_v3 = vpop.f32.mrf.mxu0 }
 0x241   : > { %v1454_v4 = vpop.f32.mrf.mxu1  ;;  %v4577_v5 = vpop.eup %4576  ;;  %v2345_v6 = vadd.f32 %v4575_v0, %v1656_v61  ;;  %v846_v7 = vadd.f32 %v5262_v28, %v845_v3  ;;  %v4164_v61 = vld [vmem:[%s4917_s29 + $0x118] sm:$0xff] }
 0x242   : > { %v4579_v8 = vpop.eup %4578  ;;  %4582 = vtanh.f32 %v2142_v1  ;;  %v1455_v9 = vadd.f32 %v5262_v28, %v1454_v4 }
 0x243   : > { %v4581_v10 = vpop.eup %4580  ;;  %v3034_v11 = vadd.f32 %v4577_v5, %v2345_v6  ;;  %4584 = vtanh.f32 %v2831_v2 }
 0x244   : > { %v1657_v13 = vadd.f32 %v4581_v10, %v4579_v8  ;;  %4586 = vtanh.f32 %v846_v7 }
 0x245   : > { %v3114_v12 = vmul.f32 0.25, %v3034_v11  ;;  %4588 = vtanh.f32 %v1455_v9 }
 0x247   : > { %3194 = vst [vmem:[%s4978_s12 + $0x188] sm:$0xff] %v3114_v12  ;;  %v2143_v14 = vpop.f32.mrf.mxu2  ;;  %v2832_v15 = vpop.f32.mrf.mxu3 }
 0x248   : > { %v4583_v18 = vpop.eup %4582  ;;  %v2144_v19 = vadd.f32 %v5262_v28, %v2143_v14  ;;  %v2833_v20 = vadd.f32 %v5262_v28, %v2832_v15  ;;  %v848_v21 = vpop.f32.mrf.mxu0 }
 0x249   : > { %v1457_v22 = vpop.f32.mrf.mxu1  ;;  %v4585_v25 = vpop.eup %4584  ;;  %v2346_v26 = vadd.f32 %v4583_v18, %v1657_v13  ;;  %v849_v27 = vadd.f32 %v5262_v28, %v848_v21 }
 0x24a   : > { %v1458_v40 = vadd.f32 %v5262_v28, %v1457_v22  ;;  %4590 = vtanh.f32 %v2144_v19  ;;  %v4587_v29 = vpop.eup %4586 }
 0x24b   : > { %v3035_v30 = vadd.f32 %v4585_v25, %v2346_v26  ;;  %4592 = vtanh.f32 %v2833_v20  ;;  %887 = vmatmul.bf16.gmra.mxu0 %v4043_v16  ;;  %1496 = vmatmul.bf16.gmra.mxu1 %v4083_v17  ;;  %v4589_v31 = vpop.eup %4588  ;;  %v4045_v25 = vld [vmem:[%s4902_s19 + $0x120] sm:$0xff] }
 0x24c   : > { %4594 = vtanh.f32 %v849_v27  ;;  %2185 = vmatmul.bf16.gmra.mxu2 %v4123_v23  ;;  %2874 = vmatmul.bf16.gmra.mxu3 %v4163_v24  ;;  %v1658_v33 = vadd.f32 %v4589_v31, %v4587_v29  ;;  %v4085_v26 = vld [vmem:[%s4907_s23 + $0x120] sm:$0xff] }
 0x24d   : > { %v3115_v32 = vmul.f32 0.25, %v3035_v30  ;;  %4596 = vtanh.f32 %v1458_v40 }
 0x24f   : > { %3195 = vst [vmem:[%s4978_s12 + $0x190] sm:$0xff] %v3115_v32  ;;  %v2146_v34 = vpop.f32.mrf.mxu2  ;;  %v2835_v35 = vpop.f32.mrf.mxu3  ;;  %v4125_v32 = vld [vmem:[%s4912_s26 + $0x120] sm:$0xff] }
 0x250   : > { %v4591_v36 = vpop.eup %4590  ;;  %v2147_v37 = vadd.f32 %v5262_v28, %v2146_v34  ;;  %v2836_v38 = vadd.f32 %v5262_v28, %v2835_v35  ;;  %v850_v39 = vpop.f32.mrf.mxu0 }
 0x251   : > { %v1459_v41 = vpop.f32.mrf.mxu1  ;;  %v4593_v42 = vpop.eup %4592  ;;  %v2347_v43 = vadd.f32 %v4591_v36, %v1658_v33  ;;  %v851_v44 = vadd.f32 %v5262_v28, %v850_v39  ;;  %v4165_v33 = vld [vmem:[%s4917_s29 + $0x120] sm:$0xff] }
 0x252   : > { %v4595_v45 = vpop.eup %4594  ;;  %4598 = vtanh.f32 %v2147_v37  ;;  %v1460_v46 = vadd.f32 %v5262_v28, %v1459_v41 }
 0x253   : > { %v4597_v47 = vpop.eup %4596  ;;  %v3036_v48 = vadd.f32 %v4593_v42, %v2347_v43  ;;  %4600 = vtanh.f32 %v2836_v38 }
 0x254   : > { %v1659_v50 = vadd.f32 %v4597_v47, %v4595_v45  ;;  %4602 = vtanh.f32 %v851_v44 }
 0x255   : > { %v3116_v49 = vmul.f32 0.25, %v3036_v48  ;;  %4604 = vtanh.f32 %v1460_v46 }
 0x257   : > { %3196 = vst [vmem:[%s4978_s12 + $0x198] sm:$0xff] %v3116_v49  ;;  %v2148_v51 = vpop.f32.mrf.mxu2  ;;  %v2837_v52 = vpop.f32.mrf.mxu3 }
 0x258   : > { %v4599_v55 = vpop.eup %4598  ;;  %v2149_v56 = vadd.f32 %v5262_v28, %v2148_v51  ;;  %v2838_v57 = vadd.f32 %v5262_v28, %v2837_v52  ;;  %v853_v58 = vpop.f32.mrf.mxu0 }
 0x259   : > { %v1462_v59 = vpop.f32.mrf.mxu1  ;;  %v4601_v62 = vpop.eup %4600  ;;  %v2348_v63 = vadd.f32 %v4599_v55, %v1659_v50  ;;  %v854_v0 = vadd.f32 %v5262_v28, %v853_v58 }
 0x25a   : > { %v1463_v1 = vadd.f32 %v5262_v28, %v1462_v59  ;;  %4606 = vtanh.f32 %v2149_v56  ;;  %v4603_v2 = vpop.eup %4602 }
 0x25b   : > { %v3037_v3 = vadd.f32 %v4601_v62, %v2348_v63  ;;  %4608 = vtanh.f32 %v2838_v57  ;;  %892 = vmatmul.bf16.gmra.mxu0 %v4044_v53  ;;  %1501 = vmatmul.bf16.gmra.mxu1 %v4084_v54  ;;  %v4605_v4 = vpop.eup %4604  ;;  %v4046_v62 = vld [vmem:[%s4902_s19 + $0x128] sm:$0xff] }
 0x25c   : > { %4610 = vtanh.f32 %v854_v0  ;;  %2190 = vmatmul.bf16.gmra.mxu2 %v4124_v60  ;;  %2879 = vmatmul.bf16.gmra.mxu3 %v4164_v61  ;;  %v1660_v6 = vadd.f32 %v4605_v4, %v4603_v2  ;;  %v4086_v63 = vld [vmem:[%s4907_s23 + $0x128] sm:$0xff] }
 0x25d   : > { %v3117_v5 = vmul.f32 0.25, %v3037_v3  ;;  %4612 = vtanh.f32 %v1463_v1 }
 0x25f   : > { %3197 = vst [vmem:[%s4978_s12 + $0x1a0] sm:$0xff] %v3117_v5  ;;  %v2151_v7 = vpop.f32.mrf.mxu2  ;;  %v2840_v8 = vpop.f32.mrf.mxu3  ;;  %v4126_v5 = vld [vmem:[%s4912_s26 + $0x128] sm:$0xff] }
 0x260   : > { %v4607_v9 = vpop.eup %4606  ;;  %v2152_v10 = vadd.f32 %v5262_v28, %v2151_v7  ;;  %v2841_v11 = vadd.f32 %v5262_v28, %v2840_v8  ;;  %v855_v12 = vpop.f32.mrf.mxu0 }
 0x261   : > { %v1464_v13 = vpop.f32.mrf.mxu1  ;;  %v4609_v14 = vpop.eup %4608  ;;  %v2349_v15 = vadd.f32 %v4607_v9, %v1660_v6  ;;  %v856_v16 = vadd.f32 %v5262_v28, %v855_v12  ;;  %v4166_v6 = vld [vmem:[%s4917_s29 + $0x128] sm:$0xff] }
 0x262   : > { %v4611_v17 = vpop.eup %4610  ;;  %4614 = vtanh.f32 %v2152_v10  ;;  %v1465_v18 = vadd.f32 %v5262_v28, %v1464_v13 }
 0x263   : > { %v4613_v19 = vpop.eup %4612  ;;  %v3038_v20 = vadd.f32 %v4609_v14, %v2349_v15  ;;  %4616 = vtanh.f32 %v2841_v11 }
 0x264   : > { %v1661_v22 = vadd.f32 %v4613_v19, %v4611_v17  ;;  %4618 = vtanh.f32 %v856_v16 }
 0x265   : > { %v3118_v21 = vmul.f32 0.25, %v3038_v20  ;;  %4620 = vtanh.f32 %v1465_v18 }
 0x267   : > { %3198 = vst [vmem:[%s4978_s12 + $0x1a8] sm:$0xff] %v3118_v21  ;;  %v2153_v23 = vpop.f32.mrf.mxu2  ;;  %v2842_v24 = vpop.f32.mrf.mxu3 }
 0x268   : > { %v4615_v27 = vpop.eup %4614  ;;  %v2154_v40 = vadd.f32 %v5262_v28, %v2153_v23  ;;  %v2843_v29 = vadd.f32 %v5262_v28, %v2842_v24  ;;  %v858_v30 = vpop.f32.mrf.mxu0 }
 0x269   : > { %v1467_v31 = vpop.f32.mrf.mxu1  ;;  %v4617_v34 = vpop.eup %4616  ;;  %v2350_v35 = vadd.f32 %v4615_v27, %v1661_v22  ;;  %v859_v36 = vadd.f32 %v5262_v28, %v858_v30 }
 0x26a   : > { %v1468_v37 = vadd.f32 %v5262_v28, %v1467_v31  ;;  %4622 = vtanh.f32 %v2154_v40  ;;  %v4619_v38 = vpop.eup %4618 }
 0x26b   : > { %v3039_v39 = vadd.f32 %v4617_v34, %v2350_v35  ;;  %4624 = vtanh.f32 %v2843_v29  ;;  %897 = vmatmul.bf16.gmra.mxu0 %v4045_v25  ;;  %1506 = vmatmul.bf16.gmra.mxu1 %v4085_v26  ;;  %v4621_v41 = vpop.eup %4620  ;;  %v4047_v34 = vld [vmem:[%s4902_s19 + $0x130] sm:$0xff] }
 0x26c   : > { %4626 = vtanh.f32 %v859_v36  ;;  %2195 = vmatmul.bf16.gmra.mxu2 %v4125_v32  ;;  %2884 = vmatmul.bf16.gmra.mxu3 %v4165_v33  ;;  %v1662_v43 = vadd.f32 %v4621_v41, %v4619_v38  ;;  %v4087_v35 = vld [vmem:[%s4907_s23 + $0x130] sm:$0xff] }
 0x26d   : > { %v3119_v42 = vmul.f32 0.25, %v3039_v39  ;;  %4628 = vtanh.f32 %v1468_v37 }
 0x26f   : > { %3199 = vst [vmem:[%s4978_s12 + $0x1b0] sm:$0xff] %v3119_v42  ;;  %v2156_v44 = vpop.f32.mrf.mxu2  ;;  %v2845_v45 = vpop.f32.mrf.mxu3  ;;  %v4127_v42 = vld [vmem:[%s4912_s26 + $0x130] sm:$0xff] }
 0x270   : > { %v4623_v46 = vpop.eup %4622  ;;  %v2157_v47 = vadd.f32 %v5262_v28, %v2156_v44  ;;  %v2846_v48 = vadd.f32 %v5262_v28, %v2845_v45  ;;  %v860_v49 = vpop.f32.mrf.mxu0 }
 0x271   : > { %v1469_v50 = vpop.f32.mrf.mxu1  ;;  %v4625_v51 = vpop.eup %4624  ;;  %v2351_v52 = vadd.f32 %v4623_v46, %v1662_v43  ;;  %v861_v53 = vadd.f32 %v5262_v28, %v860_v49  ;;  %v4167_v43 = vld [vmem:[%s4917_s29 + $0x130] sm:$0xff] }
 0x272   : > { %v4627_v54 = vpop.eup %4626  ;;  %4630 = vtanh.f32 %v2157_v47  ;;  %v1470_v55 = vadd.f32 %v5262_v28, %v1469_v50 }
 0x273   : > { %v4629_v56 = vpop.eup %4628  ;;  %v3040_v57 = vadd.f32 %v4625_v51, %v2351_v52  ;;  %4632 = vtanh.f32 %v2846_v48 }
 0x274   : > { %v1663_v59 = vadd.f32 %v4629_v56, %v4627_v54  ;;  %4634 = vtanh.f32 %v861_v53 }
 0x275   : > { %v3120_v58 = vmul.f32 0.25, %v3040_v57  ;;  %4636 = vtanh.f32 %v1470_v55 }
 0x277   : > { %3200 = vst [vmem:[%s4978_s12 + $0x1b8] sm:$0xff] %v3120_v58  ;;  %v2158_v60 = vpop.f32.mrf.mxu2  ;;  %v2847_v61 = vpop.f32.mrf.mxu3 }
 0x278   : > { %v4631_v0 = vpop.eup %4630  ;;  %v2159_v1 = vadd.f32 %v5262_v28, %v2158_v60  ;;  %v2848_v2 = vadd.f32 %v5262_v28, %v2847_v61  ;;  %v863_v3 = vpop.f32.mrf.mxu0 }
 0x279   : > { %v1472_v4 = vpop.f32.mrf.mxu1  ;;  %v4633_v7 = vpop.eup %4632  ;;  %v2352_v8 = vadd.f32 %v4631_v0, %v1663_v59  ;;  %v864_v9 = vadd.f32 %v5262_v28, %v863_v3 }
 0x27a   : > { %v1473_v10 = vadd.f32 %v5262_v28, %v1472_v4  ;;  %4638 = vtanh.f32 %v2159_v1  ;;  %v4635_v11 = vpop.eup %4634 }
 0x27b   : > { %v3041_v12 = vadd.f32 %v4633_v7, %v2352_v8  ;;  %4640 = vtanh.f32 %v2848_v2  ;;  %902 = vmatmul.bf16.gmra.mxu0 %v4046_v62  ;;  %1511 = vmatmul.bf16.gmra.mxu1 %v4086_v63  ;;  %v4637_v13 = vpop.eup %4636  ;;  %v4048_v7 = vld [vmem:[%s4902_s19 + $0x138] sm:$0xff] }
 0x27c   : > { %4642 = vtanh.f32 %v864_v9  ;;  %2200 = vmatmul.bf16.gmra.mxu2 %v4126_v5  ;;  %2889 = vmatmul.bf16.gmra.mxu3 %v4166_v6  ;;  %v1664_v15 = vadd.f32 %v4637_v13, %v4635_v11  ;;  %v4088_v8 = vld [vmem:[%s4907_s23 + $0x138] sm:$0xff] }
 0x27d   : > { %v3121_v14 = vmul.f32 0.25, %v3041_v12  ;;  %4644 = vtanh.f32 %v1473_v10 }
 0x27f   : > { %3201 = vst [vmem:[%s4978_s12 + $0x1c0] sm:$0xff] %v3121_v14  ;;  %v2161_v16 = vpop.f32.mrf.mxu2  ;;  %v2850_v17 = vpop.f32.mrf.mxu3  ;;  %v4128_v14 = vld [vmem:[%s4912_s26 + $0x138] sm:$0xff] }
 0x280   : > { %v4639_v18 = vpop.eup %4638  ;;  %v2162_v19 = vadd.f32 %v5262_v28, %v2161_v16  ;;  %v2851_v20 = vadd.f32 %v5262_v28, %v2850_v17  ;;  %v865_v21 = vpop.f32.mrf.mxu0 }
 0x281   : > { %v1474_v22 = vpop.f32.mrf.mxu1  ;;  %v4641_v23 = vpop.eup %4640  ;;  %v2353_v24 = vadd.f32 %v4639_v18, %v1664_v15  ;;  %v866_v25 = vadd.f32 %v5262_v28, %v865_v21  ;;  %v4168_v15 = vld [vmem:[%s4917_s29 + $0x138] sm:$0xff] }
 0x282   : > { %v4643_v26 = vpop.eup %4642  ;;  %4646 = vtanh.f32 %v2162_v19  ;;  %v1475_v27 = vadd.f32 %v5262_v28, %v1474_v22 }
 0x283   : > { %v4645_v40 = vpop.eup %4644  ;;  %v3042_v29 = vadd.f32 %v4641_v23, %v2353_v24  ;;  %4648 = vtanh.f32 %v2851_v20 }
 0x284   : > { %v1665_v31 = vadd.f32 %v4645_v40, %v4643_v26  ;;  %4650 = vtanh.f32 %v866_v25 }
 0x285   : > { %v3122_v30 = vmul.f32 0.25, %v3042_v29  ;;  %4652 = vtanh.f32 %v1475_v27 }
 0x287   : > { %3202 = vst [vmem:[%s4978_s12 + $0x1c8] sm:$0xff] %v3122_v30  ;;  %v2163_v32 = vpop.f32.mrf.mxu2  ;;  %v2852_v33 = vpop.f32.mrf.mxu3 }
 0x288   : > { %v4647_v36 = vpop.eup %4646  ;;  %v2164_v37 = vadd.f32 %v5262_v28, %v2163_v32  ;;  %v2853_v38 = vadd.f32 %v5262_v28, %v2852_v33  ;;  %v868_v39 = vpop.f32.mrf.mxu0 }
 0x289   : > { %v1477_v41 = vpop.f32.mrf.mxu1  ;;  %v4649_v44 = vpop.eup %4648  ;;  %v2354_v45 = vadd.f32 %v4647_v36, %v1665_v31  ;;  %v869_v46 = vadd.f32 %v5262_v28, %v868_v39 }
 0x28a   : > { %v1478_v47 = vadd.f32 %v5262_v28, %v1477_v41  ;;  %4654 = vtanh.f32 %v2164_v37  ;;  %v4651_v48 = vpop.eup %4650 }
 0x28b   : > { %v3043_v49 = vadd.f32 %v4649_v44, %v2354_v45  ;;  %4656 = vtanh.f32 %v2853_v38  ;;  %907 = vmatmul.bf16.gmra.mxu0 %v4047_v34  ;;  %1516 = vmatmul.bf16.gmra.mxu1 %v4087_v35  ;;  %v4653_v50 = vpop.eup %4652 }
 0x28c   : > { %4658 = vtanh.f32 %v869_v46  ;;  %2205 = vmatmul.bf16.gmra.mxu2 %v4127_v42  ;;  %2894 = vmatmul.bf16.gmra.mxu3 %v4167_v43  ;;  %v1666_v52 = vadd.f32 %v4653_v50, %v4651_v48 }
 0x28d   : > { %v3123_v51 = vmul.f32 0.25, %v3043_v49  ;;  %4660 = vtanh.f32 %v1478_v47 }
 0x28f   : > { %3203 = vst [vmem:[%s4978_s12 + $0x1d0] sm:$0xff] %v3123_v51  ;;  %v2166_v53 = vpop.f32.mrf.mxu2  ;;  %v2855_v54 = vpop.f32.mrf.mxu3 }
 0x290   : > { %v4655_v55 = vpop.eup %4654  ;;  %v2167_v56 = vadd.f32 %v5262_v28, %v2166_v53  ;;  %v2856_v57 = vadd.f32 %v5262_v28, %v2855_v54  ;;  %v870_v58 = vpop.f32.mrf.mxu0 }
 0x291   : > { %v1479_v59 = vpop.f32.mrf.mxu1  ;;  %v4657_v60 = vpop.eup %4656  ;;  %v2355_v61 = vadd.f32 %v4655_v55, %v1666_v52  ;;  %v871_v62 = vadd.f32 %v5262_v28, %v870_v58 }
 0x292   : > { %v4659_v63 = vpop.eup %4658  ;;  %4662 = vtanh.f32 %v2167_v56  ;;  %v1480_v0 = vadd.f32 %v5262_v28, %v1479_v59 }
 0x293   : > { %v4661_v1 = vpop.eup %4660  ;;  %v3044_v2 = vadd.f32 %v4657_v60, %v2355_v61  ;;  %4664 = vtanh.f32 %v2856_v57 }
 0x294   : > { %v1667_v4 = vadd.f32 %v4661_v1, %v4659_v63  ;;  %4666 = vtanh.f32 %v871_v62 }
 0x295   : > { %v3124_v3 = vmul.f32 0.25, %v3044_v2  ;;  %4668 = vtanh.f32 %v1480_v0 }
 0x297   : > { %3204 = vst [vmem:[%s4978_s12 + $0x1d8] sm:$0xff] %v3124_v3  ;;  %v2168_v5 = vpop.f32.mrf.mxu2  ;;  %v2857_v6 = vpop.f32.mrf.mxu3 }
 0x298   : > { %v4663_v9 = vpop.eup %4662  ;;  %v2169_v10 = vadd.f32 %v5262_v28, %v2168_v5  ;;  %v2858_v11 = vadd.f32 %v5262_v28, %v2857_v6  ;;  %v873_v12 = vpop.f32.mrf.mxu0 }
 0x299   : > { %v1482_v13 = vpop.f32.mrf.mxu1  ;;  %v4665_v16 = vpop.eup %4664  ;;  %v2356_v17 = vadd.f32 %v4663_v9, %v1667_v4  ;;  %v874_v18 = vadd.f32 %v5262_v28, %v873_v12 }
 0x29a   : > { %v1483_v19 = vadd.f32 %v5262_v28, %v1482_v13  ;;  %4670 = vtanh.f32 %v2169_v10  ;;  %v4667_v20 = vpop.eup %4666  ;;  %v5414_v28 = vld [vmem:[%s5513_s5] ss:$0 sm:$0xff] }
 0x29b   : > { %v3045_v21 = vadd.f32 %v4665_v16, %v2356_v17  ;;  %4672 = vtanh.f32 %v2858_v11  ;;  %912 = vmatmul.bf16.gmra.mxu0 %v4048_v7  ;;  %1521 = vmatmul.bf16.gmra.mxu1 %v4088_v8  ;;  %v4669_v22 = vpop.eup %4668 }
 0x29c   : > { %4674 = vtanh.f32 %v874_v18  ;;  %2210 = vmatmul.bf16.gmra.mxu2 %v4128_v14  ;;  %2899 = vmatmul.bf16.gmra.mxu3 %v4168_v15  ;;  %v1668_v24 = vadd.f32 %v4669_v22, %v4667_v20 }
 0x29d   : > { %v3125_v23 = vmul.f32 0.25, %v3045_v21  ;;  %4676 = vtanh.f32 %v1483_v19 }
 0x29f   : > { %3205 = vst [vmem:[%s4978_s12 + $0x1e0] sm:$0xff] %v3125_v23  ;;  %v2171_v25 = vpop.f32.mrf.mxu2  ;;  %v2860_v26 = vpop.f32.mrf.mxu3 }
 0x2a0   : > { %v4671_v27 = vpop.eup %4670  ;;  %v2172_v40 = vadd.f32 %v5414_v28, %v2171_v25  ;;  %v2861_v29 = vadd.f32 %v5414_v28, %v2860_v26  ;;  %v875_v30 = vpop.f32.mrf.mxu0 }
 0x2a1   : > { %v1484_v31 = vpop.f32.mrf.mxu1  ;;  %v4673_v32 = vpop.eup %4672  ;;  %v2357_v33 = vadd.f32 %v4671_v27, %v1668_v24  ;;  %v876_v34 = vadd.f32 %v5414_v28, %v875_v30 }
 0x2a2   : > { %v4675_v35 = vpop.eup %4674  ;;  %4678 = vtanh.f32 %v2172_v40  ;;  %v1485_v36 = vadd.f32 %v5414_v28, %v1484_v31 }
 0x2a3   : > { %v4677_v37 = vpop.eup %4676  ;;  %v3046_v38 = vadd.f32 %v4673_v32, %v2357_v33  ;;  %4680 = vtanh.f32 %v2861_v29 }
 0x2a4   : > { %v1669_v41 = vadd.f32 %v4677_v37, %v4675_v35  ;;  %4682 = vtanh.f32 %v876_v34 }
 0x2a5   : > { %v3126_v39 = vmul.f32 0.25, %v3046_v38  ;;  %4684 = vtanh.f32 %v1485_v36 }
 0x2a7   : > { %3206 = vst [vmem:[%s4978_s12 + $0x1e8] sm:$0xff] %v3126_v39  ;;  %v2173_v42 = vpop.f32.mrf.mxu2  ;;  %v2862_v43 = vpop.f32.mrf.mxu3 }
 0x2a8   : > { %v4679_v44 = vpop.eup %4678  ;;  %v2174_v45 = vadd.f32 %v5414_v28, %v2173_v42  ;;  %v2863_v46 = vadd.f32 %v5414_v28, %v2862_v43  ;;  %v878_v47 = vpop.f32.mrf.mxu0 }
 0x2a9   : > { %v1487_v48 = vpop.f32.mrf.mxu1  ;;  %v4681_v49 = vpop.eup %4680  ;;  %v2358_v50 = vadd.f32 %v4679_v44, %v1669_v41  ;;  %v879_v51 = vadd.f32 %v5414_v28, %v878_v47 }
 0x2aa   : > { %v1488_v52 = vadd.f32 %v5414_v28, %v1487_v48  ;;  %4686 = vtanh.f32 %v2174_v45  ;;  %v4683_v53 = vpop.eup %4682 }
 0x2ab   : > { %v3047_v54 = vadd.f32 %v4681_v49, %v2358_v50  ;;  %4688 = vtanh.f32 %v2863_v46  ;;  %v4685_v55 = vpop.eup %4684 }
 0x2ac   : > { %4690 = vtanh.f32 %v879_v51  ;;  %v1670_v57 = vadd.f32 %v4685_v55, %v4683_v53 }
 0x2ad   : > { %v3127_v56 = vmul.f32 0.25, %v3047_v54  ;;  %4692 = vtanh.f32 %v1488_v52 }
 0x2af   : > { %3207 = vst [vmem:[%s4978_s12 + $0x1f0] sm:$0xff] %v3127_v56  ;;  %v2176_v58 = vpop.f32.mrf.mxu2  ;;  %v2865_v59 = vpop.f32.mrf.mxu3 }
 0x2b0   : > { %v4687_v60 = vpop.eup %4686  ;;  %v2177_v61 = vadd.f32 %v5414_v28, %v2176_v58  ;;  %v2866_v62 = vadd.f32 %v5414_v28, %v2865_v59  ;;  %v880_v63 = vpop.f32.mrf.mxu0 }
 0x2b1   : > { %v1489_v0 = vpop.f32.mrf.mxu1  ;;  %v4689_v1 = vpop.eup %4688  ;;  %v2359_v2 = vadd.f32 %v4687_v60, %v1670_v57  ;;  %v881_v3 = vadd.f32 %v5414_v28, %v880_v63 }
 0x2b2   : > { %v4691_v4 = vpop.eup %4690  ;;  %4694 = vtanh.f32 %v2177_v61  ;;  %v1490_v5 = vadd.f32 %v5414_v28, %v1489_v0 }
 0x2b3   : > { %v4693_v6 = vpop.eup %4692  ;;  %v3048_v7 = vadd.f32 %v4689_v1, %v2359_v2  ;;  %4696 = vtanh.f32 %v2866_v62 }
 0x2b4   : > { %v1671_v9 = vadd.f32 %v4693_v6, %v4691_v4  ;;  %4698 = vtanh.f32 %v881_v3 }
 0x2b5   : > { %v3128_v8 = vmul.f32 0.25, %v3048_v7  ;;  %4700 = vtanh.f32 %v1490_v5 }
 0x2b7   : > { %3208 = vst [vmem:[%s4978_s12 + $0x1f8] sm:$0xff] %v3128_v8  ;;  %v2178_v10 = vpop.f32.mrf.mxu2  ;;  %v2867_v11 = vpop.f32.mrf.mxu3 }
 0x2b8   : > { %v4695_v12 = vpop.eup %4694  ;;  %v2179_v13 = vadd.f32 %v5414_v28, %v2178_v10  ;;  %v2868_v14 = vadd.f32 %v5414_v28, %v2867_v11  ;;  %v883_v15 = vpop.f32.mrf.mxu0 }
 0x2b9   : > { %v1492_v16 = vpop.f32.mrf.mxu1  ;;  %v4697_v17 = vpop.eup %4696  ;;  %v2360_v18 = vadd.f32 %v4695_v12, %v1671_v9  ;;  %v884_v19 = vadd.f32 %v5414_v28, %v883_v15 }
 0x2ba   : > { %v1493_v20 = vadd.f32 %v5414_v28, %v1492_v16  ;;  %4702 = vtanh.f32 %v2179_v13  ;;  %v4699_v21 = vpop.eup %4698 }
 0x2bb   : > { %v3049_v22 = vadd.f32 %v4697_v17, %v2360_v18  ;;  %4704 = vtanh.f32 %v2868_v14  ;;  %v4701_v23 = vpop.eup %4700 }
 0x2bc   : > { %4706 = vtanh.f32 %v884_v19  ;;  %v1672_v25 = vadd.f32 %v4701_v23, %v4699_v21 }
 0x2bd   : > { %v3129_v24 = vmul.f32 0.25, %v3049_v22  ;;  %4708 = vtanh.f32 %v1493_v20 }
 0x2bf   : > { %3209 = vst [vmem:[%s4978_s12 + $0x200] sm:$0xff] %v3129_v24  ;;  %v2181_v26 = vpop.f32.mrf.mxu2  ;;  %v2870_v27 = vpop.f32.mrf.mxu3 }
 0x2c0   : > { %v4703_v40 = vpop.eup %4702  ;;  %v2182_v29 = vadd.f32 %v5414_v28, %v2181_v26  ;;  %v2871_v30 = vadd.f32 %v5414_v28, %v2870_v27  ;;  %v885_v31 = vpop.f32.mrf.mxu0 }
 0x2c1   : > { %v1494_v32 = vpop.f32.mrf.mxu1  ;;  %v4705_v33 = vpop.eup %4704  ;;  %v2361_v34 = vadd.f32 %v4703_v40, %v1672_v25  ;;  %v886_v35 = vadd.f32 %v5414_v28, %v885_v31 }
 0x2c2   : > { %v4707_v36 = vpop.eup %4706  ;;  %4710 = vtanh.f32 %v2182_v29  ;;  %v1495_v37 = vadd.f32 %v5414_v28, %v1494_v32 }
 0x2c3   : > { %v4709_v38 = vpop.eup %4708  ;;  %v3050_v39 = vadd.f32 %v4705_v33, %v2361_v34  ;;  %4712 = vtanh.f32 %v2871_v30 }
 0x2c4   : > { %v1673_v42 = vadd.f32 %v4709_v38, %v4707_v36  ;;  %4714 = vtanh.f32 %v886_v35 }
 0x2c5   : > { %v3130_v41 = vmul.f32 0.25, %v3050_v39  ;;  %4716 = vtanh.f32 %v1495_v37 }
 0x2c7   : > { %3210 = vst [vmem:[%s4978_s12 + $0x208] sm:$0xff] %v3130_v41  ;;  %v2183_v43 = vpop.f32.mrf.mxu2  ;;  %v2872_v44 = vpop.f32.mrf.mxu3 }
 0x2c8   : > { %v4711_v45 = vpop.eup %4710  ;;  %v2184_v46 = vadd.f32 %v5414_v28, %v2183_v43  ;;  %v2873_v47 = vadd.f32 %v5414_v28, %v2872_v44  ;;  %v888_v48 = vpop.f32.mrf.mxu0 }
 0x2c9   : > { %v1497_v49 = vpop.f32.mrf.mxu1  ;;  %v4713_v50 = vpop.eup %4712  ;;  %v2362_v51 = vadd.f32 %v4711_v45, %v1673_v42  ;;  %v889_v52 = vadd.f32 %v5414_v28, %v888_v48 }
 0x2ca   : > { %v1498_v53 = vadd.f32 %v5414_v28, %v1497_v49  ;;  %4718 = vtanh.f32 %v2184_v46  ;;  %v4715_v54 = vpop.eup %4714 }
 0x2cb   : > { %v3051_v55 = vadd.f32 %v4713_v50, %v2362_v51  ;;  %4720 = vtanh.f32 %v2873_v47  ;;  %v4717_v56 = vpop.eup %4716 }
 0x2cc   : > { %4722 = vtanh.f32 %v889_v52  ;;  %v1674_v58 = vadd.f32 %v4717_v56, %v4715_v54 }
 0x2cd   : > { %v3131_v57 = vmul.f32 0.25, %v3051_v55  ;;  %4724 = vtanh.f32 %v1498_v53 }
 0x2cf   : > { %3211 = vst [vmem:[%s4978_s12 + $0x210] sm:$0xff] %v3131_v57  ;;  %v2186_v59 = vpop.f32.mrf.mxu2  ;;  %v2875_v60 = vpop.f32.mrf.mxu3 }
 0x2d0   : > { %v4719_v61 = vpop.eup %4718  ;;  %v2187_v62 = vadd.f32 %v5414_v28, %v2186_v59  ;;  %v2876_v63 = vadd.f32 %v5414_v28, %v2875_v60  ;;  %v890_v0 = vpop.f32.mrf.mxu0 }
 0x2d1   : > { %v1499_v1 = vpop.f32.mrf.mxu1  ;;  %v4721_v2 = vpop.eup %4720  ;;  %v2363_v3 = vadd.f32 %v4719_v61, %v1674_v58  ;;  %v891_v4 = vadd.f32 %v5414_v28, %v890_v0 }
 0x2d2   : > { %v4723_v5 = vpop.eup %4722  ;;  %4726 = vtanh.f32 %v2187_v62  ;;  %v1500_v6 = vadd.f32 %v5414_v28, %v1499_v1 }
 0x2d3   : > { %v4725_v7 = vpop.eup %4724  ;;  %v3052_v8 = vadd.f32 %v4721_v2, %v2363_v3  ;;  %4728 = vtanh.f32 %v2876_v63 }
 0x2d4   : > { %v1675_v10 = vadd.f32 %v4725_v7, %v4723_v5  ;;  %4730 = vtanh.f32 %v891_v4 }
 0x2d5   : > { %v3132_v9 = vmul.f32 0.25, %v3052_v8  ;;  %4732 = vtanh.f32 %v1500_v6 }
 0x2d7   : > { %3212 = vst [vmem:[%s4978_s12 + $0x218] sm:$0xff] %v3132_v9  ;;  %v2188_v11 = vpop.f32.mrf.mxu2  ;;  %v2877_v12 = vpop.f32.mrf.mxu3 }
 0x2d8   : > { %v4727_v13 = vpop.eup %4726  ;;  %v2189_v14 = vadd.f32 %v5414_v28, %v2188_v11  ;;  %v2878_v15 = vadd.f32 %v5414_v28, %v2877_v12  ;;  %v893_v16 = vpop.f32.mrf.mxu0 }
 0x2d9   : > { %v1502_v17 = vpop.f32.mrf.mxu1  ;;  %v4729_v18 = vpop.eup %4728  ;;  %v2364_v19 = vadd.f32 %v4727_v13, %v1675_v10  ;;  %v894_v20 = vadd.f32 %v5414_v28, %v893_v16 }
 0x2da   : > { %v1503_v21 = vadd.f32 %v5414_v28, %v1502_v17  ;;  %4734 = vtanh.f32 %v2189_v14  ;;  %v4731_v22 = vpop.eup %4730 }
 0x2db   : > { %v3053_v23 = vadd.f32 %v4729_v18, %v2364_v19  ;;  %4736 = vtanh.f32 %v2878_v15  ;;  %v4733_v24 = vpop.eup %4732 }
 0x2dc   : > { %4738 = vtanh.f32 %v894_v20  ;;  %v1676_v26 = vadd.f32 %v4733_v24, %v4731_v22 }
 0x2dd   : > { %v3133_v25 = vmul.f32 0.25, %v3053_v23  ;;  %4740 = vtanh.f32 %v1503_v21 }
 0x2df   : > { %3213 = vst [vmem:[%s4978_s12 + $0x220] sm:$0xff] %v3133_v25  ;;  %v2191_v27 = vpop.f32.mrf.mxu2  ;;  %v2880_v40 = vpop.f32.mrf.mxu3 }
 0x2e0   : > { %v4735_v29 = vpop.eup %4734  ;;  %v2192_v30 = vadd.f32 %v5414_v28, %v2191_v27  ;;  %v2881_v31 = vadd.f32 %v5414_v28, %v2880_v40  ;;  %v895_v32 = vpop.f32.mrf.mxu0 }
 0x2e1   : > { %v1504_v33 = vpop.f32.mrf.mxu1  ;;  %v4737_v34 = vpop.eup %4736  ;;  %v2365_v35 = vadd.f32 %v4735_v29, %v1676_v26  ;;  %v896_v36 = vadd.f32 %v5414_v28, %v895_v32 }
 0x2e2   : > { %v4739_v37 = vpop.eup %4738  ;;  %4742 = vtanh.f32 %v2192_v30  ;;  %v1505_v38 = vadd.f32 %v5414_v28, %v1504_v33 }
 0x2e3   : > { %v4741_v39 = vpop.eup %4740  ;;  %v3054_v41 = vadd.f32 %v4737_v34, %v2365_v35  ;;  %4744 = vtanh.f32 %v2881_v31 }
 0x2e4   : > { %v1677_v43 = vadd.f32 %v4741_v39, %v4739_v37  ;;  %4746 = vtanh.f32 %v896_v36 }
 0x2e5   : > { %v3134_v42 = vmul.f32 0.25, %v3054_v41  ;;  %4748 = vtanh.f32 %v1505_v38 }
 0x2e7   : > { %3214 = vst [vmem:[%s4978_s12 + $0x228] sm:$0xff] %v3134_v42  ;;  %v2193_v44 = vpop.f32.mrf.mxu2  ;;  %v2882_v45 = vpop.f32.mrf.mxu3 }
 0x2e8   : > { %v4743_v46 = vpop.eup %4742  ;;  %v2194_v47 = vadd.f32 %v5414_v28, %v2193_v44  ;;  %v2883_v48 = vadd.f32 %v5414_v28, %v2882_v45  ;;  %v898_v49 = vpop.f32.mrf.mxu0 }
 0x2e9   : > { %v1507_v50 = vpop.f32.mrf.mxu1  ;;  %v4745_v51 = vpop.eup %4744  ;;  %v2366_v52 = vadd.f32 %v4743_v46, %v1677_v43  ;;  %v899_v53 = vadd.f32 %v5414_v28, %v898_v49 }
 0x2ea   : > { %v1508_v54 = vadd.f32 %v5414_v28, %v1507_v50  ;;  %4750 = vtanh.f32 %v2194_v47  ;;  %v4747_v55 = vpop.eup %4746 }
 0x2eb   : > { %v3055_v56 = vadd.f32 %v4745_v51, %v2366_v52  ;;  %4752 = vtanh.f32 %v2883_v48  ;;  %v4749_v57 = vpop.eup %4748 }
 0x2ec   : > { %4754 = vtanh.f32 %v899_v53  ;;  %v1678_v59 = vadd.f32 %v4749_v57, %v4747_v55 }
 0x2ed   : > { %v3135_v58 = vmul.f32 0.25, %v3055_v56  ;;  %4756 = vtanh.f32 %v1508_v54 }
 0x2ef   : > { %3215 = vst [vmem:[%s4978_s12 + $0x230] sm:$0xff] %v3135_v58  ;;  %v2196_v60 = vpop.f32.mrf.mxu2  ;;  %v2885_v61 = vpop.f32.mrf.mxu3 }
 0x2f0   : > { %v4751_v62 = vpop.eup %4750  ;;  %v2197_v63 = vadd.f32 %v5414_v28, %v2196_v60  ;;  %v2886_v0 = vadd.f32 %v5414_v28, %v2885_v61  ;;  %v900_v1 = vpop.f32.mrf.mxu0 }
 0x2f1   : > { %v1509_v2 = vpop.f32.mrf.mxu1  ;;  %v4753_v3 = vpop.eup %4752  ;;  %v2367_v4 = vadd.f32 %v4751_v62, %v1678_v59  ;;  %v901_v5 = vadd.f32 %v5414_v28, %v900_v1 }
 0x2f2   : > { %v4755_v6 = vpop.eup %4754  ;;  %4758 = vtanh.f32 %v2197_v63  ;;  %v1510_v7 = vadd.f32 %v5414_v28, %v1509_v2 }
 0x2f3   : > { %v4757_v8 = vpop.eup %4756  ;;  %v3056_v9 = vadd.f32 %v4753_v3, %v2367_v4  ;;  %4760 = vtanh.f32 %v2886_v0 }
 0x2f4   : > { %v1679_v11 = vadd.f32 %v4757_v8, %v4755_v6  ;;  %4762 = vtanh.f32 %v901_v5 }
 0x2f5   : > { %v3136_v10 = vmul.f32 0.25, %v3056_v9  ;;  %4764 = vtanh.f32 %v1510_v7 }
 0x2f7   : > { %3216 = vst [vmem:[%s4978_s12 + $0x238] sm:$0xff] %v3136_v10  ;;  %v2198_v12 = vpop.f32.mrf.mxu2  ;;  %v2887_v13 = vpop.f32.mrf.mxu3 }
 0x2f8   : > { %v4759_v14 = vpop.eup %4758  ;;  %v2199_v15 = vadd.f32 %v5414_v28, %v2198_v12  ;;  %v2888_v16 = vadd.f32 %v5414_v28, %v2887_v13  ;;  %v903_v17 = vpop.f32.mrf.mxu0 }
 0x2f9   : > { %v1512_v18 = vpop.f32.mrf.mxu1  ;;  %v4761_v19 = vpop.eup %4760  ;;  %v2368_v20 = vadd.f32 %v4759_v14, %v1679_v11  ;;  %v904_v21 = vadd.f32 %v5414_v28, %v903_v17 }
 0x2fa   : > { %v1513_v22 = vadd.f32 %v5414_v28, %v1512_v18  ;;  %4766 = vtanh.f32 %v2199_v15  ;;  %v4763_v23 = vpop.eup %4762 }
 0x2fb   : > { %v3057_v24 = vadd.f32 %v4761_v19, %v2368_v20  ;;  %4768 = vtanh.f32 %v2888_v16  ;;  %v4765_v25 = vpop.eup %4764 }
 0x2fc   : > { %4770 = vtanh.f32 %v904_v21  ;;  %v1680_v27 = vadd.f32 %v4765_v25, %v4763_v23 }
 0x2fd   : > { %v3137_v26 = vmul.f32 0.25, %v3057_v24  ;;  %4772 = vtanh.f32 %v1513_v22 }
 0x2ff   : > { %3217 = vst [vmem:[%s4978_s12 + $0x240] sm:$0xff] %v3137_v26  ;;  %v2201_v40 = vpop.f32.mrf.mxu2  ;;  %v2890_v29 = vpop.f32.mrf.mxu3 }
 0x300   : > { %v4767_v30 = vpop.eup %4766  ;;  %v2202_v31 = vadd.f32 %v5414_v28, %v2201_v40  ;;  %v2891_v32 = vadd.f32 %v5414_v28, %v2890_v29  ;;  %v905_v33 = vpop.f32.mrf.mxu0 }
 0x301   : > { %v1514_v34 = vpop.f32.mrf.mxu1  ;;  %v4769_v35 = vpop.eup %4768  ;;  %v2369_v36 = vadd.f32 %v4767_v30, %v1680_v27  ;;  %v906_v37 = vadd.f32 %v5414_v28, %v905_v33 }
 0x302   : > { %v4771_v38 = vpop.eup %4770  ;;  %4774 = vtanh.f32 %v2202_v31  ;;  %v1515_v39 = vadd.f32 %v5414_v28, %v1514_v34 }
 0x303   : > { %v4773_v41 = vpop.eup %4772  ;;  %v3058_v42 = vadd.f32 %v4769_v35, %v2369_v36  ;;  %4776 = vtanh.f32 %v2891_v32 }
 0x304   : > { %v1681_v44 = vadd.f32 %v4773_v41, %v4771_v38  ;;  %4778 = vtanh.f32 %v906_v37 }
 0x305   : > { %v3138_v43 = vmul.f32 0.25, %v3058_v42  ;;  %4780 = vtanh.f32 %v1515_v39 }
 0x307   : > { %3218 = vst [vmem:[%s4978_s12 + $0x248] sm:$0xff] %v3138_v43  ;;  %v2203_v45 = vpop.f32.mrf.mxu2  ;;  %v2892_v46 = vpop.f32.mrf.mxu3 }
 0x308   : > { %v4775_v47 = vpop.eup %4774  ;;  %v2204_v48 = vadd.f32 %v5414_v28, %v2203_v45  ;;  %v2893_v49 = vadd.f32 %v5414_v28, %v2892_v46  ;;  %v908_v50 = vpop.f32.mrf.mxu0 }
 0x309   : > { %v1517_v51 = vpop.f32.mrf.mxu1  ;;  %v4777_v52 = vpop.eup %4776  ;;  %v2370_v53 = vadd.f32 %v4775_v47, %v1681_v44  ;;  %v909_v54 = vadd.f32 %v5414_v28, %v908_v50 }
 0x30a   : > { %v1518_v55 = vadd.f32 %v5414_v28, %v1517_v51  ;;  %4782 = vtanh.f32 %v2204_v48  ;;  %v4779_v56 = vpop.eup %4778 }
 0x30b   : > { %v3059_v57 = vadd.f32 %v4777_v52, %v2370_v53  ;;  %4784 = vtanh.f32 %v2893_v49  ;;  %v4781_v58 = vpop.eup %4780 }
 0x30c   : > { %4786 = vtanh.f32 %v909_v54  ;;  %v1682_v60 = vadd.f32 %v4781_v58, %v4779_v56 }
 0x30d   : > { %v3139_v59 = vmul.f32 0.25, %v3059_v57  ;;  %4788 = vtanh.f32 %v1518_v55 }
 0x30f   : > { %3219 = vst [vmem:[%s4978_s12 + $0x250] sm:$0xff] %v3139_v59  ;;  %v2206_v61 = vpop.f32.mrf.mxu2  ;;  %v2895_v62 = vpop.f32.mrf.mxu3 }
 0x310   : > { %v4783_v63 = vpop.eup %4782  ;;  %v2207_v0 = vadd.f32 %v5414_v28, %v2206_v61  ;;  %v2896_v1 = vadd.f32 %v5414_v28, %v2895_v62  ;;  %v910_v2 = vpop.f32.mrf.mxu0 }
 0x311   : > { %v1519_v3 = vpop.f32.mrf.mxu1  ;;  %v4785_v4 = vpop.eup %4784  ;;  %v2371_v5 = vadd.f32 %v4783_v63, %v1682_v60  ;;  %v911_v6 = vadd.f32 %v5414_v28, %v910_v2 }
 0x312   : > { %v4787_v7 = vpop.eup %4786  ;;  %4790 = vtanh.f32 %v2207_v0  ;;  %v1520_v8 = vadd.f32 %v5414_v28, %v1519_v3 }
 0x313   : > { %v4789_v9 = vpop.eup %4788  ;;  %v3060_v10 = vadd.f32 %v4785_v4, %v2371_v5  ;;  %4792 = vtanh.f32 %v2896_v1 }
 0x314   : > { %v1683_v12 = vadd.f32 %v4789_v9, %v4787_v7  ;;  %4794 = vtanh.f32 %v911_v6 }
 0x315   : > { %v3140_v11 = vmul.f32 0.25, %v3060_v10  ;;  %4796 = vtanh.f32 %v1520_v8 }
 0x317   : > { %3220 = vst [vmem:[%s4978_s12 + $0x258] sm:$0xff] %v3140_v11  ;;  %v2208_v13 = vpop.f32.mrf.mxu2  ;;  %v2897_v14 = vpop.f32.mrf.mxu3 }
 0x318   : > { %v4791_v15 = vpop.eup %4790  ;;  %v2209_v16 = vadd.f32 %v5414_v28, %v2208_v13  ;;  %v2898_v17 = vadd.f32 %v5414_v28, %v2897_v14  ;;  %v913_v18 = vpop.f32.mrf.mxu0 }
 0x319   : > { %v1522_v19 = vpop.f32.mrf.mxu1  ;;  %v4793_v20 = vpop.eup %4792  ;;  %v2372_v21 = vadd.f32 %v4791_v15, %v1683_v12  ;;  %v914_v22 = vadd.f32 %v5414_v28, %v913_v18 }
 0x31a   : > { %v1523_v23 = vadd.f32 %v5414_v28, %v1522_v19  ;;  %4798 = vtanh.f32 %v2209_v16  ;;  %v4795_v24 = vpop.eup %4794 }
 0x31b   : > { %v3061_v25 = vadd.f32 %v4793_v20, %v2372_v21  ;;  %4800 = vtanh.f32 %v2898_v17  ;;  %v4797_v26 = vpop.eup %4796 }
 0x31c   : > { %4802 = vtanh.f32 %v914_v22  ;;  %v1684_v40 = vadd.f32 %v4797_v26, %v4795_v24 }
 0x31d   : > { %v3141_v27 = vmul.f32 0.25, %v3061_v25  ;;  %4804 = vtanh.f32 %v1523_v23 }
 0x31f   : > { %3221 = vst [vmem:[%s4978_s12 + $0x260] sm:$0xff] %v3141_v27  ;;  %v2211_v29 = vpop.f32.mrf.mxu2  ;;  %v2900_v30 = vpop.f32.mrf.mxu3 }
 0x320   : > { %v4799_v31 = vpop.eup %4798  ;;  %v2212_v32 = vadd.f32 %v5414_v28, %v2211_v29  ;;  %v2901_v33 = vadd.f32 %v5414_v28, %v2900_v30  ;;  %v915_v34 = vpop.f32.mrf.mxu0 }
 0x321   : > { %v1524_v35 = vpop.f32.mrf.mxu1  ;;  %v4801_v36 = vpop.eup %4800  ;;  %v2373_v37 = vadd.f32 %v4799_v31, %v1684_v40  ;;  %v916_v38 = vadd.f32 %v5414_v28, %v915_v34 }
 0x322   : > { %v4803_v39 = vpop.eup %4802  ;;  %4806 = vtanh.f32 %v2212_v32  ;;  %v1525_v41 = vadd.f32 %v5414_v28, %v1524_v35 }
 0x323   : > { %v4805_v42 = vpop.eup %4804  ;;  %v3062_v43 = vadd.f32 %v4801_v36, %v2373_v37  ;;  %4808 = vtanh.f32 %v2901_v33 }
 0x324   : > { %v1685_v45 = vadd.f32 %v4805_v42, %v4803_v39  ;;  %4810 = vtanh.f32 %v916_v38 }
 0x325   : > { %v3142_v44 = vmul.f32 0.25, %v3062_v43  ;;  %4812 = vtanh.f32 %v1525_v41 }
 0x327   : > { %3222 = vst [vmem:[%s4978_s12 + $0x268] sm:$0xff] %v3142_v44  ;;  %v2213_v46 = vpop.f32.mrf.mxu2  ;;  %v2902_v47 = vpop.f32.mrf.mxu3 }
 0x328   : > { %v4807_v48 = vpop.eup %4806  ;;  %v2214_v49 = vadd.f32 %v5414_v28, %v2213_v46  ;;  %v2903_v50 = vadd.f32 %v5414_v28, %v2902_v47 }
 0x329   : > { %v4809_v51 = vpop.eup %4808  ;;  %v2374_v52 = vadd.f32 %v4807_v48, %v1685_v45 }
 0x32a   : > { %4814 = vtanh.f32 %v2214_v49  ;;  %v4811_v53 = vpop.eup %4810 }
 0x32b   : > { %v3063_v54 = vadd.f32 %v4809_v51, %v2374_v52  ;;  %v4813_v55 = vpop.eup %4812  ;;  %4816 = vtanh.f32 %v2903_v50 }
 0x32c   : > { %v1686_v57 = vadd.f32 %v4813_v55, %v4811_v53 }
 0x32d   : > { %v3143_v56 = vmul.f32 0.25, %v3063_v54 }
 0x32f   : > { %3223 = vst [vmem:[%s4978_s12 + $0x270] sm:$0xff] %v3143_v56 }
 0x330   : > { %v4815_v58 = vpop.eup %4814 }
 0x331   : > { %v2375_v59 = vadd.f32 %v4815_v58, %v1686_v57  ;;  %v4817_v60 = vpop.eup %4816 }
 0x333   : > { %v3064_v61 = vadd.f32 %v4817_v60, %v2375_v59 }
 0x335   : > { %v3144_v62 = vmul.f32 0.25, %v3064_v61 }
 0x337   : > { %3224 = vst [vmem:[%s4978_s12 + $0x278] sm:$0xff] %v3144_v62 }
 0x338 PF: > { %s16_s21 = sadd.s32 1, %s4827_s21  }
 0x339   : > { %p13_p4 = scmp.ge.s32.totalorder %s16_s21, 4  }
 0x33b   :  { %15 = sbr.rel (!%p13_p4) target bundleno = 1 (0x1), region = 83 }

// kernel: cnn_forward.4
= control target key start
LH: loop header
LB: loop body
LE: loop exit
PB: predicated region body
PF: predicated region fallthrough
CT: control target
= control target key end

     0   :  { %s948_s21 = smov 0   ;;  %s1116_s0 = inlined_call_operand.vmem [shape: bf16[32,256], index: 0, kind: input, shape index: {}]   ;;  %s1117_s1 = inlined_call_operand.vmem [shape: bf16[32,256], index: 1, kind: input, shape index: {}]   ;;  %s1118_s2 = inlined_call_operand.vmem [shape: bf16[32,256], index: 2, kind: input, shape index: {}]   ;;  %s1119_s3 = inlined_call_operand.vmem [shape: bf16[32,256], index: 3, kind: input, shape index: {}]   ;;  %s1120_s4 = inlined_call_operand.vmem [shape: bf16[256,128], index: 4, kind: input, shape index: {}]   ;;  %s1121_s5 = inlined_call_operand.vmem [shape: f32[1,128], index: 5, kind: input, shape index: {}]   ;;  %s1122_s6 = inlined_call_operand.vmem [shape: f32[32,128], index: 6, kind: output, shape index: {}]  }
   0x1 LB: > { %s735_s22 = sadd.s32 4294967295, %s911_s21   ;;  %p739_p0 = scmp.ge.s32.totalorder %s911_s21, 1  ;;  %s911_s21 = sphi %s948_s21, %s16_s21  }
   0x2   : > { %p250_p1 = scmp.lt.s32.totalorder %s911_s21, 3 }
   0x4   : > { %p251_p2 = pnand %p739_p0, %p250_p1 }
   0x5   : > { %s740_s11 = sshll.u32 (!%p251_p2), %s735_s22, 1 }
   0x6   : > { %254 = sbr.rel (%p251_p2) target bundleno = 231 (0xe7), region = 44  ;;  %p300_p3 = scmp.lt.s32.totalorder (!%p251_p2), %s740_s11, 3 }
   0xb   : > { %v959_v0 = vld [vmem:[%s1120_s4 + $0x38] sm:$0xff]  ;;  %v971_v2 = vld [vmem:[%s1120_s4 + $0x30] sm:$0xff]  ;;  %v985_v4 = vld [vmem:[%s1120_s4 + $0x28] sm:$0xff]  ;;  %s1124_s11 = smov (!%p300_p3, %s740_s11), 3 }
   0xc   : > { %v964_v1 = vld [vmem:[%s1120_s4 + $0x78] sm:$0xff]  ;;  %477 = vmatpush.bf16.msra.mxu0 %v959_v0  ;;  %v976_v3 = vld [vmem:[%s1120_s4 + $0x70] sm:$0xff]  ;;  %519 = vmatpush.bf16.msra.mxu2 %v959_v0  ;;  %v990_v5 = vld [vmem:[%s1120_s4 + $0x68] sm:$0xff]  ;;  %s1032_s25 = sshll.u32 %s1124_s11, 3 }
   0xd   : > { %491 = vmatpush.bf16.msra.mxu1 %v964_v1  ;;  %533 = vmatpush.bf16.msra.mxu3 %v964_v1  ;;  %v999_v6 = vld [vmem:[%s1120_s4 + $0x20] sm:$0xff]  ;;  %v1013_v8 = vld [vmem:[%s1120_s4 + $0x18] sm:$0xff]  ;;  %v858_v10 = vld [vmem:[%s1120_s4 + $0x10] sm:$0xff]  ;;  %s311_s8 = scalar_lea.vmem %s1117_s1, %s1032_s25  ;;  %s304_s11 = scalar_lea.vmem %s1116_s0, %s1032_s25 }
   0xe   : > { %v1004_v7 = vld [vmem:[%s1120_s4 + $0x60] sm:$0xff]  ;;  %v1018_v9 = vld [vmem:[%s1120_s4 + $0x58] sm:$0xff]  ;;  %v866_v11 = vld [vmem:[%s1120_s4 + $0x50] sm:$0xff]  ;;  %s318_s18 = scalar_lea.vmem %s1118_s2, %s1032_s25  ;;  %s325_s22 = scalar_lea.vmem %s1119_s3, %s1032_s25 }
   0xf   : > { %v1037_v12 = vld [vmem:[%s1120_s4 + $0x8] sm:$0xff]  ;;  %v1055_v14 = vld [vmem:[%s1120_s4] sm:$0xff]  ;;  %s331_s28 = scalar_lea.vmem %s1122_s6, %s1032_s25 }
  0x10   : > { %478 = vmatpush.bf16.msra.mxu0 %v971_v2  ;;  %520 = vmatpush.bf16.msra.mxu2 %v971_v2  ;;  %v1042_v13 = vld [vmem:[%s1120_s4 + $0x48] sm:$0xff]  ;;  %v1062_v15 = vld [vmem:[%s1120_s4 + $0x40] sm:$0xff] }
  0x11   : > { %492 = vmatpush.bf16.msra.mxu1 %v976_v3  ;;  %534 = vmatpush.bf16.msra.mxu3 %v976_v3  ;;  %v828_v16 = vld [vmem:[%s311_s8] sm:$0xf]  ;;  %v875_v17 = vld [vmem:[%s311_s8 + $0x4] sm:$0xf0]  ;;  %v874_v18 = vld [vmem:[%s311_s8 + $0x4] sm:$0xf] }
  0x12   : > { %v830_v19 = vld [vmem:[%s311_s8 + $0x8] sm:$0xf0]  ;;  %v756_v20 = vld [vmem:[%s304_s11] sm:$0xf]  ;;  %v873_v21 = vld [vmem:[%s304_s11 + $0x4] sm:$0xf0]  ;;  %v829_v24 = vor.u32 %v875_v17, %v828_v16 }
  0x13   : > { %v872_v22 = vld [vmem:[%s304_s11 + $0x4] sm:$0xf]  ;;  %v758_v23 = vld [vmem:[%s304_s11 + $0x8] sm:$0xf0]  ;;  %v833_v25 = vor.u32 %v874_v18, %v830_v19  ;;  %v757_v26 = vor.u32 %v873_v21, %v756_v20  ;;  %v836_v28 = vld [vmem:[%s318_s18] sm:$0xf] }
  0x14   : > { %479 = vmatpush.bf16.msra.mxu0 %v985_v4  ;;  %521 = vmatpush.bf16.msra.mxu2 %v985_v4  ;;  %v761_v27 = vor.u32 %v872_v22, %v758_v23  ;;  %v877_v29 = vld [vmem:[%s318_s18 + $0x4] sm:$0xf0]  ;;  %v876_v30 = vld [vmem:[%s318_s18 + $0x4] sm:$0xf]  ;;  %v838_v31 = vld [vmem:[%s318_s18 + $0x8] sm:$0xf0] }
  0x15   : > { %493 = vmatpush.bf16.msra.mxu1 %v990_v5  ;;  %535 = vmatpush.bf16.msra.mxu3 %v990_v5  ;;  %v844_v32 = vld [vmem:[%s325_s22] sm:$0xf]  ;;  %v879_v33 = vld [vmem:[%s325_s22 + $0x4] sm:$0xf0]  ;;  %v878_v34 = vld [vmem:[%s325_s22 + $0x4] sm:$0xf]  ;;  %v837_v36 = vor.u32 %v877_v29, %v836_v28  ;;  %v841_v37 = vor.u32 %v876_v30, %v838_v31 }
  0x16   : > { %v846_v35 = vld [vmem:[%s325_s22 + $0x8] sm:$0xf0]  ;;  %v845_v38 = vor.u32 %v879_v33, %v844_v32  ;;  %v888_v45 = vld [vmem:[%s1121_s5] ss:$0 sm:$0xff] }
  0x17   : > { %v849_v39 = vor.u32 %v878_v34, %v846_v35 }
  0x18   : > { %480 = vmatpush.bf16.msra.mxu0 %v999_v6  ;;  %522 = vmatpush.bf16.msra.mxu2 %v999_v6 }
  0x19   : > { %494 = vmatpush.bf16.msra.mxu1 %v1004_v7  ;;  %536 = vmatpush.bf16.msra.mxu3 %v1004_v7 }
  0x1c   : > { %481 = vmatpush.bf16.msra.mxu0 %v1013_v8  ;;  %523 = vmatpush.bf16.msra.mxu2 %v1013_v8 }
  0x1d   : > { %495 = vmatpush.bf16.msra.mxu1 %v1018_v9  ;;  %537 = vmatpush.bf16.msra.mxu3 %v1018_v9 }
  0x20   : > { %482 = vmatpush.bf16.msra.mxu0 %v858_v10  ;;  %524 = vmatpush.bf16.msra.mxu2 %v858_v10 }
  0x21   : > { %496 = vmatpush.bf16.msra.mxu1 %v866_v11  ;;  %538 = vmatpush.bf16.msra.mxu3 %v866_v11 }
  0x24   : > { %483 = vmatpush.bf16.msra.mxu0 %v1037_v12  ;;  %525 = vmatpush.bf16.msra.mxu2 %v1037_v12 }
  0x25   : > { %497 = vmatpush.bf16.msra.mxu1 %v1042_v13  ;;  %539 = vmatpush.bf16.msra.mxu3 %v1042_v13 }
  0x28   : > { %484 = vmatpush.bf16.msra.mxu0 %v1055_v14  ;;  %526 = vmatpush.bf16.msra.mxu2 %v1055_v14 }
  0x29   : > { %498 = vmatpush.bf16.msra.mxu1 %v1062_v15  ;;  %540 = vmatpush.bf16.msra.mxu3 %v1062_v15 }
  0x2b   : > { %527 = vmatmul.bf16.vlgmr.msra.gmra.mxu2 %v829_v24  ;;  %485 = vmatmul.bf16.vlgmr.msra.gmra.mxu0 %v757_v26 }
  0x2c   : > { %563 = vmatpush.bf16.msrb.mxu0 %v959_v0  ;;  %607 = vmatpush.bf16.msrb.mxu2 %v959_v0 }
  0x2d   : > { %577 = vmatpush.bf16.msrb.mxu1 %v964_v1  ;;  %621 = vmatpush.bf16.msrb.mxu3 %v964_v1 }
  0x2e   : > { %541 = vmatmul.bf16.vlgmr.msra.gmra.mxu3 %v833_v25  ;;  %499 = vmatmul.bf16.vlgmr.msra.gmra.mxu1 %v761_v27 }
  0x30   : > { %564 = vmatpush.bf16.msrb.mxu0 %v971_v2  ;;  %608 = vmatpush.bf16.msrb.mxu2 %v971_v2 }
  0x31   : > { %578 = vmatpush.bf16.msrb.mxu1 %v976_v3  ;;  %622 = vmatpush.bf16.msrb.mxu3 %v976_v3 }
  0x34   : > { %565 = vmatpush.bf16.msrb.mxu0 %v985_v4  ;;  %609 = vmatpush.bf16.msrb.mxu2 %v985_v4 }
  0x35   : > { %579 = vmatpush.bf16.msrb.mxu1 %v990_v5  ;;  %623 = vmatpush.bf16.msrb.mxu3 %v990_v5 }
  0x38   : > { %566 = vmatpush.bf16.msrb.mxu0 %v999_v6  ;;  %610 = vmatpush.bf16.msrb.mxu2 %v999_v6 }
  0x39   : > { %580 = vmatpush.bf16.msrb.mxu1 %v1004_v7  ;;  %624 = vmatpush.bf16.msrb.mxu3 %v1004_v7 }
  0x3c   : > { %567 = vmatpush.bf16.msrb.mxu0 %v1013_v8  ;;  %611 = vmatpush.bf16.msrb.mxu2 %v1013_v8 }
  0x3d   : > { %581 = vmatpush.bf16.msrb.mxu1 %v1018_v9  ;;  %625 = vmatpush.bf16.msrb.mxu3 %v1018_v9 }
  0x40   : > { %568 = vmatpush.bf16.msrb.mxu0 %v858_v10  ;;  %612 = vmatpush.bf16.msrb.mxu2 %v858_v10 }
  0x41   : > { %582 = vmatpush.bf16.msrb.mxu1 %v866_v11  ;;  %626 = vmatpush.bf16.msrb.mxu3 %v866_v11 }
  0x44   : > { %569 = vmatpush.bf16.msrb.mxu0 %v1037_v12  ;;  %613 = vmatpush.bf16.msrb.mxu2 %v1037_v12 }
  0x45   : > { %583 = vmatpush.bf16.msrb.mxu1 %v1042_v13  ;;  %627 = vmatpush.bf16.msrb.mxu3 %v1042_v13 }
  0x48   : > { %570 = vmatpush.bf16.msrb.mxu0 %v1055_v14  ;;  %614 = vmatpush.bf16.msrb.mxu2 %v1055_v14 }
  0x49   : > { %584 = vmatpush.bf16.msrb.mxu1 %v1062_v15  ;;  %628 = vmatpush.bf16.msrb.mxu3 %v1062_v15 }
  0x4b   : > { %571 = vmatmul.bf16.vlgmr.msrb.gmra.mxu0 %v837_v36  ;;  %615 = vmatmul.bf16.vlgmr.msrb.gmra.mxu2 %v845_v38 }
  0x4c   : > { %585 = vmatmul.bf16.vlgmr.msrb.gmra.mxu1 %v841_v37  ;;  %629 = vmatmul.bf16.vlgmr.msrb.gmra.mxu3 %v849_v39 }
  0xa8   : > { %v486_v40 = vpop.f32.mrf.mxu0 }
  0xa9   : > { %v487_v47 = vadd.f32 %v888_v45, %v486_v40 }
  0xab   : > { %v500_v41 = vpop.f32.mrf.mxu1 }
  0xac   : > { %v501_v52 = vadd.f32 %v500_v41, %v487_v47 }
  0xae   : > { %v528_v42 = vpop.f32.mrf.mxu2  ;;  %889 = vtanh.f32 %v501_v52 }
  0xaf   : > { %v529_v48 = vadd.f32 %v888_v45, %v528_v42 }
  0xb0   : > { %v488_v44 = vpop.f32.mrf.mxu0 }
  0xb1   : > { %v542_v43 = vpop.f32.mrf.mxu3  ;;  %v489_v57 = vadd.f32 %v888_v45, %v488_v44 }
  0xb2   : > { %v543_v55 = vadd.f32 %v542_v43, %v529_v48 }
  0xb3   : > { %v502_v46 = vpop.f32.mrf.mxu1 }
  0xb4   : > { %891 = vtanh.f32 %v543_v55  ;;  %v503_v63 = vadd.f32 %v502_v46, %v489_v57  ;;  %v890_v3 = vpop.eup %889 }
  0xb6   : > { %v530_v49 = vpop.f32.mrf.mxu2 }
  0xb7   : > { %v531_v58 = vadd.f32 %v888_v45, %v530_v49 }
  0xb9   : > { %v544_v50 = vpop.f32.mrf.mxu3 }
  0xba   : > { %v545_v1 = vadd.f32 %v544_v50, %v531_v58  ;;  %v892_v5 = vpop.eup %891 }
  0xbb   : > { %v549_v8 = vadd.f32 %v892_v5, %v890_v3 }
  0xc8   : > { %v572_v51 = vpop.f32.mrf.mxu0 }
  0xc9   : > { %v573_v53 = vadd.f32 %v888_v45, %v572_v51  ;;  %v586_v54 = vpop.f32.mrf.mxu1 }
  0xcb   : > { %v587_v56 = vadd.f32 %v586_v54, %v573_v53 }
  0xcd   : > { %893 = vtanh.f32 %v587_v56 }
  0xce   : > { %v616_v59 = vpop.f32.mrf.mxu2 }
  0xcf   : > { %v630_v60 = vpop.f32.mrf.mxu3  ;;  %v617_v61 = vadd.f32 %v888_v45, %v616_v59 }
  0xd0   : > { %v574_v62 = vpop.f32.mrf.mxu0 }
  0xd1   : > { %v575_v0 = vadd.f32 %v888_v45, %v574_v62  ;;  %v631_v2 = vadd.f32 %v630_v60, %v617_v61  ;;  %v588_v4 = vpop.f32.mrf.mxu1 }
  0xd3   : > { %895 = vtanh.f32 %v631_v2  ;;  %v589_v6 = vadd.f32 %v588_v4, %v575_v0  ;;  %v894_v7 = vpop.eup %893 }
  0xd4   : > { %897 = vtanh.f32 %v503_v63  ;;  %v593_v11 = vadd.f32 %v894_v7, %v549_v8 }
  0xd5   : > { %899 = vtanh.f32 %v545_v1 }
  0xd6   : > { %v618_v9 = vpop.f32.mrf.mxu2  ;;  %901 = vtanh.f32 %v589_v6 }
  0xd7   : > { %v619_v10 = vadd.f32 %v888_v45, %v618_v9  ;;  %v632_v12 = vpop.f32.mrf.mxu3 }
  0xd9   : > { %v896_v13 = vpop.eup %895  ;;  %v633_v14 = vadd.f32 %v632_v12, %v619_v10 }
  0xda   : > { %v898_v15 = vpop.eup %897  ;;  %v637_v16 = vadd.f32 %v896_v13, %v593_v11 }
  0xdb   : > { %v900_v17 = vpop.eup %899  ;;  %903 = vtanh.f32 %v633_v14 }
  0xdc   : > { %v639_v18 = vmul.f32 0.25, %v637_v16  ;;  %v902_v19 = vpop.eup %901  ;;  %v550_v20 = vadd.f32 %v900_v17, %v898_v15 }
  0xde   : > { %641 = vst [vmem:[%s331_s28] sm:$0xff] %v639_v18  ;;  %v594_v21 = vadd.f32 %v902_v19, %v550_v20 }
  0xe1   : > { %v904_v22 = vpop.eup %903 }
  0xe2   : > { %v638_v23 = vadd.f32 %v904_v22, %v594_v21 }
  0xe4   : > { %v640_v24 = vmul.f32 0.25, %v638_v23 }
  0xe6   : > { %642 = vst [vmem:[%s331_s28 + $0x8] sm:$0xff] %v640_v24 }
  0xe7 PF: > { %s16_s21 = sadd.s32 1, %s911_s21  }
  0xe8   : > { %p13_p4 = scmp.ge.s32.totalorder %s16_s21, 4  }
  0xea   :  { %15 = sbr.rel (!%p13_p4) target bundleno = 1 (0x1), region = 83 }

// kernel: cnn_forward.5
= control target key start
LH: loop header
LB: loop body
LE: loop exit
PB: predicated region body
PF: predicated region fallthrough
CT: control target
= control target key end

     0   :  { %s472_s1 = inlined_call_operand.vmem [shape: f32[256,128], index: 1, kind: input, shape index: {}]   ;;  %s473_s3 = inlined_call_operand.vmem [shape: f32[128,128], index: 3, kind: input, shape index: {}]   ;;  %s474_s2 = inlined_call_operand.vmem [shape: f32[1,128], index: 2, kind: input, shape index: {}]   ;;  %s475_s0 = inlined_call_operand.vmem [shape: f32[8,256], index: 0, kind: input, shape index: {}]   ;;  %s476_s4 = inlined_call_operand.vmem [shape: f32[1,128], index: 4, kind: input, shape index: {}]   ;;  %s477_s5 = inlined_call_operand.vmem [shape: f32[128,128], index: 5, kind: input, shape index: {}]   ;;  %s478_s6 = inlined_call_operand.vmem [shape: f32[1,128], index: 6, kind: input, shape index: {}]   ;;  %s479_s7 = inlined_call_operand.vmem [shape: f32[8,128], index: 7, kind: output, shape index: {}]  }
   0x1   :  { %v43_v0 = vld [vmem:[%s472_s1 + $0x78] sm:$0xff]  ;;  %v42_v1 = vld [vmem:[%s472_s1 + $0x70] sm:$0xff]  ;;  %v41_v4 = vld [vmem:[%s472_s1 + $0x68] sm:$0xff] }
   0x2   :  { %v59_v2 = vld [vmem:[%s472_s1 + $0xf8] sm:$0xff]  ;;  %64 = vmatpush.msra.mxu0 %v43_v0  ;;  %v58_v3 = vld [vmem:[%s472_s1 + $0xf0] sm:$0xff]  ;;  %v57_v5 = vld [vmem:[%s472_s1 + $0xe8] sm:$0xff] }
   0x3   :  { %84 = vmatpush.msra.mxu1 %v59_v2  ;;  %v40_v6 = vld [vmem:[%s472_s1 + $0x60] sm:$0xff]  ;;  %v39_v8 = vld [vmem:[%s472_s1 + $0x58] sm:$0xff]  ;;  %v38_v10 = vld [vmem:[%s472_s1 + $0x50] sm:$0xff] }
   0x4   :  { %65 = vmatpush.msra.mxu0 %v42_v1  ;;  %v56_v7 = vld [vmem:[%s472_s1 + $0xe0] sm:$0xff]  ;;  %v55_v9 = vld [vmem:[%s472_s1 + $0xd8] sm:$0xff]  ;;  %v54_v11 = vld [vmem:[%s472_s1 + $0xd0] sm:$0xff] }
   0x5   :  { %85 = vmatpush.msra.mxu1 %v58_v3  ;;  %v37_v12 = vld [vmem:[%s472_s1 + $0x48] sm:$0xff]  ;;  %v120_v14 = vld [vmem:[%s473_s3 + $0x78] sm:$0xff]  ;;  %v119_v15 = vld [vmem:[%s473_s3 + $0x70] sm:$0xff] }
   0x6   :  { %66 = vmatpush.msra.mxu0 %v41_v4  ;;  %v53_v13 = vld [vmem:[%s472_s1 + $0xc8] sm:$0xff]  ;;  %v36_v16 = vld [vmem:[%s472_s1 + $0x40] sm:$0xff]  ;;  %125 = vmatpush.msra.mxu2 %v120_v14  ;;  %v35_v19 = vld [vmem:[%s472_s1 + $0x38] sm:$0xff] }
   0x7   :  { %86 = vmatpush.msra.mxu1 %v57_v5  ;;  %v52_v17 = vld [vmem:[%s472_s1 + $0xc0] sm:$0xff]  ;;  %v118_v18 = vld [vmem:[%s473_s3 + $0x68] sm:$0xff]  ;;  %v51_v20 = vld [vmem:[%s472_s1 + $0xb8] sm:$0xff] }
   0x8   :  { %67 = vmatpush.msra.mxu0 %v40_v6  ;;  %126 = vmatpush.msra.mxu2 %v119_v15  ;;  %v117_v21 = vld [vmem:[%s473_s3 + $0x60] sm:$0xff]  ;;  %v34_v22 = vld [vmem:[%s472_s1 + $0x30] sm:$0xff]  ;;  %v116_v24 = vld [vmem:[%s473_s3 + $0x58] sm:$0xff] }
   0x9   :  { %87 = vmatpush.msra.mxu1 %v56_v7  ;;  %v50_v23 = vld [vmem:[%s472_s1 + $0xb0] sm:$0xff]  ;;  %v33_v25 = vld [vmem:[%s472_s1 + $0x28] sm:$0xff]  ;;  %v32_v28 = vld [vmem:[%s472_s1 + $0x20] sm:$0xff] }
   0xa   :  { %68 = vmatpush.msra.mxu0 %v39_v8  ;;  %127 = vmatpush.msra.mxu2 %v118_v18  ;;  %v49_v26 = vld [vmem:[%s472_s1 + $0xa8] sm:$0xff]  ;;  %v115_v27 = vld [vmem:[%s473_s3 + $0x50] sm:$0xff]  ;;  %v48_v29 = vld [vmem:[%s472_s1 + $0xa0] sm:$0xff] }
   0xb   :  { %88 = vmatpush.msra.mxu1 %v55_v9  ;;  %v114_v30 = vld [vmem:[%s473_s3 + $0x48] sm:$0xff]  ;;  %v31_v31 = vld [vmem:[%s472_s1 + $0x18] sm:$0xff]  ;;  %v113_v33 = vld [vmem:[%s473_s3 + $0x40] sm:$0xff] }
   0xc   :  { %69 = vmatpush.msra.mxu0 %v38_v10  ;;  %128 = vmatpush.msra.mxu2 %v117_v21  ;;  %v47_v32 = vld [vmem:[%s472_s1 + $0x98] sm:$0xff]  ;;  %v30_v34 = vld [vmem:[%s472_s1 + $0x10] sm:$0xff]  ;;  %v29_v37 = vld [vmem:[%s472_s1 + $0x8] sm:$0xff] }
   0xd   :  { %89 = vmatpush.msra.mxu1 %v54_v11  ;;  %v46_v35 = vld [vmem:[%s472_s1 + $0x90] sm:$0xff]  ;;  %v112_v36 = vld [vmem:[%s473_s3 + $0x38] sm:$0xff]  ;;  %v45_v38 = vld [vmem:[%s472_s1 + $0x88] sm:$0xff] }
   0xe   :  { %70 = vmatpush.msra.mxu0 %v37_v12  ;;  %129 = vmatpush.msra.mxu2 %v116_v24  ;;  %v111_v39 = vld [vmem:[%s473_s3 + $0x30] sm:$0xff]  ;;  %v28_v40 = vld [vmem:[%s472_s1] sm:$0xff]  ;;  %v27_v43 = vld [vmem:[%s475_s0 + $0x8] sm:$0xff] }
   0xf   :  { %90 = vmatpush.msra.mxu1 %v53_v13  ;;  %v44_v41 = vld [vmem:[%s472_s1 + $0x80] sm:$0xff]  ;;  %v110_v44 = vld [vmem:[%s473_s3 + $0x28] sm:$0xff]  ;;  %v108_v46 = vld [vmem:[%s473_s3 + $0x18] sm:$0xff] }
  0x10   :  { %71 = vmatpush.msra.mxu0 %v36_v16  ;;  %130 = vmatpush.msra.mxu2 %v115_v27  ;;  %v26_v42 = vld [vmem:[%s475_s0] sm:$0xff]  ;;  %v107_v47 = vld [vmem:[%s473_s3 + $0x10] sm:$0xff]  ;;  %v106_v48 = vld [vmem:[%s473_s3 + $0x8] sm:$0xff] }
  0x11   :  { %91 = vmatpush.msra.mxu1 %v52_v17  ;;  %v109_v45 = vld [vmem:[%s473_s3 + $0x20] sm:$0xff]  ;;  %v161_v50 = vld [vmem:[%s477_s5 + $0x78] sm:$0xff]  ;;  %v160_v51 = vld [vmem:[%s477_s5 + $0x70] sm:$0xff] }
  0x12   :  { %72 = vmatpush.msra.mxu0 %v35_v19  ;;  %131 = vmatpush.msra.mxu2 %v114_v30  ;;  %v105_v49 = vld [vmem:[%s473_s3] sm:$0xff]  ;;  %v159_v52 = vld [vmem:[%s477_s5 + $0x68] sm:$0xff]  ;;  %v157_v54 = vld [vmem:[%s477_s5 + $0x58] sm:$0xff] }
  0x13   :  { %92 = vmatpush.msra.mxu1 %v51_v20  ;;  %166 = vmatpush.msra.mxu3 %v161_v50  ;;  %v158_v53 = vld [vmem:[%s477_s5 + $0x60] sm:$0xff]  ;;  %v156_v55 = vld [vmem:[%s477_s5 + $0x50] sm:$0xff]  ;;  %v155_v56 = vld [vmem:[%s477_s5 + $0x48] sm:$0xff] }
  0x14   :  { %73 = vmatpush.msra.mxu0 %v34_v22  ;;  %132 = vmatpush.msra.mxu2 %v113_v33  ;;  %v154_v57 = vld [vmem:[%s477_s5 + $0x40] sm:$0xff]  ;;  %v153_v58 = vld [vmem:[%s477_s5 + $0x38] sm:$0xff]  ;;  %v152_v59 = vld [vmem:[%s477_s5 + $0x30] sm:$0xff] }
  0x15   :  { %93 = vmatpush.msra.mxu1 %v50_v23  ;;  %167 = vmatpush.msra.mxu3 %v160_v51  ;;  %v211_v60 = vld [vmem:[%s474_s2] ss:$0 sm:$0xff]  ;;  %v151_v61 = vld [vmem:[%s477_s5 + $0x28] sm:$0xff]  ;;  %v149_v4 = vld [vmem:[%s477_s5 + $0x18] sm:$0xff] }
  0x16   :  { %74 = vmatpush.msra.mxu0 %v33_v25  ;;  %133 = vmatpush.msra.mxu2 %v112_v36  ;;  %v150_v3 = vld [vmem:[%s477_s5 + $0x20] sm:$0xff]  ;;  %v148_v5 = vld [vmem:[%s477_s5 + $0x10] sm:$0xff]  ;;  %v147_v6 = vld [vmem:[%s477_s5 + $0x8] sm:$0xff] }
  0x17   :  { %94 = vmatpush.msra.mxu1 %v49_v26  ;;  %168 = vmatpush.msra.mxu3 %v159_v52  ;;  %v146_v7 = vld [vmem:[%s477_s5] sm:$0xff] }
  0x18   :  { %75 = vmatpush.msra.mxu0 %v32_v28  ;;  %134 = vmatpush.msra.mxu2 %v111_v39  ;;  %v212_v8 = vld [vmem:[%s476_s4] ss:$0 sm:$0xff] }
  0x19   :  { %95 = vmatpush.msra.mxu1 %v48_v29  ;;  %169 = vmatpush.msra.mxu3 %v158_v53  ;;  %v213_v12 = vld [vmem:[%s478_s6] ss:$0 sm:$0xff] }
  0x1a   :  { %76 = vmatpush.msra.mxu0 %v31_v31  ;;  %135 = vmatpush.msra.mxu2 %v110_v44 }
  0x1b   :  { %96 = vmatpush.msra.mxu1 %v47_v32  ;;  %170 = vmatpush.msra.mxu3 %v157_v54 }
  0x1c   :  { %77 = vmatpush.msra.mxu0 %v30_v34  ;;  %136 = vmatpush.msra.mxu2 %v109_v45 }
  0x1d   :  { %97 = vmatpush.msra.mxu1 %v46_v35  ;;  %171 = vmatpush.msra.mxu3 %v156_v55 }
  0x1e   :  { %78 = vmatpush.msra.mxu0 %v29_v37  ;;  %137 = vmatpush.msra.mxu2 %v108_v46 }
  0x1f   :  { %98 = vmatpush.msra.mxu1 %v45_v38  ;;  %172 = vmatpush.msra.mxu3 %v155_v56 }
  0x20   :  { %79 = vmatpush.msra.mxu0 %v28_v40  ;;  %138 = vmatpush.msra.mxu2 %v107_v47 }
  0x21   :  { %99 = vmatpush.msra.mxu1 %v44_v41  ;;  %80 = vmatmul.f32.vlgmr.msra.gmra.mxu0 %v26_v42 }
  0x22   :  { %100 = vmatmul.f32.vlgmr.msra.gmra.mxu1 %v27_v43  ;;  %139 = vmatpush.msra.mxu2 %v106_v48 }
  0x23   :  { %173 = vmatpush.msra.mxu3 %v154_v57 }
  0x24   :  { %140 = vmatpush.msra.mxu2 %v105_v49 }
  0x25   :  { %174 = vmatpush.msra.mxu3 %v153_v58 }
  0x27   :  { %175 = vmatpush.msra.mxu3 %v152_v59 }
  0x29   :  { %176 = vmatpush.msra.mxu3 %v151_v61 }
  0x2b   :  { %177 = vmatpush.msra.mxu3 %v150_v3 }
  0x2d   :  { %178 = vmatpush.msra.mxu3 %v149_v4 }
  0x2f   :  { %179 = vmatpush.msra.mxu3 %v148_v5 }
  0x31   :  { %180 = vmatpush.msra.mxu3 %v147_v6 }
  0x33   :  { %181 = vmatpush.msra.mxu3 %v146_v7 }
  0x9e   :  { %v81_v62 = vpop.f32.mrf.mxu0 }
  0x9f   :  { %v101_v63 = vpop.f32.mrf.mxu1  ;;  %v82_v0 = vadd.f32 %v211_v60, %v81_v62 }
  0xa1   :  { %v102_v1 = vadd.f32 %v101_v63, %v82_v0 }
  0xa3   :  { %214 = vtanh.f32 %v102_v1 }
  0xa9   :  { %v215_v2 = vpop.eup %214 }
  0xaa   :  { %141 = vmatmul.f32.vlgmr.msra.gmra.mxu2 %v215_v2 }
 0x12d   :  { %v142_v9 = vpop.f32.mrf.mxu2 }
 0x12e   :  { %v143_v10 = vadd.f32 %v212_v8, %v142_v9 }
 0x130   :  { %216 = vtanh.f32 %v143_v10 }
 0x136   :  { %v217_v11 = vpop.eup %216 }
 0x137   :  { %182 = vmatmul.f32.vlgmr.msra.gmra.mxu3 %v217_v11 }
 0x1ba   :  { %v183_v13 = vpop.f32.mrf.mxu3 }
 0x1bb   :  { %v184_v14 = vadd.f32 %v213_v12, %v183_v13 }
 0x1bd   :  { %v210_v15 = vmul.f32 -1.442695, %v184_v14 }
 0x1bf   :  { %218 = vpow2.f32 %v210_v15 }
 0x1c5   :  { %v219_v16 = vpop.eup %218 }
 0x1c6   :  { %v189_v17 = vadd.f32 1.0, %v219_v16 }
 0x1c8   :  { %220 = vrcp.f32 %v189_v17  ;;  %v201_v21 = vand.u32 2147483648, %v189_v17  ;;  %v199_v23 = vand.u32 2147483647, %v189_v17  ;;  %vm195_vm1 = vweird.f32 %v189_v17 }
 0x1ca   :  { %v202_v25 = vor.u32 1.1754944e-38, %v201_v21  ;;  %vm200_vm3 = vcmp.eq.f32.partialorder %v199_v23, 8.507059e+37 }
 0x1ce   :  { %v221_v18 = vpop.eup %220 }
 0x1cf   :  { %v191_v19 = vmul.f32 %v221_v18, %v189_v17  ;;  %vm196_vm0 = vweird.f32 %v221_v18 }
 0x1d0   :  { %vm197_vm2 = vmor %vm195_vm1, %vm196_vm0 }
 0x1d1   :  { %v192_v20 = vsub.f32 1.0, %v191_v19 }
 0x1d3   :  { %v193_v22 = vmul.f32 %v221_v18, %v192_v20 }
 0x1d5   :  { %v194_v24 = vadd.f32 %v221_v18, %v193_v22 }
 0x1d7   :  { %v198_v26 = vsel %vm197_vm2, %v221_v18, %v194_v24 }
 0x1d8   :  { %v203_v27 = vsel %vm200_vm3, %v202_v25, %v198_v26 }
 0x1d9   :  { %205 = vst [vmem:[%s479_s7] sm:$0xff] %v203_v27 }

</bundles_post_ra>
